<compile_context>
chip_gen: v5e
topology: v5e:2x2
jax: 0.10.0
libtpu: 0.0.40
codegen_flags: <defaults>
</compile_context>

<pallas_src>
import functools

import jax
import jax.numpy as jnp
from jax.experimental import pallas as pl
from jax.experimental.pallas import tpu as pltpu

LATENT, POSE = 8, 1
FLAT = 64 * 4 * 4  # 1024

_SINGLE_BLOCK_MAX_M = 256   # small-M layers: one block (v7x feedback threshold)
_TM_MAX = 2048              # row-tile upper bound (a few MB of VMEM at most)
_VMEM_LIMIT = 32 * 1024 * 1024  # explicit; leaves headroom on v7x (64 MiB VMEM)


def _round_up(x, m):
    return ((x + m - 1) // m) * m


# ----------------------------------------------------------------------------
# Generic row-tiled pallas_call helper
# ----------------------------------------------------------------------------
def _rowwise_pallas(kernel, row_ins, const_ins, out_cols, out_dtypes):
    """Run kernel(*row_refs, *const_refs, *out_refs); row_ins / outputs tiled on
    dim 0.  Small M -> single block; otherwise >=2 'parallel' row blocks (v7x
    megacore) with the ragged final block handled by Pallas masking (no
    pad/slice HBM copies)."""
    M = row_ins[0].shape[0]
    out_shape = tuple(jax.ShapeDtypeStruct((M, c), d)
                      for c, d in zip(out_cols, out_dtypes))
    if M <= _SINGLE_BLOCK_MAX_M:
        return pl.pallas_call(kernel, out_shape=out_shape)(*row_ins, *const_ins)

    tm = min(_TM_MAX, _round_up(pl.cdiv(M, 2), 8))   # always >= 2 grid blocks
    in_specs = ([pl.BlockSpec((tm, a.shape[1]), lambda i: (i, 0)) for a in row_ins]
                + [pl.BlockSpec(a.shape, lambda i: (0, 0)) for a in const_ins])
    out_specs = tuple(pl.BlockSpec((tm, c), lambda i: (i, 0)) for c in out_cols)
    return pl.pallas_call(
        kernel,
        out_shape=out_shape,
        grid=(pl.cdiv(M, tm),),
        in_specs=in_specs,
        out_specs=out_specs,
        compiler_params=pltpu.CompilerParams(
            dimension_semantics=("parallel",),
            vmem_limit_bytes=_VMEM_LIMIT),
    )(*row_ins, *const_ins)


# ----------------------------------------------------------------------------
# Pallas kernels
# ----------------------------------------------------------------------------
def _gemm_kernel(x_ref, w_ref, b_ref, o_ref, *, relu):
    acc = jnp.dot(x_ref[...], w_ref[...], preferred_element_type=jnp.float32)
    acc = acc + b_ref[...]
    if relu:
        acc = jnp.maximum(acc, 0.0)
    o_ref[...] = acc.astype(o_ref.dtype)


def _gemm2_kernel(x_ref, w1_ref, b1_ref, w2_ref, b2_ref, o_ref):
    """relu(x@w1+b1) @ w2 + b2 — used to fuse ConvTranspose d3 with pointwise d4."""
    h = jnp.dot(x_ref[...], w1_ref[...], preferred_element_type=jnp.float32)
    h = jnp.maximum(h + b1_ref[...], 0.0)
    o = jnp.dot(h.astype(jnp.bfloat16), w2_ref[...],
                preferred_element_type=jnp.float32)
    o_ref[...] = (o + b2_ref[...]).astype(o_ref.dtype)


def _heads_decode_kernel(x_ref, eps_ref, wh_ref, bh_ref, wz_ref, wp_ref, bd_ref,
                         mu_ref, lv_ref, z_ref, zp_ref, d_ref):
    """Fused [mu | log_var | pose] heads + reparameterisation + decoder Linear.
    Emits mu / log_var / z / z_pose / dec directly (no XLA slicing/concat)."""
    h = jnp.dot(x_ref[...], wh_ref[...], preferred_element_type=jnp.float32)
    h = h + bh_ref[...]                              # (M, 17) = [mu | lv | pose]
    mu = h[:, :LATENT]
    log_var = h[:, LATENT:2 * LATENT]
    pose = h[:, 2 * LATENT:]
    z = eps_ref[...] * jnp.exp(0.5 * log_var) + mu   # exp on EUP, all f32
    mu_ref[...] = mu
    lv_ref[...] = log_var
    z_ref[...] = z
    zp_ref[:, :POSE] = pose                          # z_pose = [pose | z]
    zp_ref[:, POSE:] = z
    dec = jnp.dot(z.astype(jnp.bfloat16), wz_ref[...],
                  preferred_element_type=jnp.float32)
    dec = dec + pose * wp_ref[...] + bd_ref[...]     # pose column as rank-1 update
    d_ref[...] = dec.astype(d_ref.dtype)


def pallas_linear(x, w, b, relu=False, out_dtype=jnp.float32):
    kern = functools.partial(_gemm_kernel, relu=relu)
    (out,) = _rowwise_pallas(kern, (x,), (w, b), (w.shape[1],), (out_dtype,))
    return out


def pallas_linear2(x, w1, b1, w2, b2, out_dtype=jnp.float32):
    (out,) = _rowwise_pallas(_gemm2_kernel, (x,), (w1, b1, w2, b2),
                             (w2.shape[1],), (out_dtype,))
    return out


def fused_heads_decode(encoded, fp, eps):
    # TODO(synk): torch.randn_like noise is supplied as an explicit eps input;
    # could use pltpu.prng_seed / pltpu.prng_random_bits in-kernel instead.
    mu, log_var, z, z_pose, dec = _rowwise_pallas(
        _heads_decode_kernel,
        (encoded, eps.astype(jnp.float32)),
        (fp["heads_w"], fp["heads_b"], fp["dec_wz"], fp["dec_wp"], fp["dec_b"]),
        (LATENT, LATENT, LATENT, LATENT + POSE, FLAT),
        (jnp.float32, jnp.float32, jnp.float32, jnp.float32, jnp.bfloat16))
    return mu, log_var, z, z_pose, dec


# ----------------------------------------------------------------------------
# Conv / ConvTranspose built on the Pallas GEMMs (NHWC, bf16 activations)
# ----------------------------------------------------------------------------
def _im2col_nhwc(x, k, stride, pt, pb, pleft, pright):
    """x:(N,H,W,C) -> ((N*Ho*Wo, k*k*C), Ho, Wo); patch column order (ky,kx,c)."""
    N, H, W, C = x.shape
    xp = jnp.pad(x, ((0, 0), (pt, pb), (pleft, pright), (0, 0)))
    Ho = (H + pt + pb - k) // stride + 1
    Wo = (W + pleft + pright - k) // stride + 1
    cols = []
    for i in range(k):
        for j in range(k):
            cols.append(xp[:, i:i + stride * Ho:stride, j:j + stride * Wo:stride, :])
    patches = cols[0] if len(cols) == 1 else jnp.concatenate(cols, axis=-1)
    # TODO(synk): in-kernel im2col (doubly-strided ref[pl.ds(..., stride=2)]
    # window reads from a VMEM-resident feature map) would remove this patch
    # tensor's HBM round trip and enable whole-encoder fusion; kept in XLA here
    # because that lowering path is unverified on this toolchain.
    return patches.reshape(N * Ho * Wo, k * k * C), Ho, Wo


def conv2d_nhwc(x, w2d, b, k, stride, pad, relu, out_dtype=jnp.bfloat16):
    """PyTorch Conv2d semantics in NHWC. w2d:(k*k*Cin, Cout) pre-transposed."""
    N = x.shape[0]
    cout = w2d.shape[1]
    patches, Ho, Wo = _im2col_nhwc(x, k, stride, pad, pad, pad, pad)
    out = pallas_linear(patches, w2d, b, relu=relu, out_dtype=out_dtype)
    return out.reshape(N, Ho, Wo, cout)


def conv_transpose2d_nhwc(x, w_all, b_all, k, p, relu, out_dtype=jnp.bfloat16):
    """PyTorch ConvTranspose2d (stride 2) via stride-phase decomposition:
      * one stride-1 im2col with a ceil(k/2) window over the un-upsampled input,
      * one GEMM producing 2*2*Cout phase channels per block position,
      * one transpose+reshape+slice to interleave the phases (single pass —
        replaces the former 4x strided-scatter loop).
    out[oy] = sum_t x[q-t] * w[r + 2t],  r=(oy+p)%2, q=(oy+p)//2."""
    s = 2
    assert p in (0, 1)
    N, H, W, _ = x.shape
    km = -(-k // s)                          # ceil(k/2) shared window size
    cout = w_all.shape[1] // (s * s)
    Ho = (H - 1) * s - 2 * p + k
    Wo = (W - 1) * s - 2 * p + k
    q_max_y = (Ho - 1 + p) // s
    q_max_x = (Wo - 1 + p) // s
    pad_l = km - 1                           # q_min == 0 for p in {0,1}
    pad_ry = max(0, q_max_y - (H - 1))
    pad_rx = max(0, q_max_x - (W - 1))

    patches, Uy, Ux = _im2col_nhwc(x, km, 1, pad_l, pad_ry, pad_l, pad_rx)
    out = pallas_linear(patches, w_all, b_all, relu=relu, out_dtype=out_dtype)
    out = out.reshape(N, Uy, Ux, s, s, cout)                  # (.., ry, rx, c)
    out = jnp.transpose(out, (0, 1, 3, 2, 4, 5)).reshape(N, s * Uy, s * Ux, cout)
    return out[:, p:p + Ho, p:p + Wo, :]                      # oy = 2u + r - p


def conv_transpose_d3_d4(x, fp):
    """Fused ConvTranspose2d(16,8,3,s2,p1)+ReLU -> ConvTranspose2d(8,1,2,s2,p1).
    d4 has a 1x1 stride-phase window, i.e. it is pointwise on d3's interleaved
    output, so it is applied per d3-phase inside the same kernel via a
    block-diagonal second GEMM.  Output (N, 64, 64) f32."""
    N = x.shape[0]
    patches, U, _ = _im2col_nhwc(x, 2, 1, 1, 0, 1, 0)         # (N*17*17, 64)
    out = pallas_linear2(patches, fp["d3_w"], fp["d3_b"],
                         fp["d4_wbd"], fp["d4_bbd"], out_dtype=jnp.float32)
    # columns ordered (ry, rx, qy, qx); final oy = 4*u + 2*ry + qy - 3
    out = out.reshape(N, U, U, 2, 2, 2, 2)
    out = jnp.transpose(out, (0, 1, 3, 5, 2, 4, 6)).reshape(N, 4 * U, 4 * U)
    return out[:, 3:3 + 64, 3:3 + 64]


# ----------------------------------------------------------------------------
# Parameters: PyTorch-layout init + one-time GEMM-ready preparation
# ----------------------------------------------------------------------------
def init_params(key):
    keys = iter(jax.random.split(key, 32))

    def uinit(shape, fan_in):
        bound = 1.0 / jnp.sqrt(fan_in)
        return jax.random.uniform(next(keys), shape, jnp.float32, -bound, bound)

    p = {}
    enc = [(1, 8), (8, 16), (16, 32), (32, 64)]
    for n, (ci, co) in enumerate(enc, 1):
        p[f"e{n}_w"] = uinit((co, ci, 3, 3), ci * 9)        # PyTorch (Cout,Cin,k,k)
        p[f"e{n}_b"] = uinit((co,), ci * 9)
    for name, out_dim in (("mu", LATENT), ("lv", LATENT), ("pose", POSE)):
        p[f"{name}_w"] = uinit((FLAT, out_dim), FLAT)       # stored (in, out)
        p[f"{name}_b"] = uinit((out_dim,), FLAT)
    p["dec_w"] = uinit((LATENT + POSE, FLAT), LATENT + POSE)
    p["dec_b"] = uinit((FLAT,), LATENT + POSE)
    dec = [("d1", 64, 32, 3), ("d2", 32, 16, 3), ("d3", 16, 8, 3), ("d4", 8, 1, 2)]
    for name, ci, co, k in dec:
        p[f"{name}_w"] = uinit((ci, co, k, k), ci * k * k)  # PyTorch (Cin,Cout,k,k)
        p[f"{name}_b"] = uinit((co,), ci * k * k)
    return p


def _convT_gemm_weight(w, k, s):
    """(Cin,Cout,k,k) ConvTranspose weight -> (km*km*Cin, s*s*Cout) stride-phase
    GEMM weight; rows ordered (wy,wx,ci), columns ordered (ry,rx,co)."""
    ci, co = int(w.shape[0]), int(w.shape[1])
    km = -(-k // s)
    w_all = jnp.zeros((km * km * ci, s * s * co), jnp.float32)
    for wy in range(km):
        for wx in range(km):
            for ry in range(s):
                for rx in range(s):
                    ky = ry + s * (km - 1 - wy)
                    kx = rx + s * (km - 1 - wx)
                    if ky < k and kx < k:
                        r0 = (wy * km + wx) * ci
                        c0 = (ry * s + rx) * co
                        w_all = w_all.at[r0:r0 + ci, c0:c0 + co].set(w[:, :, ky, kx])
    return w_all


def prepare_params(p):
    """One-time reshape/transpose/fuse of all weights into GEMM-ready bf16
    matrices (f32 biases); the jitted forward does no weight glue."""
    bf16, f32 = jnp.bfloat16, jnp.float32
    fp = {}
    enc = [("e1", 1, 8, 3), ("e2", 8, 16, 3), ("e3", 16, 32, 3), ("e4", 32, 64, 3)]
    for name, ci, co, k in enc:
        w = p[f"{name}_w"]                                   # (co, ci, k, k)
        fp[f"{name}_w"] = jnp.transpose(w, (2, 3, 1, 0)).reshape(k * k * ci, co).astype(bf16)
        fp[f"{name}_b"] = p[f"{name}_b"].reshape(1, co).astype(f32)

    # flatten-order permutation: torch flattens NCHW (c,h,w); we flatten NHWC (h,w,c)
    perm = jnp.arange(FLAT).reshape(64, 4, 4).transpose(1, 2, 0).reshape(-1)

    fp["heads_w"] = jnp.concatenate(
        [p["mu_w"][perm], p["lv_w"][perm], p["pose_w"][perm]], axis=1).astype(bf16)
    fp["heads_b"] = jnp.concatenate(
        [p["mu_b"], p["lv_b"], p["pose_b"]]).reshape(1, -1).astype(f32)

    dec_w = p["dec_w"][:, perm]                              # (9, 1024), NHWC-ordered cols
    fp["dec_wp"] = dec_w[0:1, :].astype(f32)                 # pose row (rank-1 update)
    fp["dec_wz"] = dec_w[1:, :].astype(bf16)                 # z rows (8, 1024)
    fp["dec_b"] = p["dec_b"][perm].reshape(1, -1).astype(f32)

    for name, k in (("d1", 3), ("d2", 3), ("d3", 3)):
        fp[f"{name}_w"] = _convT_gemm_weight(p[f"{name}_w"], k, 2).astype(bf16)
        fp[f"{name}_b"] = jnp.tile(p[f"{name}_b"], 4).reshape(1, -1).astype(f32)

    # d4 folded into d3's kernel: block-diagonal (one (8->4) block per d3 phase).
    w4 = _convT_gemm_weight(p["d4_w"], 2, 2)                 # (8, 4), cols (qy,qx)
    wbd = jnp.zeros((4 * 8, 4 * 4), jnp.float32)
    for i in range(4):
        wbd = wbd.at[8 * i:8 * i + 8, 4 * i:4 * i + 4].set(w4)
    fp["d4_wbd"] = wbd.astype(bf16)                          # (32, 16)
    b4 = jnp.tile(p["d4_b"], 4).reshape(1, -1)               # (1, 4)
    fp["d4_bbd"] = jnp.tile(b4, (1, 4)).astype(f32)          # (1, 16)
    return fp


# ----------------------------------------------------------------------------
# ShapeVAE forward (latent_dims=8, pose_dims=1, spatial_dims=2)
# ----------------------------------------------------------------------------
def shape_vae_forward(x, fp, eps):
    N = x.shape[0]
    assert x.shape[1:] == (1, 64, 64)   # encoder flattens to 64*4*4
    # ----- encode (NHWC, bf16 activations, fused bias+ReLU GEMMs) -----
    # NCHW -> NHWC is a free reshape because C == 1.
    h = x.reshape(N, 64, 64, 1).astype(jnp.bfloat16)
    # TODO(synk): e1 is a (M,9)x(9,8) GEMM (<1% MXU util); a VPU path inside a
    # fused encoder kernel would avoid its patch materialization entirely.
    h = conv2d_nhwc(h, fp["e1_w"], fp["e1_b"], 3, 2, 1, relu=True)    # (N,32,32, 8)
    h = conv2d_nhwc(h, fp["e2_w"], fp["e2_b"], 3, 2, 1, relu=True)    # (N,16,16,16)
    h = conv2d_nhwc(h, fp["e3_w"], fp["e3_b"], 3, 2, 1, relu=True)    # (N, 8, 8,32)
    h = conv2d_nhwc(h, fp["e4_w"], fp["e4_b"], 3, 2, 1, relu=True)    # (N, 4, 4,64)
    encoded = h.reshape(N, FLAT)

    # ----- heads + reparameterise + decoder Linear (single fused kernel) -----
    mu, log_var, z, z_pose, dec = fused_heads_decode(encoded, fp, eps)

    # ----- decode (stride-phase ConvTranspose GEMMs, d3+d4 fused) -----
    d = dec.reshape(N, 4, 4, 64)                                      # NHWC order
    d = conv_transpose2d_nhwc(d, fp["d1_w"], fp["d1_b"], 3, 0, relu=True)   # (N, 9, 9,32)
    d = conv_transpose2d_nhwc(d, fp["d2_w"], fp["d2_b"], 3, 1, relu=True)   # (N,17,17,16)
    y = conv_transpose_d3_d4(d, fp)                                         # (N,64,64) f32
    x_rec = y.reshape(N, 1, 64, 64)                                   # free (C == 1)
    return x_rec, z, z_pose, mu, log_var


if __name__ == "__main__":
    key = jax.random.PRNGKey(0)
    k_params, k_x, k_eps = jax.random.split(key, 3)

    batch = 2
    # Encoder's 4 stride-2 convs flatten to 64*4*4, which requires 64x64 input.
    x = jax.random.normal(k_x, (batch, 1, 64, 64), jnp.float32)
    eps = jax.random.normal(k_eps, (batch, LATENT), jnp.float32)

    params = init_params(k_params)
    fparams = prepare_params(params)          # one-time GEMM-ready weights

    fwd = jax.jit(shape_vae_forward)
    x_rec, z, z_pose, mu, log_var = fwd(x, fparams, eps)
    jax.block_until_ready((x_rec, z, z_pose, mu, log_var))

    assert x_rec.shape == (batch, 1, 64, 64)
    assert z.shape == (batch, LATENT)
    assert z_pose.shape == (batch, LATENT + POSE)
    assert mu.shape == (batch, LATENT)
    assert log_var.shape == (batch, LATENT)
    assert bool(jnp.all(jnp.isfinite(x_rec)))
    assert bool(jnp.all(jnp.isfinite(z)))

    print("KERNEL_OK")
</pallas_src>

<mosaic_0001>
module attributes {stable_mosaic.version = 11 : i64} {
  func.func @_gemm_kernel(%arg0: i32, %arg1: memref<1024x9xbf16, #tpu.memory_space<vmem>>, %arg2: memref<9x8xbf16, #tpu.memory_space<vmem>>, %arg3: memref<1x8xf32, #tpu.memory_space<vmem>>, %arg4: memref<1024x8xbf16, #tpu.memory_space<vmem>>) attributes {dimension_semantics = [#tpu.dimension_semantics<parallel>], iteration_bounds = array<i64: 2>, scalar_prefetch = 0 : i64, scratch_operands = 0 : i64, tpu.core_type = #tpu.core_type<tc>, window_params = [{transform_indices = @transform_0, window_bounds = array<i64: 1024, 9>}, {pipeline_mode = #tpu.pipeline_mode<synchronous>, transform_indices = @transform_1, window_bounds = array<i64: 9, 8>}, {pipeline_mode = #tpu.pipeline_mode<synchronous>, transform_indices = @transform_2, window_bounds = array<i64: 1, 8>}, {transform_indices = @transform_3, window_bounds = array<i64: 1024, 8>}]} {
    %c0 = arith.constant 0 : index
    %c0_0 = arith.constant 0 : index
    %0 = vector.load %arg1[%c0, %c0_0] : memref<1024x9xbf16, #tpu.memory_space<vmem>>, vector<1024x9xbf16>
    %c0_1 = arith.constant 0 : index
    %c0_2 = arith.constant 0 : index
    %1 = vector.load %arg2[%c0_1, %c0_2] : memref<9x8xbf16, #tpu.memory_space<vmem>>, vector<9x8xbf16>
    %cst = arith.constant dense<0.000000e+00> : vector<1024x8xf32>
    %2 = tpu.matmul %0, %1, %cst {dimension_numbers = #tpu.dot_dimension_numbers<[1], [0], [0], [1], [0, 0, 1, 1], [], []>} : vector<1024x9xbf16>, vector<9x8xbf16>, vector<1024x8xf32> -> vector<1024x8xf32>
    %c0_3 = arith.constant 0 : index
    %c0_4 = arith.constant 0 : index
    %3 = vector.load %arg3[%c0_3, %c0_4] : memref<1x8xf32, #tpu.memory_space<vmem>>, vector<1x8xf32>
    %4 = vector.broadcast %3 : vector<1x8xf32> to vector<1024x8xf32>
    %5 = arith.addf %2, %4 : vector<1024x8xf32>
    %cst_5 = arith.constant 0.000000e+00 : f32
    %6 = vector.broadcast %cst_5 : f32 to vector<1024x8xf32>
    %7 = arith.maximumf %5, %6 : vector<1024x8xf32>
    %8 = arith.truncf %7 : vector<1024x8xf32> to vector<1024x8xbf16>
    %c0_6 = arith.constant 0 : index
    %c0_7 = arith.constant 0 : index
    %9 = vector.load %arg4[%c0_6, %c0_7] : memref<1024x8xbf16, #tpu.memory_space<vmem>>, vector<1024x8xbf16>
    tpu.vector_store %arg4[%c0_6, %c0_7], %8 {strides = array<i32>} : memref<1024x8xbf16, #tpu.memory_space<vmem>>, vector<1024x8xbf16>,
    return
  }
  func.func @transform_0(%arg0: i32) -> (i32, i32) {
    %c0_i32 = arith.constant 0 : i32
    %c0_i32_0 = arith.constant 0 : i32
    return %arg0, %c0_i32 : i32, i32
  }
  func.func @transform_1(%arg0: i32) -> (i32, i32) {
    %c0_i32 = arith.constant 0 : i32
    %c0_i32_0 = arith.constant 0 : i32
    %c0_i32_1 = arith.constant 0 : i32
    return %c0_i32, %c0_i32_0 : i32, i32
  }
  func.func @transform_2(%arg0: i32) -> (i32, i32) {
    %c0_i32 = arith.constant 0 : i32
    %c0_i32_0 = arith.constant 0 : i32
    %c0_i32_1 = arith.constant 0 : i32
    return %c0_i32, %c0_i32_0 : i32, i32
  }
  func.func @transform_3(%arg0: i32) -> (i32, i32) {
    %c0_i32 = arith.constant 0 : i32
    %c0_i32_0 = arith.constant 0 : i32
    return %arg0, %c0_i32 : i32, i32
  }
}

module attributes {stable_mosaic.version = 11 : i64} {
  func.func @_gemm_kernel(%arg0: i32, %arg1: memref<256x72xbf16, #tpu.memory_space<vmem>>, %arg2: memref<72x16xbf16, #tpu.memory_space<vmem>>, %arg3: memref<1x16xf32, #tpu.memory_space<vmem>>, %arg4: memref<256x16xbf16, #tpu.memory_space<vmem>>) attributes {dimension_semantics = [#tpu.dimension_semantics<parallel>], iteration_bounds = array<i64: 2>, scalar_prefetch = 0 : i64, scratch_operands = 0 : i64, tpu.core_type = #tpu.core_type<tc>, window_params = [{transform_indices = @transform_0, window_bounds = array<i64: 256, 72>}, {pipeline_mode = #tpu.pipeline_mode<synchronous>, transform_indices = @transform_1, window_bounds = array<i64: 72, 16>}, {pipeline_mode = #tpu.pipeline_mode<synchronous>, transform_indices = @transform_2, window_bounds = array<i64: 1, 16>}, {transform_indices = @transform_3, window_bounds = array<i64: 256, 16>}]} {
    %c0 = arith.constant 0 : index
    %c0_0 = arith.constant 0 : index
    %0 = vector.load %arg1[%c0, %c0_0] : memref<256x72xbf16, #tpu.memory_space<vmem>>, vector<256x72xbf16>
    %c0_1 = arith.constant 0 : index
    %c0_2 = arith.constant 0 : index
    %1 = vector.load %arg2[%c0_1, %c0_2] : memref<72x16xbf16, #tpu.memory_space<vmem>>, vector<72x16xbf16>
    %cst = arith.constant dense<0.000000e+00> : vector<256x16xf32>
    %2 = tpu.matmul %0, %1, %cst {dimension_numbers = #tpu.dot_dimension_numbers<[1], [0], [0], [1], [0, 0, 1, 1], [], []>} : vector<256x72xbf16>, vector<72x16xbf16>, vector<256x16xf32> -> vector<256x16xf32>
    %c0_3 = arith.constant 0 : index
    %c0_4 = arith.constant 0 : index
    %3 = vector.load %arg3[%c0_3, %c0_4] : memref<1x16xf32, #tpu.memory_space<vmem>>, vector<1x16xf32>
    %4 = vector.broadcast %3 : vector<1x16xf32> to vector<256x16xf32>
    %5 = arith.addf %2, %4 : vector<256x16xf32>
    %cst_5 = arith.constant 0.000000e+00 : f32
    %6 = vector.broadcast %cst_5 : f32 to vector<256x16xf32>
    %7 = arith.maximumf %5, %6 : vector<256x16xf32>
    %8 = arith.truncf %7 : vector<256x16xf32> to vector<256x16xbf16>
    %c0_6 = arith.constant 0 : index
    %c0_7 = arith.constant 0 : index
    %9 = vector.load %arg4[%c0_6, %c0_7] : memref<256x16xbf16, #tpu.memory_space<vmem>>, vector<256x16xbf16>
    tpu.vector_store %arg4[%c0_6, %c0_7], %8 {strides = array<i32>} : memref<256x16xbf16, #tpu.memory_space<vmem>>, vector<256x16xbf16>,
    return
  }
  func.func @transform_0(%arg0: i32) -> (i32, i32) {
    %c0_i32 = arith.constant 0 : i32
    %c0_i32_0 = arith.constant 0 : i32
    return %arg0, %c0_i32 : i32, i32
  }
  func.func @transform_1(%arg0: i32) -> (i32, i32) {
    %c0_i32 = arith.constant 0 : i32
    %c0_i32_0 = arith.constant 0 : i32
    %c0_i32_1 = arith.constant 0 : i32
    return %c0_i32, %c0_i32_0 : i32, i32
  }
  func.func @transform_2(%arg0: i32) -> (i32, i32) {
    %c0_i32 = arith.constant 0 : i32
    %c0_i32_0 = arith.constant 0 : i32
    %c0_i32_1 = arith.constant 0 : i32
    return %c0_i32, %c0_i32_0 : i32, i32
  }
  func.func @transform_3(%arg0: i32) -> (i32, i32) {
    %c0_i32 = arith.constant 0 : i32
    %c0_i32_0 = arith.constant 0 : i32
    return %arg0, %c0_i32 : i32, i32
  }
}

module attributes {stable_mosaic.version = 11 : i64} {
  func.func @_gemm_kernel(%arg0: memref<128x144xbf16, #tpu.memory_space<vmem>>, %arg1: memref<144x32xbf16, #tpu.memory_space<vmem>>, %arg2: memref<1x32xf32, #tpu.memory_space<vmem>>, %arg3: memref<128x32xbf16, #tpu.memory_space<vmem>>) attributes {dimension_semantics = [], scalar_prefetch = 0 : i64, scratch_operands = 0 : i64, tpu.core_type = #tpu.core_type<tc>} {
    %c0 = arith.constant 0 : index
    %c0_0 = arith.constant 0 : index
    %0 = vector.load %arg0[%c0, %c0_0] : memref<128x144xbf16, #tpu.memory_space<vmem>>, vector<128x144xbf16>
    %c0_1 = arith.constant 0 : index
    %c0_2 = arith.constant 0 : index
    %1 = vector.load %arg1[%c0_1, %c0_2] : memref<144x32xbf16, #tpu.memory_space<vmem>>, vector<144x32xbf16>
    %cst = arith.constant dense<0.000000e+00> : vector<128x32xf32>
    %2 = tpu.matmul %0, %1, %cst {dimension_numbers = #tpu.dot_dimension_numbers<[1], [0], [0], [1], [0, 0, 1, 1], [], []>} : vector<128x144xbf16>, vector<144x32xbf16>, vector<128x32xf32> -> vector<128x32xf32>
    %c0_3 = arith.constant 0 : index
    %c0_4 = arith.constant 0 : index
    %3 = vector.load %arg2[%c0_3, %c0_4] : memref<1x32xf32, #tpu.memory_space<vmem>>, vector<1x32xf32>
    %4 = vector.broadcast %3 : vector<1x32xf32> to vector<128x32xf32>
    %5 = arith.addf %2, %4 : vector<128x32xf32>
    %cst_5 = arith.constant 0.000000e+00 : f32
    %6 = vector.broadcast %cst_5 : f32 to vector<128x32xf32>
    %7 = arith.maximumf %5, %6 : vector<128x32xf32>
    %8 = arith.truncf %7 : vector<128x32xf32> to vector<128x32xbf16>
    %c0_6 = arith.constant 0 : index
    %c0_7 = arith.constant 0 : index
    %9 = vector.load %arg3[%c0_6, %c0_7] : memref<128x32xbf16, #tpu.memory_space<vmem>>, vector<128x32xbf16>
    tpu.vector_store %arg3[%c0_6, %c0_7], %8 {strides = array<i32>} : memref<128x32xbf16, #tpu.memory_space<vmem>>, vector<128x32xbf16>,
    return
  }
}

module attributes {stable_mosaic.version = 11 : i64} {
  func.func @_gemm_kernel(%arg0: memref<32x288xbf16, #tpu.memory_space<vmem>>, %arg1: memref<288x64xbf16, #tpu.memory_space<vmem>>, %arg2: memref<1x64xf32, #tpu.memory_space<vmem>>, %arg3: memref<32x64xbf16, #tpu.memory_space<vmem>>) attributes {dimension_semantics = [], scalar_prefetch = 0 : i64, scratch_operands = 0 : i64, tpu.core_type = #tpu.core_type<tc>} {
    %c0 = arith.constant 0 : index
    %c0_0 = arith.constant 0 : index
    %0 = vector.load %arg0[%c0, %c0_0] : memref<32x288xbf16, #tpu.memory_space<vmem>>, vector<32x288xbf16>
    %c0_1 = arith.constant 0 : index
    %c0_2 = arith.constant 0 : index
    %1 = vector.load %arg1[%c0_1, %c0_2] : memref<288x64xbf16, #tpu.memory_space<vmem>>, vector<288x64xbf16>
    %cst = arith.constant dense<0.000000e+00> : vector<32x64xf32>
    %2 = tpu.matmul %0, %1, %cst {dimension_numbers = #tpu.dot_dimension_numbers<[1], [0], [0], [1], [0, 0, 1, 1], [], []>} : vector<32x288xbf16>, vector<288x64xbf16>, vector<32x64xf32> -> vector<32x64xf32>
    %c0_3 = arith.constant 0 : index
    %c0_4 = arith.constant 0 : index
    %3 = vector.load %arg2[%c0_3, %c0_4] : memref<1x64xf32, #tpu.memory_space<vmem>>, vector<1x64xf32>
    %4 = vector.broadcast %3 : vector<1x64xf32> to vector<32x64xf32>
    %5 = arith.addf %2, %4 : vector<32x64xf32>
    %cst_5 = arith.constant 0.000000e+00 : f32
    %6 = vector.broadcast %cst_5 : f32 to vector<32x64xf32>
    %7 = arith.maximumf %5, %6 : vector<32x64xf32>
    %8 = arith.truncf %7 : vector<32x64xf32> to vector<32x64xbf16>
    %c0_6 = arith.constant 0 : index
    %c0_7 = arith.constant 0 : index
    %9 = vector.load %arg3[%c0_6, %c0_7] : memref<32x64xbf16, #tpu.memory_space<vmem>>, vector<32x64xbf16>
    tpu.vector_store %arg3[%c0_6, %c0_7], %8 {strides = array<i32>} : memref<32x64xbf16, #tpu.memory_space<vmem>>, vector<32x64xbf16>,
    return
  }
}

module attributes {stable_mosaic.version = 11 : i64} {
  func.func @_heads_decode_kernel(%arg0: memref<2x1024xbf16, #tpu.memory_space<vmem>>, %arg1: memref<2x8xf32, #tpu.memory_space<vmem>>, %arg2: memref<1024x17xbf16, #tpu.memory_space<vmem>>, %arg3: memref<1x17xf32, #tpu.memory_space<vmem>>, %arg4: memref<8x1024xbf16, #tpu.memory_space<vmem>>, %arg5: memref<1x1024xf32, #tpu.memory_space<vmem>>, %arg6: memref<1x1024xf32, #tpu.memory_space<vmem>>, %arg7: memref<2x8xf32, #tpu.memory_space<vmem>>, %arg8: memref<2x8xf32, #tpu.memory_space<vmem>>, %arg9: memref<2x8xf32, #tpu.memory_space<vmem>>, %arg10: memref<2x9xf32, #tpu.memory_space<vmem>>, %arg11: memref<2x1024xbf16, #tpu.memory_space<vmem>>) attributes {dimension_semantics = [], scalar_prefetch = 0 : i64, scratch_operands = 0 : i64, tpu.core_type = #tpu.core_type<tc>} {
    %c0 = arith.constant 0 : index
    %c0_0 = arith.constant 0 : index
    %0 = vector.load %arg0[%c0, %c0_0] : memref<2x1024xbf16, #tpu.memory_space<vmem>>, vector<2x1024xbf16>
    %c0_1 = arith.constant 0 : index
    %c0_2 = arith.constant 0 : index
    %1 = vector.load %arg2[%c0_1, %c0_2] : memref<1024x17xbf16, #tpu.memory_space<vmem>>, vector<1024x17xbf16>
    %cst = arith.constant dense<0.000000e+00> : vector<2x17xf32>
    %2 = tpu.matmul %0, %1, %cst {dimension_numbers = #tpu.dot_dimension_numbers<[1], [0], [0], [1], [0, 0, 1, 1], [], []>} : vector<2x1024xbf16>, vector<1024x17xbf16>, vector<2x17xf32> -> vector<2x17xf32>
    %c0_3 = arith.constant 0 : index
    %c0_4 = arith.constant 0 : index
    %3 = vector.load %arg3[%c0_3, %c0_4] : memref<1x17xf32, #tpu.memory_space<vmem>>, vector<1x17xf32>
    %4 = vector.broadcast %3 : vector<1x17xf32> to vector<2x17xf32>
    %5 = arith.addf %2, %4 : vector<2x17xf32>
    %6 = vector.extract_strided_slice %5 {offsets = [0, 0], sizes = [2, 8], strides = [1, 1]} : vector<2x17xf32> to vector<2x8xf32>
    %7 = vector.extract_strided_slice %5 {offsets = [0, 8], sizes = [2, 8], strides = [1, 1]} : vector<2x17xf32> to vector<2x8xf32>
    %8 = vector.extract_strided_slice %5 {offsets = [0, 16], sizes = [2, 1], strides = [1, 1]} : vector<2x17xf32> to vector<2x1xf32>
    %c0_5 = arith.constant 0 : index
    %c0_6 = arith.constant 0 : index
    %9 = vector.load %arg1[%c0_5, %c0_6] : memref<2x8xf32, #tpu.memory_space<vmem>>, vector<2x8xf32>
    %cst_7 = arith.constant 5.000000e-01 : f32
    %10 = vector.broadcast %cst_7 : f32 to vector<2x8xf32>
    %11 = arith.mulf %10, %7 : vector<2x8xf32>
    %12 = math.exp %11 : vector<2x8xf32>
    %13 = arith.mulf %9, %12 : vector<2x8xf32>
    %14 = arith.addf %13, %6 : vector<2x8xf32>
    %c0_8 = arith.constant 0 : index
    %c0_9 = arith.constant 0 : index
    %15 = vector.load %arg7[%c0_8, %c0_9] : memref<2x8xf32, #tpu.memory_space<vmem>>, vector<2x8xf32>
    tpu.vector_store %arg7[%c0_8, %c0_9], %6 {strides = array<i32>} : memref<2x8xf32, #tpu.memory_space<vmem>>, vector<2x8xf32>,
    %c0_10 = arith.constant 0 : index
    %c0_11 = arith.constant 0 : index
    %16 = vector.load %arg8[%c0_10, %c0_11] : memref<2x8xf32, #tpu.memory_space<vmem>>, vector<2x8xf32>
    tpu.vector_store %arg8[%c0_10, %c0_11], %7 {strides = array<i32>} : memref<2x8xf32, #tpu.memory_space<vmem>>, vector<2x8xf32>,
    %c0_12 = arith.constant 0 : index
    %c0_13 = arith.constant 0 : index
    %17 = vector.load %arg9[%c0_12, %c0_13] : memref<2x8xf32, #tpu.memory_space<vmem>>, vector<2x8xf32>
    tpu.vector_store %arg9[%c0_12, %c0_13], %14 {strides = array<i32>} : memref<2x8xf32, #tpu.memory_space<vmem>>, vector<2x8xf32>,
    %c0_14 = arith.constant 0 : index
    %c0_15 = arith.constant 0 : index
    %18 = vector.load %arg10[%c0_14, %c0_15] : memref<2x9xf32, #tpu.memory_space<vmem>>, vector<2x1xf32>
    tpu.vector_store %arg10[%c0_14, %c0_15], %8 {strides = array<i32>} : memref<2x9xf32, #tpu.memory_space<vmem>>, vector<2x1xf32>,
    %c0_16 = arith.constant 0 : index
    %c1 = arith.constant 1 : index
    %19 = vector.load %arg10[%c0_16, %c1] : memref<2x9xf32, #tpu.memory_space<vmem>>, vector<2x8xf32>
    tpu.vector_store %arg10[%c0_16, %c1], %14 {strides = array<i32>} : memref<2x9xf32, #tpu.memory_space<vmem>>, vector<2x8xf32>,
    %20 = arith.truncf %14 : vector<2x8xf32> to vector<2x8xbf16>
    %c0_17 = arith.constant 0 : index
    %c0_18 = arith.constant 0 : index
    %21 = vector.load %arg4[%c0_17, %c0_18] : memref<8x1024xbf16, #tpu.memory_space<vmem>>, vector<8x1024xbf16>
    %cst_19 = arith.constant dense<0.000000e+00> : vector<2x1024xf32>
    %22 = tpu.matmul %20, %21, %cst_19 {dimension_numbers = #tpu.dot_dimension_numbers<[1], [0], [0], [1], [0, 0, 1, 1], [], []>} : vector<2x8xbf16>, vector<8x1024xbf16>, vector<2x1024xf32> -> vector<2x1024xf32>
    %c0_20 = arith.constant 0 : index
    %c0_21 = arith.constant 0 : index
    %23 = vector.load %arg5[%c0_20, %c0_21] : memref<1x1024xf32, #tpu.memory_space<vmem>>, vector<1x1024xf32>
    %24 = vector.broadcast %8 : vector<2x1xf32> to vector<2x1024xf32>
    %25 = vector.broadcast %23 : vector<1x1024xf32> to vector<2x1024xf32>
    %26 = arith.mulf %24, %25 : vector<2x1024xf32>
    %27 = arith.addf %22, %26 : vector<2x1024xf32>
    %c0_22 = arith.constant 0 : index
    %c0_23 = arith.constant 0 : index
    %28 = vector.load %arg6[%c0_22, %c0_23] : memref<1x1024xf32, #tpu.memory_space<vmem>>, vector<1x1024xf32>
    %29 = vector.broadcast %28 : vector<1x1024xf32> to vector<2x1024xf32>
    %30 = arith.addf %27, %29 : vector<2x1024xf32>
    %31 = arith.truncf %30 : vector<2x1024xf32> to vector<2x1024xbf16>
    %c0_24 = arith.constant 0 : index
    %c0_25 = arith.constant 0 : index
    %32 = vector.load %arg11[%c0_24, %c0_25] : memref<2x1024xbf16, #tpu.memory_space<vmem>>, vector<2x1024xbf16>
    tpu.vector_store %arg11[%c0_24, %c0_25], %31 {strides = array<i32>} : memref<2x1024xbf16, #tpu.memory_space<vmem>>, vector<2x1024xbf16>,
    return
  }
}

module attributes {stable_mosaic.version = 11 : i64} {
  func.func @_gemm_kernel(%arg0: memref<50x256xbf16, #tpu.memory_space<vmem>>, %arg1: memref<256x128xbf16, #tpu.memory_space<vmem>>, %arg2: memref<1x128xf32, #tpu.memory_space<vmem>>, %arg3: memref<50x128xbf16, #tpu.memory_space<vmem>>) attributes {dimension_semantics = [], scalar_prefetch = 0 : i64, scratch_operands = 0 : i64, tpu.core_type = #tpu.core_type<tc>} {
    %c0 = arith.constant 0 : index
    %c0_0 = arith.constant 0 : index
    %0 = vector.load %arg0[%c0, %c0_0] : memref<50x256xbf16, #tpu.memory_space<vmem>>, vector<50x256xbf16>
    %c0_1 = arith.constant 0 : index
    %c0_2 = arith.constant 0 : index
    %1 = vector.load %arg1[%c0_1, %c0_2] : memref<256x128xbf16, #tpu.memory_space<vmem>>, vector<256x128xbf16>
    %cst = arith.constant dense<0.000000e+00> : vector<50x128xf32>
    %2 = tpu.matmul %0, %1, %cst {dimension_numbers = #tpu.dot_dimension_numbers<[1], [0], [0], [1], [0, 0, 1, 1], [], []>} : vector<50x256xbf16>, vector<256x128xbf16>, vector<50x128xf32> -> vector<50x128xf32>
    %c0_3 = arith.constant 0 : index
    %c0_4 = arith.constant 0 : index
    %3 = vector.load %arg2[%c0_3, %c0_4] : memref<1x128xf32, #tpu.memory_space<vmem>>, vector<1x128xf32>
    %4 = vector.broadcast %3 : vector<1x128xf32> to vector<50x128xf32>
    %5 = arith.addf %2, %4 : vector<50x128xf32>
    %cst_5 = arith.constant 0.000000e+00 : f32
    %6 = vector.broadcast %cst_5 : f32 to vector<50x128xf32>
    %7 = arith.maximumf %5, %6 : vector<50x128xf32>
    %8 = arith.truncf %7 : vector<50x128xf32> to vector<50x128xbf16>
    %c0_6 = arith.constant 0 : index
    %c0_7 = arith.constant 0 : index
    %9 = vector.load %arg3[%c0_6, %c0_7] : memref<50x128xbf16, #tpu.memory_space<vmem>>, vector<50x128xbf16>
    tpu.vector_store %arg3[%c0_6, %c0_7], %8 {strides = array<i32>} : memref<50x128xbf16, #tpu.memory_space<vmem>>, vector<50x128xbf16>,
    return
  }
}

module attributes {stable_mosaic.version = 11 : i64} {
  func.func @_gemm_kernel(%arg0: memref<162x128xbf16, #tpu.memory_space<vmem>>, %arg1: memref<128x64xbf16, #tpu.memory_space<vmem>>, %arg2: memref<1x64xf32, #tpu.memory_space<vmem>>, %arg3: memref<162x64xbf16, #tpu.memory_space<vmem>>) attributes {dimension_semantics = [], scalar_prefetch = 0 : i64, scratch_operands = 0 : i64, tpu.core_type = #tpu.core_type<tc>} {
    %c0 = arith.constant 0 : index
    %c0_0 = arith.constant 0 : index
    %0 = vector.load %arg0[%c0, %c0_0] : memref<162x128xbf16, #tpu.memory_space<vmem>>, vector<162x128xbf16>
    %c0_1 = arith.constant 0 : index
    %c0_2 = arith.constant 0 : index
    %1 = vector.load %arg1[%c0_1, %c0_2] : memref<128x64xbf16, #tpu.memory_space<vmem>>, vector<128x64xbf16>
    %cst = arith.constant dense<0.000000e+00> : vector<162x64xf32>
    %2 = tpu.matmul %0, %1, %cst {dimension_numbers = #tpu.dot_dimension_numbers<[1], [0], [0], [1], [0, 0, 1, 1], [], []>} : vector<162x128xbf16>, vector<128x64xbf16>, vector<162x64xf32> -> vector<162x64xf32>
    %c0_3 = arith.constant 0 : index
    %c0_4 = arith.constant 0 : index
    %3 = vector.load %arg2[%c0_3, %c0_4] : memref<1x64xf32, #tpu.memory_space<vmem>>, vector<1x64xf32>
    %4 = vector.broadcast %3 : vector<1x64xf32> to vector<162x64xf32>
    %5 = arith.addf %2, %4 : vector<162x64xf32>
    %cst_5 = arith.constant 0.000000e+00 : f32
    %6 = vector.broadcast %cst_5 : f32 to vector<162x64xf32>
    %7 = arith.maximumf %5, %6 : vector<162x64xf32>
    %8 = arith.truncf %7 : vector<162x64xf32> to vector<162x64xbf16>
    %c0_6 = arith.constant 0 : index
    %c0_7 = arith.constant 0 : index
    %9 = vector.load %arg3[%c0_6, %c0_7] : memref<162x64xbf16, #tpu.memory_space<vmem>>, vector<162x64xbf16>
    tpu.vector_store %arg3[%c0_6, %c0_7], %8 {strides = array<i32>} : memref<162x64xbf16, #tpu.memory_space<vmem>>, vector<162x64xbf16>,
    return
  }
}

module attributes {stable_mosaic.version = 11 : i64} {
  func.func @_gemm2_kernel(%arg0: i32, %arg1: memref<296x64xbf16, #tpu.memory_space<vmem>>, %arg2: memref<64x32xbf16, #tpu.memory_space<vmem>>, %arg3: memref<1x32xf32, #tpu.memory_space<vmem>>, %arg4: memref<32x16xbf16, #tpu.memory_space<vmem>>, %arg5: memref<1x16xf32, #tpu.memory_space<vmem>>, %arg6: memref<296x16xf32, #tpu.memory_space<vmem>>) attributes {dimension_semantics = [#tpu.dimension_semantics<parallel>], iteration_bounds = array<i64: 2>, scalar_prefetch = 0 : i64, scratch_operands = 0 : i64, tpu.core_type = #tpu.core_type<tc>, window_params = [{transform_indices = @transform_0, window_bounds = array<i64: 296, 64>}, {pipeline_mode = #tpu.pipeline_mode<synchronous>, transform_indices = @transform_1, window_bounds = array<i64: 64, 32>}, {pipeline_mode = #tpu.pipeline_mode<synchronous>, transform_indices = @transform_2, window_bounds = array<i64: 1, 32>}, {pipeline_mode = #tpu.pipeline_mode<synchronous>, transform_indices = @transform_3, window_bounds = array<i64: 32, 16>}, {pipeline_mode = #tpu.pipeline_mode<synchronous>, transform_indices = @transform_4, window_bounds = array<i64: 1, 16>}, {transform_indices = @transform_5, window_bounds = array<i64: 296, 16>}]} {
    %c0 = arith.constant 0 : index
    %c0_0 = arith.constant 0 : index
    %0 = vector.load %arg1[%c0, %c0_0] : memref<296x64xbf16, #tpu.memory_space<vmem>>, vector<296x64xbf16>
    %c0_1 = arith.constant 0 : index
    %c0_2 = arith.constant 0 : index
    %1 = vector.load %arg2[%c0_1, %c0_2] : memref<64x32xbf16, #tpu.memory_space<vmem>>, vector<64x32xbf16>
    %cst = arith.constant dense<0.000000e+00> : vector<296x32xf32>
    %2 = tpu.matmul %0, %1, %cst {dimension_numbers = #tpu.dot_dimension_numbers<[1], [0], [0], [1], [0, 0, 1, 1], [], []>} : vector<296x64xbf16>, vector<64x32xbf16>, vector<296x32xf32> -> vector<296x32xf32>
    %c0_3 = arith.constant 0 : index
    %c0_4 = arith.constant 0 : index
    %3 = vector.load %arg3[%c0_3, %c0_4] : memref<1x32xf32, #tpu.memory_space<vmem>>, vector<1x32xf32>
    %4 = vector.broadcast %3 : vector<1x32xf32> to vector<296x32xf32>
    %5 = arith.addf %2, %4 : vector<296x32xf32>
    %cst_5 = arith.constant 0.000000e+00 : f32
    %6 = vector.broadcast %cst_5 : f32 to vector<296x32xf32>
    %7 = arith.maximumf %5, %6 : vector<296x32xf32>
    %8 = arith.truncf %7 : vector<296x32xf32> to vector<296x32xbf16>
    %c0_6 = arith.constant 0 : index
    %c0_7 = arith.constant 0 : index
    %9 = vector.load %arg4[%c0_6, %c0_7] : memref<32x16xbf16, #tpu.memory_space<vmem>>, vector<32x16xbf16>
    %cst_8 = arith.constant dense<0.000000e+00> : vector<296x16xf32>
    %10 = tpu.matmul %8, %9, %cst_8 {dimension_numbers = #tpu.dot_dimension_numbers<[1], [0], [0], [1], [0, 0, 1, 1], [], []>} : vector<296x32xbf16>, vector<32x16xbf16>, vector<296x16xf32> -> vector<296x16xf32>
    %c0_9 = arith.constant 0 : index
    %c0_10 = arith.constant 0 : index
    %11 = vector.load %arg5[%c0_9, %c0_10] : memref<1x16xf32, #tpu.memory_space<vmem>>, vector<1x16xf32>
    %12 = vector.broadcast %11 : vector<1x16xf32> to vector<296x16xf32>
    %13 = arith.addf %10, %12 : vector<296x16xf32>
    %c0_11 = arith.constant 0 : index
    %c0_12 = arith.constant 0 : index
    %14 = vector.load %arg6[%c0_11, %c0_12] : memref<296x16xf32, #tpu.memory_space<vmem>>, vector<296x16xf32>
    tpu.vector_store %arg6[%c0_11, %c0_12], %13 {strides = array<i32>} : memref<296x16xf32, #tpu.memory_space<vmem>>, vector<296x16xf32>,
    return
  }
  func.func @transform_0(%arg0: i32) -> (i32, i32) {
    %c0_i32 = arith.constant 0 : i32
    %c0_i32_0 = arith.constant 0 : i32
    return %arg0, %c0_i32 : i32, i32
  }
  func.func @transform_1(%arg0: i32) -> (i32, i32) {
    %c0_i32 = arith.constant 0 : i32
    %c0_i32_0 = arith.constant 0 : i32
    %c0_i32_1 = arith.constant 0 : i32
    return %c0_i32, %c0_i32_0 : i32, i32
  }
  func.func @transform_2(%arg0: i32) -> (i32, i32) {
    %c0_i32 = arith.constant 0 : i32
    %c0_i32_0 = arith.constant 0 : i32
    %c0_i32_1 = arith.constant 0 : i32
    return %c0_i32, %c0_i32_0 : i32, i32
  }
  func.func @transform_3(%arg0: i32) -> (i32, i32) {
    %c0_i32 = arith.constant 0 : i32
    %c0_i32_0 = arith.constant 0 : i32
    %c0_i32_1 = arith.constant 0 : i32
    return %c0_i32, %c0_i32_0 : i32, i32
  }
  func.func @transform_4(%arg0: i32) -> (i32, i32) {
    %c0_i32 = arith.constant 0 : i32
    %c0_i32_0 = arith.constant 0 : i32
    %c0_i32_1 = arith.constant 0 : i32
    return %c0_i32, %c0_i32_0 : i32, i32
  }
  func.func @transform_5(%arg0: i32) -> (i32, i32) {
    %c0_i32 = arith.constant 0 : i32
    %c0_i32_0 = arith.constant 0 : i32
    return %arg0, %c0_i32 : i32, i32
  }
}

</mosaic_0001>

<bundles_post_ra>
// kernel: shape_vae_forward.8
= control target key start
LH: loop header
LB: loop body
LE: loop exit
PB: predicated region body
PF: predicated region fallthrough
CT: control target
= control target key end

     0   :  { %8 = vsyncpa [#allocation3], 0  ;;  %s2122_s12 = smov 0   ;;  %s2675_s0 = inlined_call_operand.vmem [shape: bf16[2048,9], index: 0, kind: input, shape index: {}]   ;;  %s2676_s1 = inlined_call_operand.vmem [shape: bf16[9,8], index: 1, kind: input, shape index: {}]   ;;  %s2677_s2 = inlined_call_operand.hbm [shape: f32[1,8], index: 2, kind: input, shape index: {}]   ;;  %s2678_s3 = inlined_call_operand.vmem [shape: bf16[2048,8], index: 3, kind: output, shape index: {}]  }
   0x1 LB: > { %s1631_s13 = sadd.s32 4294967295, %s2098_s12   ;;  %p1633_p0 = scmp.ge.s32.totalorder %s2098_s12, 1  ;;  %s2098_s12 = sphi %s2122_s12, %s14_s12  }
   0x2   : > { %p113_p1 = scmp.lt.s32.totalorder %s2098_s12, 3  ;;  %s128_s16 = sshll.u32 %s2677_s2, 4  ;;  %s129_s16 = int_to_ptr.hbm [resolvable:$true] %s128_s16 }
   0x3   : > { %p2044_p3 = scmp.eq.s32.totalorder %s1631_s13, 0  ;;  %s2100_s17 = smov [#allocation2]  }
   0x4   : > { %p114_p2 = pnand %p1633_p0, %p113_p1  ;;  %s130_s18 = sshll.u32 %s2100_s17, 4  ;;  %s131_s18 = int_to_ptr.vmem [resolvable:$true] %s130_s18 }
   0x6   : > { %p2040_p4 = pneg %p114_p2  ;;  %152 = sbr.rel (%p114_p2) target bundleno = 410 (0x19a), region = 32 }
   0x8   : > { %p2041_p5 = pnand %p2044_p3, %p2040_p4 }
   0xa   : > { %2043 = dma.hbm_to_vmem [thread:$0]  (!%p2041_p5), %s129_s16, 16, %s131_s18, [#allocation3]  }
   0xb   : > { %2093 = dma.done.wait (%p2044_p3), [#allocation3], 16  }
   0xc   : > { %2095 = vsyncadd (%p2044_p3), [#allocation3], 4294967280  ;;  %s1638_s19 = sshll.u32 %s1631_s13, 7  ;;  %vm842_vm0 = vcmask 1043456   ;;  %vm843_vm1 = vcmask 1044480   ;;  %v2101_v0 = vmov 65535  }
   0xd   : > { %p178_p6 = scmp.lt.s32.totalorder %s1638_s19, 255  ;;  %v844_v1 = vsel %vm842_vm0, 4294967295, %v2101_v0  ;;  %v1900_v2 = vld [vmem:[%s2676_s1] sm:$0xf]  ;;  %v2032_v3 = vld [vmem:[%s2676_s1] sm:$0x10] }
   0xe   : > { %v845_v4 = vsel %vm843_vm1, %v844_v1, 0  ;;  %v1901_v5 = vor.u32 %v2032_v3, %v1900_v2  ;;  %vm649_vm2 = vcmask 72704   ;;  %v2213_v39 = vld [vmem:[#allocation2] ss:$0 sm:$0xff]  ;;  %vm1434_vm3 = vcmask 60416  }
   0xf   : > { %s2680_s19 = smov (!%p178_p6, %s1638_s19), 255 }
  0x10   : > { %s1639_s20 = sshll.u32 %s2680_s19, 2  ;;  %v847_v6 = vand.u32 %v1901_v5, %v845_v4 }
  0x11   : > { %s2147_s27 = scalar_lea.vmem %s2675_s0, %s1639_s20  ;;  %s2228_s30 = scalar_lea.vmem %s2678_s3, %s1639_s20 }
  0x12   : > { %v1968_v7 = vld [vmem:[%s2147_s27] sm:$0xff]  ;;  %856 = vmatpush.bf16.msra.mxu0 %v847_v6  ;;  %2033 = vmatpush.bf16.msra.mxu1 %v847_v6  ;;  %v1969_v11 = vld [vmem:[%s2147_s27 + $0x8] sm:$0xff]  ;;  %v1970_v15 = vld [vmem:[%s2147_s27 + $0x10] sm:$0xff] }
  0x13   : > { %v1984_v8 = vld [vmem:[%s2147_s27 + $0x80] sm:$0xff]  ;;  %2034 = vmatpush.bf16.msra.mxu2 %v847_v6  ;;  %2035 = vmatpush.bf16.msra.mxu3 %v847_v6  ;;  %v1985_v12 = vld [vmem:[%s2147_s27 + $0x88] sm:$0xff]  ;;  %v1986_v16 = vld [vmem:[%s2147_s27 + $0x90] sm:$0xff] }
  0x14   : > { %v2000_v9 = vld [vmem:[%s2147_s27 + $0x100] sm:$0xff]  ;;  %v2001_v13 = vld [vmem:[%s2147_s27 + $0x108] sm:$0xff]  ;;  %v2002_v17 = vld [vmem:[%s2147_s27 + $0x110] sm:$0xff] }
  0x15   : > { %v2016_v10 = vld [vmem:[%s2147_s27 + $0x180] sm:$0xff]  ;;  %1902 = vmatmul.msk.bf16.vlgmr.msra.gmra.mxu0 %vm649_vm2, %v1968_v7  ;;  %1918 = vmatmul.msk.bf16.vlgmr.msra.gmra.mxu1 %vm649_vm2, %v1984_v8  ;;  %v2017_v14 = vld [vmem:[%s2147_s27 + $0x188] sm:$0xff]  ;;  %v2018_v18 = vld [vmem:[%s2147_s27 + $0x190] sm:$0xff] }
  0x16   : > { %1934 = vmatmul.msk.bf16.vlgmr.msra.gmra.mxu2 %vm649_vm2, %v2000_v9  ;;  %1950 = vmatmul.msk.bf16.vlgmr.msra.gmra.mxu3 %vm649_vm2, %v2016_v10  ;;  %v1971_v19 = vld [vmem:[%s2147_s27 + $0x18] sm:$0xff]  ;;  %v1972_v23 = vld [vmem:[%s2147_s27 + $0x20] sm:$0xff]  ;;  %v1973_v27 = vld [vmem:[%s2147_s27 + $0x28] sm:$0xff] }
  0x17   : > { %v1987_v20 = vld [vmem:[%s2147_s27 + $0x98] sm:$0xff]  ;;  %v1988_v24 = vld [vmem:[%s2147_s27 + $0xa0] sm:$0xff]  ;;  %v1989_v28 = vld [vmem:[%s2147_s27 + $0xa8] sm:$0xff] }
  0x18   : > { %v2003_v21 = vld [vmem:[%s2147_s27 + $0x118] sm:$0xff]  ;;  %v2004_v25 = vld [vmem:[%s2147_s27 + $0x120] sm:$0xff]  ;;  %v2005_v29 = vld [vmem:[%s2147_s27 + $0x128] sm:$0xff] }
  0x19   : > { %v2019_v22 = vld [vmem:[%s2147_s27 + $0x198] sm:$0xff]  ;;  %v2020_v26 = vld [vmem:[%s2147_s27 + $0x1a0] sm:$0xff]  ;;  %v2021_v30 = vld [vmem:[%s2147_s27 + $0x1a8] sm:$0xff] }
  0x1a   : > { %v1974_v31 = vld [vmem:[%s2147_s27 + $0x30] sm:$0xff]  ;;  %v1975_v35 = vld [vmem:[%s2147_s27 + $0x38] sm:$0xff]  ;;  %v1976_v40 = vld [vmem:[%s2147_s27 + $0x40] sm:$0xff] }
  0x1b   : > { %v1990_v32 = vld [vmem:[%s2147_s27 + $0xb0] sm:$0xff]  ;;  %v1991_v36 = vld [vmem:[%s2147_s27 + $0xb8] sm:$0xff]  ;;  %v1992_v41 = vld [vmem:[%s2147_s27 + $0xc0] sm:$0xff] }
  0x1c   : > { %v2006_v33 = vld [vmem:[%s2147_s27 + $0x130] sm:$0xff]  ;;  %v2007_v37 = vld [vmem:[%s2147_s27 + $0x138] sm:$0xff]  ;;  %v2008_v44 = vld [vmem:[%s2147_s27 + $0x140] sm:$0xff] }
  0x1d   : > { %v2022_v34 = vld [vmem:[%s2147_s27 + $0x1b0] sm:$0xff]  ;;  %v2023_v38 = vld [vmem:[%s2147_s27 + $0x1b8] sm:$0xff]  ;;  %v2024_v45 = vld [vmem:[%s2147_s27 + $0x1c0] sm:$0xff] }
  0x1e   : > { %v1977_v6 = vld [vmem:[%s2147_s27 + $0x48] sm:$0xff] }
  0x1f   : > { %v1993_v7 = vld [vmem:[%s2147_s27 + $0xc8] sm:$0xff] }
  0x25   : > { %1903 = vmatmul.msk.bf16.gmra.mxu0 %vm649_vm2, %v1969_v11  ;;  %1919 = vmatmul.msk.bf16.gmra.mxu1 %vm649_vm2, %v1985_v12  ;;  %v2009_v12 = vld [vmem:[%s2147_s27 + $0x148] sm:$0xff] }
  0x26   : > { %1935 = vmatmul.msk.bf16.gmra.mxu2 %vm649_vm2, %v2001_v13  ;;  %1951 = vmatmul.msk.bf16.gmra.mxu3 %vm649_vm2, %v2017_v14  ;;  %v2025_v13 = vld [vmem:[%s2147_s27 + $0x1c8] sm:$0xff] }
  0x35   : > { %1904 = vmatmul.msk.bf16.gmra.mxu0 %vm649_vm2, %v1970_v15  ;;  %1920 = vmatmul.msk.bf16.gmra.mxu1 %vm649_vm2, %v1986_v16 }
  0x36   : > { %1936 = vmatmul.msk.bf16.gmra.mxu2 %vm649_vm2, %v2002_v17  ;;  %1952 = vmatmul.msk.bf16.gmra.mxu3 %vm649_vm2, %v2018_v18 }
  0x45   : > { %1905 = vmatmul.msk.bf16.gmra.mxu0 %vm649_vm2, %v1971_v19  ;;  %1921 = vmatmul.msk.bf16.gmra.mxu1 %vm649_vm2, %v1987_v20 }
  0x46   : > { %1937 = vmatmul.msk.bf16.gmra.mxu2 %vm649_vm2, %v2003_v21  ;;  %1953 = vmatmul.msk.bf16.gmra.mxu3 %vm649_vm2, %v2019_v22 }
  0x55   : > { %1906 = vmatmul.msk.bf16.gmra.mxu0 %vm649_vm2, %v1972_v23  ;;  %1922 = vmatmul.msk.bf16.gmra.mxu1 %vm649_vm2, %v1988_v24 }
  0x56   : > { %1938 = vmatmul.msk.bf16.gmra.mxu2 %vm649_vm2, %v2004_v25  ;;  %1954 = vmatmul.msk.bf16.gmra.mxu3 %vm649_vm2, %v2020_v26 }
  0x65   : > { %1907 = vmatmul.msk.bf16.gmra.mxu0 %vm649_vm2, %v1973_v27  ;;  %1923 = vmatmul.msk.bf16.gmra.mxu1 %vm649_vm2, %v1989_v28 }
  0x66   : > { %1939 = vmatmul.msk.bf16.gmra.mxu2 %vm649_vm2, %v2005_v29  ;;  %1955 = vmatmul.msk.bf16.gmra.mxu3 %vm649_vm2, %v2021_v30 }
  0x75   : > { %1908 = vmatmul.msk.bf16.gmra.mxu0 %vm649_vm2, %v1974_v31  ;;  %1924 = vmatmul.msk.bf16.gmra.mxu1 %vm649_vm2, %v1990_v32 }
  0x76   : > { %1940 = vmatmul.msk.bf16.gmra.mxu2 %vm649_vm2, %v2006_v33  ;;  %1956 = vmatmul.msk.bf16.gmra.mxu3 %vm649_vm2, %v2022_v34 }
  0x85   : > { %1909 = vmatmul.msk.bf16.gmra.mxu0 %vm649_vm2, %v1975_v35  ;;  %1925 = vmatmul.msk.bf16.gmra.mxu1 %vm649_vm2, %v1991_v36 }
  0x86   : > { %1941 = vmatmul.msk.bf16.gmra.mxu2 %vm649_vm2, %v2007_v37  ;;  %1957 = vmatmul.msk.bf16.gmra.mxu3 %vm649_vm2, %v2023_v38 }
  0x92   : > { %v858_v42 = vpop.f32.mrf.mxu0  ;;  %v938_v43 = vpop.f32.mrf.mxu1 }
  0x93   : > { %v859_v46 = vadd.f32 %v2213_v39, %v858_v42  ;;  %v939_v47 = vadd.f32 %v2213_v39, %v938_v43  ;;  %v1978_v43 = vld [vmem:[%s2147_s27 + $0x50] sm:$0xff] }
  0x95   : > { %v1178_v48 = vmax.f32 %v859_v46, 0.0  ;;  %v1210_v49 = vmax.f32 %v939_v47, 0.0  ;;  %1910 = vmatmul.msk.bf16.gmra.mxu0 %vm649_vm2, %v1976_v40  ;;  %1926 = vmatmul.msk.bf16.gmra.mxu1 %vm649_vm2, %v1992_v41 }
  0x96   : > { %1942 = vmatmul.msk.bf16.gmra.mxu2 %vm649_vm2, %v2008_v44  ;;  %1958 = vmatmul.msk.bf16.gmra.mxu3 %vm649_vm2, %v2024_v45  ;;  %v1994_v44 = vld [vmem:[%s2147_s27 + $0xd0] sm:$0xff] }
  0x97   : > { %v1306_v50 = vpack.c.bf16 %v1178_v48, %v1178_v48  ;;  %v1338_v51 = vpack.c.bf16 %v1210_v49, %v1210_v49  ;;  %v2010_v49 = vld [vmem:[%s2147_s27 + $0x150] sm:$0xff] }
  0x99   : > { %1435 = vst.msk [vmem:[%s2228_s30] sm:$0xf] %vm1434_vm3, %v1306_v50  ;;  %v1018_v52 = vpop.f32.mrf.mxu2  ;;  %v1098_v53 = vpop.f32.mrf.mxu3  ;;  %v2026_v50 = vld [vmem:[%s2147_s27 + $0x1d0] sm:$0xff] }
  0x9a   : > { %1467 = vst.msk [vmem:[%s2228_s30 + $0x80] sm:$0xf] %vm1434_vm3, %v1338_v51  ;;  %v1019_v54 = vadd.f32 %v2213_v39, %v1018_v52  ;;  %v1099_v55 = vadd.f32 %v2213_v39, %v1098_v53  ;;  %v860_v56 = vpop.f32.mrf.mxu0  ;;  %v940_v57 = vpop.f32.mrf.mxu1 }
  0x9b   : > { %v861_v58 = vadd.f32 %v2213_v39, %v860_v56  ;;  %v941_v59 = vadd.f32 %v2213_v39, %v940_v57 }
  0x9c   : > { %v1242_v60 = vmax.f32 %v1019_v54, 0.0  ;;  %v1274_v61 = vmax.f32 %v1099_v55, 0.0 }
  0x9d   : > { %v1179_v62 = vmax.f32 %v861_v58, 0.0  ;;  %v1211_v63 = vmax.f32 %v941_v59, 0.0 }
  0x9e   : > { %v1370_v0 = vpack.c.bf16 %v1242_v60, %v1242_v60  ;;  %v1402_v1 = vpack.c.bf16 %v1274_v61, %v1274_v61 }
  0x9f   : > { %v1307_v2 = vpack.c.bf16 %v1179_v62, %v1179_v62  ;;  %v1339_v3 = vpack.c.bf16 %v1211_v63, %v1211_v63 }
  0xa0   : > { %1499 = vst.msk [vmem:[%s2228_s30 + $0x100] sm:$0xf] %vm1434_vm3, %v1370_v0 }
  0xa1   : > { %1531 = vst.msk [vmem:[%s2228_s30 + $0x180] sm:$0xf] %vm1434_vm3, %v1402_v1  ;;  %v1020_v4 = vpop.f32.mrf.mxu2  ;;  %v1100_v5 = vpop.f32.mrf.mxu3 }
  0xa2   : > { %1436 = vst.msk [vmem:[%s2228_s30 + $0x4] sm:$0xf] %vm1434_vm3, %v1307_v2  ;;  %v1021_v8 = vadd.f32 %v2213_v39, %v1020_v4  ;;  %v1101_v9 = vadd.f32 %v2213_v39, %v1100_v5  ;;  %v863_v10 = vpop.f32.mrf.mxu0  ;;  %v943_v11 = vpop.f32.mrf.mxu1 }
  0xa3   : > { %1468 = vst.msk [vmem:[%s2228_s30 + $0x84] sm:$0xf] %vm1434_vm3, %v1339_v3  ;;  %v864_v14 = vadd.f32 %v2213_v39, %v863_v10  ;;  %v944_v15 = vadd.f32 %v2213_v39, %v943_v11 }
  0xa4   : > { %v1243_v16 = vmax.f32 %v1021_v8, 0.0  ;;  %v1275_v17 = vmax.f32 %v1101_v9, 0.0 }
  0xa5   : > { %v1180_v18 = vmax.f32 %v864_v14, 0.0  ;;  %v1212_v19 = vmax.f32 %v944_v15, 0.0  ;;  %1911 = vmatmul.msk.bf16.gmra.mxu0 %vm649_vm2, %v1977_v6  ;;  %1927 = vmatmul.msk.bf16.gmra.mxu1 %vm649_vm2, %v1993_v7  ;;  %v1979_v15 = vld [vmem:[%s2147_s27 + $0x58] sm:$0xff] }
  0xa6   : > { %v1371_v20 = vpack.c.bf16 %v1243_v16, %v1243_v16  ;;  %v1403_v21 = vpack.c.bf16 %v1275_v17, %v1275_v17  ;;  %1943 = vmatmul.msk.bf16.gmra.mxu2 %vm649_vm2, %v2009_v12  ;;  %1959 = vmatmul.msk.bf16.gmra.mxu3 %vm649_vm2, %v2025_v13  ;;  %v1995_v16 = vld [vmem:[%s2147_s27 + $0xd8] sm:$0xff] }
  0xa7   : > { %v1308_v22 = vpack.c.bf16 %v1180_v18, %v1180_v18  ;;  %v1340_v23 = vpack.c.bf16 %v1212_v19, %v1212_v19 }
  0xa8   : > { %1500 = vst.msk [vmem:[%s2228_s30 + $0x104] sm:$0xf] %vm1434_vm3, %v1371_v20 }
  0xa9   : > { %1532 = vst.msk [vmem:[%s2228_s30 + $0x184] sm:$0xf] %vm1434_vm3, %v1403_v21  ;;  %v1023_v24 = vpop.f32.mrf.mxu2  ;;  %v1103_v25 = vpop.f32.mrf.mxu3  ;;  %v2011_v21 = vld [vmem:[%s2147_s27 + $0x158] sm:$0xff] }
  0xaa   : > { %1437 = vst.msk [vmem:[%s2228_s30 + $0x8] sm:$0xf] %vm1434_vm3, %v1308_v22  ;;  %v1024_v26 = vadd.f32 %v2213_v39, %v1023_v24  ;;  %v1104_v27 = vadd.f32 %v2213_v39, %v1103_v25  ;;  %v865_v28 = vpop.f32.mrf.mxu0  ;;  %v945_v29 = vpop.f32.mrf.mxu1  ;;  %v2027_v22 = vld [vmem:[%s2147_s27 + $0x1d8] sm:$0xff] }
  0xab   : > { %1469 = vst.msk [vmem:[%s2228_s30 + $0x88] sm:$0xf] %vm1434_vm3, %v1340_v23  ;;  %v866_v30 = vadd.f32 %v2213_v39, %v865_v28  ;;  %v946_v31 = vadd.f32 %v2213_v39, %v945_v29 }
  0xac   : > { %v1244_v32 = vmax.f32 %v1024_v26, 0.0  ;;  %v1276_v33 = vmax.f32 %v1104_v27, 0.0 }
  0xad   : > { %v1181_v34 = vmax.f32 %v866_v30, 0.0  ;;  %v1213_v35 = vmax.f32 %v946_v31, 0.0 }
  0xae   : > { %v1372_v36 = vpack.c.bf16 %v1244_v32, %v1244_v32  ;;  %v1404_v37 = vpack.c.bf16 %v1276_v33, %v1276_v33 }
  0xaf   : > { %v1309_v38 = vpack.c.bf16 %v1181_v34, %v1181_v34  ;;  %v1341_v40 = vpack.c.bf16 %v1213_v35, %v1213_v35 }
  0xb0   : > { %1501 = vst.msk [vmem:[%s2228_s30 + $0x108] sm:$0xf] %vm1434_vm3, %v1372_v36 }
  0xb1   : > { %1533 = vst.msk [vmem:[%s2228_s30 + $0x188] sm:$0xf] %vm1434_vm3, %v1404_v37  ;;  %v1025_v41 = vpop.f32.mrf.mxu2  ;;  %v1105_v42 = vpop.f32.mrf.mxu3 }
  0xb2   : > { %1438 = vst.msk [vmem:[%s2228_s30 + $0xc] sm:$0xf] %vm1434_vm3, %v1309_v38  ;;  %v1026_v45 = vadd.f32 %v2213_v39, %v1025_v41  ;;  %v1106_v46 = vadd.f32 %v2213_v39, %v1105_v42  ;;  %v868_v47 = vpop.f32.mrf.mxu0  ;;  %v948_v48 = vpop.f32.mrf.mxu1 }
  0xb3   : > { %1470 = vst.msk [vmem:[%s2228_s30 + $0x8c] sm:$0xf] %vm1434_vm3, %v1341_v40  ;;  %v869_v51 = vadd.f32 %v2213_v39, %v868_v47  ;;  %v949_v52 = vadd.f32 %v2213_v39, %v948_v48 }
  0xb4   : > { %v1245_v53 = vmax.f32 %v1026_v45, 0.0  ;;  %v1277_v54 = vmax.f32 %v1106_v46, 0.0 }
  0xb5   : > { %v1182_v55 = vmax.f32 %v869_v51, 0.0  ;;  %v1214_v56 = vmax.f32 %v949_v52, 0.0  ;;  %1912 = vmatmul.msk.bf16.gmra.mxu0 %vm649_vm2, %v1978_v43  ;;  %1928 = vmatmul.msk.bf16.gmra.mxu1 %vm649_vm2, %v1994_v44  ;;  %v1980_v52 = vld [vmem:[%s2147_s27 + $0x60] sm:$0xff] }
  0xb6   : > { %v1373_v57 = vpack.c.bf16 %v1245_v53, %v1245_v53  ;;  %v1405_v58 = vpack.c.bf16 %v1277_v54, %v1277_v54  ;;  %1944 = vmatmul.msk.bf16.gmra.mxu2 %vm649_vm2, %v2010_v49  ;;  %1960 = vmatmul.msk.bf16.gmra.mxu3 %vm649_vm2, %v2026_v50  ;;  %v1996_v53 = vld [vmem:[%s2147_s27 + $0xe0] sm:$0xff] }
  0xb7   : > { %v1310_v59 = vpack.c.bf16 %v1182_v55, %v1182_v55  ;;  %v1342_v60 = vpack.c.bf16 %v1214_v56, %v1214_v56 }
  0xb8   : > { %1502 = vst.msk [vmem:[%s2228_s30 + $0x10c] sm:$0xf] %vm1434_vm3, %v1373_v57 }
  0xb9   : > { %1534 = vst.msk [vmem:[%s2228_s30 + $0x18c] sm:$0xf] %vm1434_vm3, %v1405_v58  ;;  %v1028_v61 = vpop.f32.mrf.mxu2  ;;  %v1108_v62 = vpop.f32.mrf.mxu3  ;;  %v2012_v58 = vld [vmem:[%s2147_s27 + $0x160] sm:$0xff] }
  0xba   : > { %1439 = vst.msk [vmem:[%s2228_s30 + $0x10] sm:$0xf] %vm1434_vm3, %v1310_v59  ;;  %v1029_v63 = vadd.f32 %v2213_v39, %v1028_v61  ;;  %v1109_v0 = vadd.f32 %v2213_v39, %v1108_v62  ;;  %v870_v1 = vpop.f32.mrf.mxu0  ;;  %v950_v2 = vpop.f32.mrf.mxu1  ;;  %v2028_v59 = vld [vmem:[%s2147_s27 + $0x1e0] sm:$0xff] }
  0xbb   : > { %1471 = vst.msk [vmem:[%s2228_s30 + $0x90] sm:$0xf] %vm1434_vm3, %v1342_v60  ;;  %v871_v3 = vadd.f32 %v2213_v39, %v870_v1  ;;  %v951_v4 = vadd.f32 %v2213_v39, %v950_v2 }
  0xbc   : > { %v1246_v5 = vmax.f32 %v1029_v63, 0.0  ;;  %v1278_v6 = vmax.f32 %v1109_v0, 0.0 }
  0xbd   : > { %v1183_v7 = vmax.f32 %v871_v3, 0.0  ;;  %v1215_v8 = vmax.f32 %v951_v4, 0.0 }
  0xbe   : > { %v1374_v9 = vpack.c.bf16 %v1246_v5, %v1246_v5  ;;  %v1406_v10 = vpack.c.bf16 %v1278_v6, %v1278_v6 }
  0xbf   : > { %v1311_v11 = vpack.c.bf16 %v1183_v7, %v1183_v7  ;;  %v1343_v12 = vpack.c.bf16 %v1215_v8, %v1215_v8 }
  0xc0   : > { %1503 = vst.msk [vmem:[%s2228_s30 + $0x110] sm:$0xf] %vm1434_vm3, %v1374_v9 }
  0xc1   : > { %1535 = vst.msk [vmem:[%s2228_s30 + $0x190] sm:$0xf] %vm1434_vm3, %v1406_v10  ;;  %v1030_v13 = vpop.f32.mrf.mxu2  ;;  %v1110_v14 = vpop.f32.mrf.mxu3 }
  0xc2   : > { %1440 = vst.msk [vmem:[%s2228_s30 + $0x14] sm:$0xf] %vm1434_vm3, %v1311_v11  ;;  %v1031_v17 = vadd.f32 %v2213_v39, %v1030_v13  ;;  %v1111_v18 = vadd.f32 %v2213_v39, %v1110_v14  ;;  %v873_v19 = vpop.f32.mrf.mxu0  ;;  %v953_v20 = vpop.f32.mrf.mxu1 }
  0xc3   : > { %1472 = vst.msk [vmem:[%s2228_s30 + $0x94] sm:$0xf] %vm1434_vm3, %v1343_v12  ;;  %v874_v23 = vadd.f32 %v2213_v39, %v873_v19  ;;  %v954_v24 = vadd.f32 %v2213_v39, %v953_v20 }
  0xc4   : > { %v1247_v25 = vmax.f32 %v1031_v17, 0.0  ;;  %v1279_v26 = vmax.f32 %v1111_v18, 0.0 }
  0xc5   : > { %v1184_v27 = vmax.f32 %v874_v23, 0.0  ;;  %v1216_v28 = vmax.f32 %v954_v24, 0.0  ;;  %1913 = vmatmul.msk.bf16.gmra.mxu0 %vm649_vm2, %v1979_v15  ;;  %1929 = vmatmul.msk.bf16.gmra.mxu1 %vm649_vm2, %v1995_v16  ;;  %v1981_v24 = vld [vmem:[%s2147_s27 + $0x68] sm:$0xff] }
  0xc6   : > { %v1375_v29 = vpack.c.bf16 %v1247_v25, %v1247_v25  ;;  %v1407_v30 = vpack.c.bf16 %v1279_v26, %v1279_v26  ;;  %1945 = vmatmul.msk.bf16.gmra.mxu2 %vm649_vm2, %v2011_v21  ;;  %1961 = vmatmul.msk.bf16.gmra.mxu3 %vm649_vm2, %v2027_v22  ;;  %v1997_v25 = vld [vmem:[%s2147_s27 + $0xe8] sm:$0xff] }
  0xc7   : > { %v1312_v31 = vpack.c.bf16 %v1184_v27, %v1184_v27  ;;  %v1344_v32 = vpack.c.bf16 %v1216_v28, %v1216_v28 }
  0xc8   : > { %1504 = vst.msk [vmem:[%s2228_s30 + $0x114] sm:$0xf] %vm1434_vm3, %v1375_v29 }
  0xc9   : > { %1536 = vst.msk [vmem:[%s2228_s30 + $0x194] sm:$0xf] %vm1434_vm3, %v1407_v30  ;;  %v1033_v33 = vpop.f32.mrf.mxu2  ;;  %v1113_v34 = vpop.f32.mrf.mxu3  ;;  %v2013_v30 = vld [vmem:[%s2147_s27 + $0x168] sm:$0xff] }
  0xca   : > { %1441 = vst.msk [vmem:[%s2228_s30 + $0x18] sm:$0xf] %vm1434_vm3, %v1312_v31  ;;  %v1034_v35 = vadd.f32 %v2213_v39, %v1033_v33  ;;  %v1114_v36 = vadd.f32 %v2213_v39, %v1113_v34  ;;  %v875_v37 = vpop.f32.mrf.mxu0  ;;  %v955_v38 = vpop.f32.mrf.mxu1  ;;  %v2029_v31 = vld [vmem:[%s2147_s27 + $0x1e8] sm:$0xff] }
  0xcb   : > { %1473 = vst.msk [vmem:[%s2228_s30 + $0x98] sm:$0xf] %vm1434_vm3, %v1344_v32  ;;  %v876_v40 = vadd.f32 %v2213_v39, %v875_v37  ;;  %v956_v41 = vadd.f32 %v2213_v39, %v955_v38 }
  0xcc   : > { %v1248_v42 = vmax.f32 %v1034_v35, 0.0  ;;  %v1280_v43 = vmax.f32 %v1114_v36, 0.0 }
  0xcd   : > { %v1185_v44 = vmax.f32 %v876_v40, 0.0  ;;  %v1217_v45 = vmax.f32 %v956_v41, 0.0 }
  0xce   : > { %v1376_v46 = vpack.c.bf16 %v1248_v42, %v1248_v42  ;;  %v1408_v47 = vpack.c.bf16 %v1280_v43, %v1280_v43 }
  0xcf   : > { %v1313_v48 = vpack.c.bf16 %v1185_v44, %v1185_v44  ;;  %v1345_v49 = vpack.c.bf16 %v1217_v45, %v1217_v45 }
  0xd0   : > { %1505 = vst.msk [vmem:[%s2228_s30 + $0x118] sm:$0xf] %vm1434_vm3, %v1376_v46 }
  0xd1   : > { %1537 = vst.msk [vmem:[%s2228_s30 + $0x198] sm:$0xf] %vm1434_vm3, %v1408_v47  ;;  %v1035_v50 = vpop.f32.mrf.mxu2  ;;  %v1115_v51 = vpop.f32.mrf.mxu3 }
  0xd2   : > { %1442 = vst.msk [vmem:[%s2228_s30 + $0x1c] sm:$0xf] %vm1434_vm3, %v1313_v48  ;;  %v1036_v54 = vadd.f32 %v2213_v39, %v1035_v50  ;;  %v1116_v55 = vadd.f32 %v2213_v39, %v1115_v51  ;;  %v878_v56 = vpop.f32.mrf.mxu0  ;;  %v958_v57 = vpop.f32.mrf.mxu1 }
  0xd3   : > { %1474 = vst.msk [vmem:[%s2228_s30 + $0x9c] sm:$0xf] %vm1434_vm3, %v1345_v49  ;;  %v879_v60 = vadd.f32 %v2213_v39, %v878_v56  ;;  %v959_v61 = vadd.f32 %v2213_v39, %v958_v57 }
  0xd4   : > { %v1249_v62 = vmax.f32 %v1036_v54, 0.0  ;;  %v1281_v63 = vmax.f32 %v1116_v55, 0.0 }
  0xd5   : > { %v1186_v0 = vmax.f32 %v879_v60, 0.0  ;;  %v1218_v1 = vmax.f32 %v959_v61, 0.0  ;;  %1914 = vmatmul.msk.bf16.gmra.mxu0 %vm649_vm2, %v1980_v52  ;;  %1930 = vmatmul.msk.bf16.gmra.mxu1 %vm649_vm2, %v1996_v53  ;;  %v1982_v61 = vld [vmem:[%s2147_s27 + $0x70] sm:$0xff] }
  0xd6   : > { %v1377_v2 = vpack.c.bf16 %v1249_v62, %v1249_v62  ;;  %v1409_v3 = vpack.c.bf16 %v1281_v63, %v1281_v63  ;;  %1946 = vmatmul.msk.bf16.gmra.mxu2 %vm649_vm2, %v2012_v58  ;;  %1962 = vmatmul.msk.bf16.gmra.mxu3 %vm649_vm2, %v2028_v59  ;;  %v1998_v62 = vld [vmem:[%s2147_s27 + $0xf0] sm:$0xff] }
  0xd7   : > { %v1314_v4 = vpack.c.bf16 %v1186_v0, %v1186_v0  ;;  %v1346_v5 = vpack.c.bf16 %v1218_v1, %v1218_v1 }
  0xd8   : > { %1506 = vst.msk [vmem:[%s2228_s30 + $0x11c] sm:$0xf] %vm1434_vm3, %v1377_v2 }
  0xd9   : > { %1538 = vst.msk [vmem:[%s2228_s30 + $0x19c] sm:$0xf] %vm1434_vm3, %v1409_v3  ;;  %v1038_v6 = vpop.f32.mrf.mxu2  ;;  %v1118_v7 = vpop.f32.mrf.mxu3  ;;  %v2014_v3 = vld [vmem:[%s2147_s27 + $0x170] sm:$0xff] }
  0xda   : > { %1443 = vst.msk [vmem:[%s2228_s30 + $0x20] sm:$0xf] %vm1434_vm3, %v1314_v4  ;;  %v1039_v8 = vadd.f32 %v2213_v39, %v1038_v6  ;;  %v1119_v9 = vadd.f32 %v2213_v39, %v1118_v7  ;;  %v880_v10 = vpop.f32.mrf.mxu0  ;;  %v960_v11 = vpop.f32.mrf.mxu1  ;;  %v2030_v4 = vld [vmem:[%s2147_s27 + $0x1f0] sm:$0xff] }
  0xdb   : > { %1475 = vst.msk [vmem:[%s2228_s30 + $0xa0] sm:$0xf] %vm1434_vm3, %v1346_v5  ;;  %v881_v12 = vadd.f32 %v2213_v39, %v880_v10  ;;  %v961_v13 = vadd.f32 %v2213_v39, %v960_v11 }
  0xdc   : > { %v1250_v14 = vmax.f32 %v1039_v8, 0.0  ;;  %v1282_v15 = vmax.f32 %v1119_v9, 0.0 }
  0xdd   : > { %v1187_v16 = vmax.f32 %v881_v12, 0.0  ;;  %v1219_v17 = vmax.f32 %v961_v13, 0.0 }
  0xde   : > { %v1378_v18 = vpack.c.bf16 %v1250_v14, %v1250_v14  ;;  %v1410_v19 = vpack.c.bf16 %v1282_v15, %v1282_v15 }
  0xdf   : > { %v1315_v20 = vpack.c.bf16 %v1187_v16, %v1187_v16  ;;  %v1347_v21 = vpack.c.bf16 %v1219_v17, %v1219_v17 }
  0xe0   : > { %1507 = vst.msk [vmem:[%s2228_s30 + $0x120] sm:$0xf] %vm1434_vm3, %v1378_v18 }
  0xe1   : > { %1539 = vst.msk [vmem:[%s2228_s30 + $0x1a0] sm:$0xf] %vm1434_vm3, %v1410_v19  ;;  %v1040_v22 = vpop.f32.mrf.mxu2  ;;  %v1120_v23 = vpop.f32.mrf.mxu3 }
  0xe2   : > { %1444 = vst.msk [vmem:[%s2228_s30 + $0x24] sm:$0xf] %vm1434_vm3, %v1315_v20  ;;  %v1041_v26 = vadd.f32 %v2213_v39, %v1040_v22  ;;  %v1121_v27 = vadd.f32 %v2213_v39, %v1120_v23  ;;  %v883_v28 = vpop.f32.mrf.mxu0  ;;  %v963_v29 = vpop.f32.mrf.mxu1 }
  0xe3   : > { %1476 = vst.msk [vmem:[%s2228_s30 + $0xa4] sm:$0xf] %vm1434_vm3, %v1347_v21  ;;  %v884_v32 = vadd.f32 %v2213_v39, %v883_v28  ;;  %v964_v33 = vadd.f32 %v2213_v39, %v963_v29 }
  0xe4   : > { %v1251_v34 = vmax.f32 %v1041_v26, 0.0  ;;  %v1283_v35 = vmax.f32 %v1121_v27, 0.0 }
  0xe5   : > { %v1188_v36 = vmax.f32 %v884_v32, 0.0  ;;  %v1220_v37 = vmax.f32 %v964_v33, 0.0  ;;  %1915 = vmatmul.msk.bf16.gmra.mxu0 %vm649_vm2, %v1981_v24  ;;  %1931 = vmatmul.msk.bf16.gmra.mxu1 %vm649_vm2, %v1997_v25  ;;  %v1983_v33 = vld [vmem:[%s2147_s27 + $0x78] sm:$0xff] }
  0xe6   : > { %v1379_v38 = vpack.c.bf16 %v1251_v34, %v1251_v34  ;;  %v1411_v40 = vpack.c.bf16 %v1283_v35, %v1283_v35  ;;  %1947 = vmatmul.msk.bf16.gmra.mxu2 %vm649_vm2, %v2013_v30  ;;  %1963 = vmatmul.msk.bf16.gmra.mxu3 %vm649_vm2, %v2029_v31  ;;  %v1999_v34 = vld [vmem:[%s2147_s27 + $0xf8] sm:$0xff] }
  0xe7   : > { %v1316_v41 = vpack.c.bf16 %v1188_v36, %v1188_v36  ;;  %v1348_v42 = vpack.c.bf16 %v1220_v37, %v1220_v37 }
  0xe8   : > { %1508 = vst.msk [vmem:[%s2228_s30 + $0x124] sm:$0xf] %vm1434_vm3, %v1379_v38 }
  0xe9   : > { %1540 = vst.msk [vmem:[%s2228_s30 + $0x1a4] sm:$0xf] %vm1434_vm3, %v1411_v40  ;;  %v1043_v43 = vpop.f32.mrf.mxu2  ;;  %v1123_v44 = vpop.f32.mrf.mxu3  ;;  %v2015_v40 = vld [vmem:[%s2147_s27 + $0x178] sm:$0xff] }
  0xea   : > { %1445 = vst.msk [vmem:[%s2228_s30 + $0x28] sm:$0xf] %vm1434_vm3, %v1316_v41  ;;  %v1044_v45 = vadd.f32 %v2213_v39, %v1043_v43  ;;  %v1124_v46 = vadd.f32 %v2213_v39, %v1123_v44  ;;  %v885_v47 = vpop.f32.mrf.mxu0  ;;  %v965_v48 = vpop.f32.mrf.mxu1  ;;  %v2031_v41 = vld [vmem:[%s2147_s27 + $0x1f8] sm:$0xff] }
  0xeb   : > { %1477 = vst.msk [vmem:[%s2228_s30 + $0xa8] sm:$0xf] %vm1434_vm3, %v1348_v42  ;;  %v886_v49 = vadd.f32 %v2213_v39, %v885_v47  ;;  %v966_v50 = vadd.f32 %v2213_v39, %v965_v48 }
  0xec   : > { %v1252_v51 = vmax.f32 %v1044_v45, 0.0  ;;  %v1284_v52 = vmax.f32 %v1124_v46, 0.0 }
  0xed   : > { %v1189_v53 = vmax.f32 %v886_v49, 0.0  ;;  %v1221_v54 = vmax.f32 %v966_v50, 0.0 }
  0xee   : > { %v1380_v55 = vpack.c.bf16 %v1252_v51, %v1252_v51  ;;  %v1412_v56 = vpack.c.bf16 %v1284_v52, %v1284_v52 }
  0xef   : > { %v1317_v57 = vpack.c.bf16 %v1189_v53, %v1189_v53  ;;  %v1349_v58 = vpack.c.bf16 %v1221_v54, %v1221_v54 }
  0xf0   : > { %1509 = vst.msk [vmem:[%s2228_s30 + $0x128] sm:$0xf] %vm1434_vm3, %v1380_v55 }
  0xf1   : > { %1541 = vst.msk [vmem:[%s2228_s30 + $0x1a8] sm:$0xf] %vm1434_vm3, %v1412_v56  ;;  %v1045_v59 = vpop.f32.mrf.mxu2  ;;  %v1125_v60 = vpop.f32.mrf.mxu3 }
  0xf2   : > { %1446 = vst.msk [vmem:[%s2228_s30 + $0x2c] sm:$0xf] %vm1434_vm3, %v1317_v57  ;;  %v1046_v63 = vadd.f32 %v2213_v39, %v1045_v59  ;;  %v1126_v0 = vadd.f32 %v2213_v39, %v1125_v60  ;;  %v888_v1 = vpop.f32.mrf.mxu0  ;;  %v968_v2 = vpop.f32.mrf.mxu1 }
  0xf3   : > { %1478 = vst.msk [vmem:[%s2228_s30 + $0xac] sm:$0xf] %vm1434_vm3, %v1349_v58  ;;  %v889_v5 = vadd.f32 %v2213_v39, %v888_v1  ;;  %v969_v6 = vadd.f32 %v2213_v39, %v968_v2 }
  0xf4   : > { %v1253_v7 = vmax.f32 %v1046_v63, 0.0  ;;  %v1285_v8 = vmax.f32 %v1126_v0, 0.0 }
  0xf5   : > { %v1190_v9 = vmax.f32 %v889_v5, 0.0  ;;  %v1222_v10 = vmax.f32 %v969_v6, 0.0  ;;  %1916 = vmatmul.msk.bf16.gmra.mxu0 %vm649_vm2, %v1982_v61  ;;  %1932 = vmatmul.msk.bf16.gmra.mxu1 %vm649_vm2, %v1998_v62 }
  0xf6   : > { %v1381_v11 = vpack.c.bf16 %v1253_v7, %v1253_v7  ;;  %v1413_v12 = vpack.c.bf16 %v1285_v8, %v1285_v8  ;;  %1948 = vmatmul.msk.bf16.gmra.mxu2 %vm649_vm2, %v2014_v3  ;;  %1964 = vmatmul.msk.bf16.gmra.mxu3 %vm649_vm2, %v2030_v4 }
  0xf7   : > { %v1318_v13 = vpack.c.bf16 %v1190_v9, %v1190_v9  ;;  %v1350_v14 = vpack.c.bf16 %v1222_v10, %v1222_v10 }
  0xf8   : > { %1510 = vst.msk [vmem:[%s2228_s30 + $0x12c] sm:$0xf] %vm1434_vm3, %v1381_v11 }
  0xf9   : > { %1542 = vst.msk [vmem:[%s2228_s30 + $0x1ac] sm:$0xf] %vm1434_vm3, %v1413_v12  ;;  %v1048_v15 = vpop.f32.mrf.mxu2  ;;  %v1128_v16 = vpop.f32.mrf.mxu3 }
  0xfa   : > { %1447 = vst.msk [vmem:[%s2228_s30 + $0x30] sm:$0xf] %vm1434_vm3, %v1318_v13  ;;  %v1049_v17 = vadd.f32 %v2213_v39, %v1048_v15  ;;  %v1129_v18 = vadd.f32 %v2213_v39, %v1128_v16  ;;  %v890_v19 = vpop.f32.mrf.mxu0  ;;  %v970_v20 = vpop.f32.mrf.mxu1 }
  0xfb   : > { %1479 = vst.msk [vmem:[%s2228_s30 + $0xb0] sm:$0xf] %vm1434_vm3, %v1350_v14  ;;  %v891_v21 = vadd.f32 %v2213_v39, %v890_v19  ;;  %v971_v22 = vadd.f32 %v2213_v39, %v970_v20 }
  0xfc   : > { %v1254_v23 = vmax.f32 %v1049_v17, 0.0  ;;  %v1286_v24 = vmax.f32 %v1129_v18, 0.0 }
  0xfd   : > { %v1191_v25 = vmax.f32 %v891_v21, 0.0  ;;  %v1223_v26 = vmax.f32 %v971_v22, 0.0 }
  0xfe   : > { %v1382_v27 = vpack.c.bf16 %v1254_v23, %v1254_v23  ;;  %v1414_v28 = vpack.c.bf16 %v1286_v24, %v1286_v24 }
  0xff   : > { %v1319_v29 = vpack.c.bf16 %v1191_v25, %v1191_v25  ;;  %v1351_v30 = vpack.c.bf16 %v1223_v26, %v1223_v26 }
 0x100   : > { %1511 = vst.msk [vmem:[%s2228_s30 + $0x130] sm:$0xf] %vm1434_vm3, %v1382_v27 }
 0x101   : > { %1543 = vst.msk [vmem:[%s2228_s30 + $0x1b0] sm:$0xf] %vm1434_vm3, %v1414_v28  ;;  %v1050_v31 = vpop.f32.mrf.mxu2  ;;  %v1130_v32 = vpop.f32.mrf.mxu3 }
 0x102   : > { %1448 = vst.msk [vmem:[%s2228_s30 + $0x34] sm:$0xf] %vm1434_vm3, %v1319_v29  ;;  %v1051_v35 = vadd.f32 %v2213_v39, %v1050_v31  ;;  %v1131_v36 = vadd.f32 %v2213_v39, %v1130_v32  ;;  %v893_v37 = vpop.f32.mrf.mxu0  ;;  %v973_v38 = vpop.f32.mrf.mxu1 }
 0x103   : > { %1480 = vst.msk [vmem:[%s2228_s30 + $0xb4] sm:$0xf] %vm1434_vm3, %v1351_v30  ;;  %v894_v42 = vadd.f32 %v2213_v39, %v893_v37  ;;  %v974_v43 = vadd.f32 %v2213_v39, %v973_v38 }
 0x104   : > { %v1255_v44 = vmax.f32 %v1051_v35, 0.0  ;;  %v1287_v45 = vmax.f32 %v1131_v36, 0.0 }
 0x105   : > { %v1192_v46 = vmax.f32 %v894_v42, 0.0  ;;  %v1224_v47 = vmax.f32 %v974_v43, 0.0  ;;  %1917 = vmatmul.msk.bf16.gmra.mxu0 %vm649_vm2, %v1983_v33  ;;  %1933 = vmatmul.msk.bf16.gmra.mxu1 %vm649_vm2, %v1999_v34 }
 0x106   : > { %v1383_v48 = vpack.c.bf16 %v1255_v44, %v1255_v44  ;;  %v1415_v49 = vpack.c.bf16 %v1287_v45, %v1287_v45  ;;  %1949 = vmatmul.msk.bf16.gmra.mxu2 %vm649_vm2, %v2015_v40  ;;  %1965 = vmatmul.msk.bf16.gmra.mxu3 %vm649_vm2, %v2031_v41 }
 0x107   : > { %v1320_v50 = vpack.c.bf16 %v1192_v46, %v1192_v46  ;;  %v1352_v51 = vpack.c.bf16 %v1224_v47, %v1224_v47 }
 0x108   : > { %1512 = vst.msk [vmem:[%s2228_s30 + $0x134] sm:$0xf] %vm1434_vm3, %v1383_v48 }
 0x109   : > { %1544 = vst.msk [vmem:[%s2228_s30 + $0x1b4] sm:$0xf] %vm1434_vm3, %v1415_v49  ;;  %v1053_v52 = vpop.f32.mrf.mxu2  ;;  %v1133_v53 = vpop.f32.mrf.mxu3 }
 0x10a   : > { %1449 = vst.msk [vmem:[%s2228_s30 + $0x38] sm:$0xf] %vm1434_vm3, %v1320_v50  ;;  %v1054_v54 = vadd.f32 %v2213_v39, %v1053_v52  ;;  %v1134_v55 = vadd.f32 %v2213_v39, %v1133_v53  ;;  %v895_v56 = vpop.f32.mrf.mxu0  ;;  %v975_v57 = vpop.f32.mrf.mxu1 }
 0x10b   : > { %1481 = vst.msk [vmem:[%s2228_s30 + $0xb8] sm:$0xf] %vm1434_vm3, %v1352_v51  ;;  %v896_v58 = vadd.f32 %v2213_v39, %v895_v56  ;;  %v976_v59 = vadd.f32 %v2213_v39, %v975_v57 }
 0x10c   : > { %v1256_v60 = vmax.f32 %v1054_v54, 0.0  ;;  %v1288_v61 = vmax.f32 %v1134_v55, 0.0 }
 0x10d   : > { %v1193_v62 = vmax.f32 %v896_v58, 0.0  ;;  %v1225_v63 = vmax.f32 %v976_v59, 0.0 }
 0x10e   : > { %v1384_v0 = vpack.c.bf16 %v1256_v60, %v1256_v60  ;;  %v1416_v1 = vpack.c.bf16 %v1288_v61, %v1288_v61 }
 0x10f   : > { %v1321_v2 = vpack.c.bf16 %v1193_v62, %v1193_v62  ;;  %v1353_v3 = vpack.c.bf16 %v1225_v63, %v1225_v63 }
 0x110   : > { %1513 = vst.msk [vmem:[%s2228_s30 + $0x138] sm:$0xf] %vm1434_vm3, %v1384_v0 }
 0x111   : > { %1545 = vst.msk [vmem:[%s2228_s30 + $0x1b8] sm:$0xf] %vm1434_vm3, %v1416_v1  ;;  %v1055_v4 = vpop.f32.mrf.mxu2  ;;  %v1135_v5 = vpop.f32.mrf.mxu3 }
 0x112   : > { %1450 = vst.msk [vmem:[%s2228_s30 + $0x3c] sm:$0xf] %vm1434_vm3, %v1321_v2  ;;  %v1056_v6 = vadd.f32 %v2213_v39, %v1055_v4  ;;  %v1136_v7 = vadd.f32 %v2213_v39, %v1135_v5  ;;  %v898_v8 = vpop.f32.mrf.mxu0  ;;  %v978_v9 = vpop.f32.mrf.mxu1 }
 0x113   : > { %1482 = vst.msk [vmem:[%s2228_s30 + $0xbc] sm:$0xf] %vm1434_vm3, %v1353_v3  ;;  %v899_v10 = vadd.f32 %v2213_v39, %v898_v8  ;;  %v979_v11 = vadd.f32 %v2213_v39, %v978_v9 }
 0x114   : > { %v1257_v12 = vmax.f32 %v1056_v6, 0.0  ;;  %v1289_v13 = vmax.f32 %v1136_v7, 0.0 }
 0x115   : > { %v1194_v14 = vmax.f32 %v899_v10, 0.0  ;;  %v1226_v15 = vmax.f32 %v979_v11, 0.0 }
 0x116   : > { %v1385_v16 = vpack.c.bf16 %v1257_v12, %v1257_v12  ;;  %v1417_v17 = vpack.c.bf16 %v1289_v13, %v1289_v13 }
 0x117   : > { %v1322_v18 = vpack.c.bf16 %v1194_v14, %v1194_v14  ;;  %v1354_v19 = vpack.c.bf16 %v1226_v15, %v1226_v15 }
 0x118   : > { %1514 = vst.msk [vmem:[%s2228_s30 + $0x13c] sm:$0xf] %vm1434_vm3, %v1385_v16 }
 0x119   : > { %1546 = vst.msk [vmem:[%s2228_s30 + $0x1bc] sm:$0xf] %vm1434_vm3, %v1417_v17  ;;  %v1058_v20 = vpop.f32.mrf.mxu2  ;;  %v1138_v21 = vpop.f32.mrf.mxu3 }
 0x11a   : > { %1451 = vst.msk [vmem:[%s2228_s30 + $0x40] sm:$0xf] %vm1434_vm3, %v1322_v18  ;;  %v1059_v22 = vadd.f32 %v2213_v39, %v1058_v20  ;;  %v1139_v23 = vadd.f32 %v2213_v39, %v1138_v21  ;;  %v900_v24 = vpop.f32.mrf.mxu0  ;;  %v980_v25 = vpop.f32.mrf.mxu1 }
 0x11b   : > { %1483 = vst.msk [vmem:[%s2228_s30 + $0xc0] sm:$0xf] %vm1434_vm3, %v1354_v19  ;;  %v901_v26 = vadd.f32 %v2213_v39, %v900_v24  ;;  %v981_v27 = vadd.f32 %v2213_v39, %v980_v25 }
 0x11c   : > { %v1258_v28 = vmax.f32 %v1059_v22, 0.0  ;;  %v1290_v29 = vmax.f32 %v1139_v23, 0.0 }
 0x11d   : > { %v1195_v30 = vmax.f32 %v901_v26, 0.0  ;;  %v1227_v31 = vmax.f32 %v981_v27, 0.0 }
 0x11e   : > { %v1386_v32 = vpack.c.bf16 %v1258_v28, %v1258_v28  ;;  %v1418_v33 = vpack.c.bf16 %v1290_v29, %v1290_v29 }
 0x11f   : > { %v1323_v34 = vpack.c.bf16 %v1195_v30, %v1195_v30  ;;  %v1355_v35 = vpack.c.bf16 %v1227_v31, %v1227_v31 }
 0x120   : > { %1515 = vst.msk [vmem:[%s2228_s30 + $0x140] sm:$0xf] %vm1434_vm3, %v1386_v32 }
 0x121   : > { %1547 = vst.msk [vmem:[%s2228_s30 + $0x1c0] sm:$0xf] %vm1434_vm3, %v1418_v33  ;;  %v1060_v36 = vpop.f32.mrf.mxu2  ;;  %v1140_v37 = vpop.f32.mrf.mxu3 }
 0x122   : > { %1452 = vst.msk [vmem:[%s2228_s30 + $0x44] sm:$0xf] %vm1434_vm3, %v1323_v34  ;;  %v1061_v38 = vadd.f32 %v2213_v39, %v1060_v36  ;;  %v1141_v40 = vadd.f32 %v2213_v39, %v1140_v37  ;;  %v903_v41 = vpop.f32.mrf.mxu0  ;;  %v983_v42 = vpop.f32.mrf.mxu1 }
 0x123   : > { %1484 = vst.msk [vmem:[%s2228_s30 + $0xc4] sm:$0xf] %vm1434_vm3, %v1355_v35  ;;  %v904_v43 = vadd.f32 %v2213_v39, %v903_v41  ;;  %v984_v44 = vadd.f32 %v2213_v39, %v983_v42 }
 0x124   : > { %v1259_v45 = vmax.f32 %v1061_v38, 0.0  ;;  %v1291_v46 = vmax.f32 %v1141_v40, 0.0 }
 0x125   : > { %v1196_v47 = vmax.f32 %v904_v43, 0.0  ;;  %v1228_v48 = vmax.f32 %v984_v44, 0.0 }
 0x126   : > { %v1387_v49 = vpack.c.bf16 %v1259_v45, %v1259_v45  ;;  %v1419_v50 = vpack.c.bf16 %v1291_v46, %v1291_v46 }
 0x127   : > { %v1324_v51 = vpack.c.bf16 %v1196_v47, %v1196_v47  ;;  %v1356_v52 = vpack.c.bf16 %v1228_v48, %v1228_v48 }
 0x128   : > { %1516 = vst.msk [vmem:[%s2228_s30 + $0x144] sm:$0xf] %vm1434_vm3, %v1387_v49 }
 0x129   : > { %1548 = vst.msk [vmem:[%s2228_s30 + $0x1c4] sm:$0xf] %vm1434_vm3, %v1419_v50  ;;  %v1063_v53 = vpop.f32.mrf.mxu2  ;;  %v1143_v54 = vpop.f32.mrf.mxu3 }
 0x12a   : > { %1453 = vst.msk [vmem:[%s2228_s30 + $0x48] sm:$0xf] %vm1434_vm3, %v1324_v51  ;;  %v1064_v55 = vadd.f32 %v2213_v39, %v1063_v53  ;;  %v1144_v56 = vadd.f32 %v2213_v39, %v1143_v54  ;;  %v905_v57 = vpop.f32.mrf.mxu0  ;;  %v985_v58 = vpop.f32.mrf.mxu1 }
 0x12b   : > { %1485 = vst.msk [vmem:[%s2228_s30 + $0xc8] sm:$0xf] %vm1434_vm3, %v1356_v52  ;;  %v906_v59 = vadd.f32 %v2213_v39, %v905_v57  ;;  %v986_v60 = vadd.f32 %v2213_v39, %v985_v58 }
 0x12c   : > { %v1260_v61 = vmax.f32 %v1064_v55, 0.0  ;;  %v1292_v62 = vmax.f32 %v1144_v56, 0.0  ;;  %v2554_v56 = vld [vmem:[#allocation2] ss:$0 sm:$0xff] }
 0x12d   : > { %v1197_v63 = vmax.f32 %v906_v59, 0.0  ;;  %v1229_v0 = vmax.f32 %v986_v60, 0.0 }
 0x12e   : > { %v1388_v1 = vpack.c.bf16 %v1260_v61, %v1260_v61  ;;  %v1420_v2 = vpack.c.bf16 %v1292_v62, %v1292_v62 }
 0x12f   : > { %v1325_v3 = vpack.c.bf16 %v1197_v63, %v1197_v63  ;;  %v1357_v4 = vpack.c.bf16 %v1229_v0, %v1229_v0 }
 0x130   : > { %1517 = vst.msk [vmem:[%s2228_s30 + $0x148] sm:$0xf] %vm1434_vm3, %v1388_v1 }
 0x131   : > { %1549 = vst.msk [vmem:[%s2228_s30 + $0x1c8] sm:$0xf] %vm1434_vm3, %v1420_v2  ;;  %v1065_v5 = vpop.f32.mrf.mxu2  ;;  %v1145_v6 = vpop.f32.mrf.mxu3 }
 0x132   : > { %1454 = vst.msk [vmem:[%s2228_s30 + $0x4c] sm:$0xf] %vm1434_vm3, %v1325_v3  ;;  %v1066_v7 = vadd.f32 %v2213_v39, %v1065_v5  ;;  %v1146_v8 = vadd.f32 %v2213_v39, %v1145_v6  ;;  %v908_v9 = vpop.f32.mrf.mxu0  ;;  %v988_v10 = vpop.f32.mrf.mxu1 }
 0x133   : > { %1486 = vst.msk [vmem:[%s2228_s30 + $0xcc] sm:$0xf] %vm1434_vm3, %v1357_v4  ;;  %v909_v11 = vadd.f32 %v2213_v39, %v908_v9  ;;  %v989_v12 = vadd.f32 %v2213_v39, %v988_v10 }
 0x134   : > { %v1261_v13 = vmax.f32 %v1066_v7, 0.0  ;;  %v1293_v14 = vmax.f32 %v1146_v8, 0.0 }
 0x135   : > { %v1198_v15 = vmax.f32 %v909_v11, 0.0  ;;  %v1230_v16 = vmax.f32 %v989_v12, 0.0 }
 0x136   : > { %v1389_v17 = vpack.c.bf16 %v1261_v13, %v1261_v13  ;;  %v1421_v18 = vpack.c.bf16 %v1293_v14, %v1293_v14 }
 0x137   : > { %v1326_v19 = vpack.c.bf16 %v1198_v15, %v1198_v15  ;;  %v1358_v20 = vpack.c.bf16 %v1230_v16, %v1230_v16 }
 0x138   : > { %1518 = vst.msk [vmem:[%s2228_s30 + $0x14c] sm:$0xf] %vm1434_vm3, %v1389_v17 }
 0x139   : > { %1550 = vst.msk [vmem:[%s2228_s30 + $0x1cc] sm:$0xf] %vm1434_vm3, %v1421_v18  ;;  %v1068_v21 = vpop.f32.mrf.mxu2  ;;  %v1148_v22 = vpop.f32.mrf.mxu3 }
 0x13a   : > { %1455 = vst.msk [vmem:[%s2228_s30 + $0x50] sm:$0xf] %vm1434_vm3, %v1326_v19  ;;  %v1069_v23 = vadd.f32 %v2213_v39, %v1068_v21  ;;  %v1149_v24 = vadd.f32 %v2213_v39, %v1148_v22  ;;  %v910_v25 = vpop.f32.mrf.mxu0  ;;  %v990_v26 = vpop.f32.mrf.mxu1 }
 0x13b   : > { %1487 = vst.msk [vmem:[%s2228_s30 + $0xd0] sm:$0xf] %vm1434_vm3, %v1358_v20  ;;  %v911_v27 = vadd.f32 %v2213_v39, %v910_v25  ;;  %v991_v28 = vadd.f32 %v2213_v39, %v990_v26 }
 0x13c   : > { %v1262_v29 = vmax.f32 %v1069_v23, 0.0  ;;  %v1294_v30 = vmax.f32 %v1149_v24, 0.0 }
 0x13d   : > { %v1199_v31 = vmax.f32 %v911_v27, 0.0  ;;  %v1231_v32 = vmax.f32 %v991_v28, 0.0 }
 0x13e   : > { %v1390_v33 = vpack.c.bf16 %v1262_v29, %v1262_v29  ;;  %v1422_v34 = vpack.c.bf16 %v1294_v30, %v1294_v30 }
 0x13f   : > { %v1327_v35 = vpack.c.bf16 %v1199_v31, %v1199_v31  ;;  %v1359_v36 = vpack.c.bf16 %v1231_v32, %v1231_v32 }
 0x140   : > { %1519 = vst.msk [vmem:[%s2228_s30 + $0x150] sm:$0xf] %vm1434_vm3, %v1390_v33 }
 0x141   : > { %1551 = vst.msk [vmem:[%s2228_s30 + $0x1d0] sm:$0xf] %vm1434_vm3, %v1422_v34  ;;  %v1070_v37 = vpop.f32.mrf.mxu2  ;;  %v1150_v38 = vpop.f32.mrf.mxu3 }
 0x142   : > { %1456 = vst.msk [vmem:[%s2228_s30 + $0x54] sm:$0xf] %vm1434_vm3, %v1327_v35  ;;  %v1071_v40 = vadd.f32 %v2213_v39, %v1070_v37  ;;  %v1151_v41 = vadd.f32 %v2213_v39, %v1150_v38  ;;  %v913_v42 = vpop.f32.mrf.mxu0  ;;  %v993_v43 = vpop.f32.mrf.mxu1 }
 0x143   : > { %1488 = vst.msk [vmem:[%s2228_s30 + $0xd4] sm:$0xf] %vm1434_vm3, %v1359_v36  ;;  %v914_v44 = vadd.f32 %v2213_v39, %v913_v42  ;;  %v994_v45 = vadd.f32 %v2213_v39, %v993_v43 }
 0x144   : > { %v1263_v46 = vmax.f32 %v1071_v40, 0.0  ;;  %v1295_v47 = vmax.f32 %v1151_v41, 0.0 }
 0x145   : > { %v1200_v48 = vmax.f32 %v914_v44, 0.0  ;;  %v1232_v49 = vmax.f32 %v994_v45, 0.0 }
 0x146   : > { %v1391_v50 = vpack.c.bf16 %v1263_v46, %v1263_v46  ;;  %v1423_v51 = vpack.c.bf16 %v1295_v47, %v1295_v47 }
 0x147   : > { %v1328_v52 = vpack.c.bf16 %v1200_v48, %v1200_v48  ;;  %v1360_v53 = vpack.c.bf16 %v1232_v49, %v1232_v49 }
 0x148   : > { %1520 = vst.msk [vmem:[%s2228_s30 + $0x154] sm:$0xf] %vm1434_vm3, %v1391_v50 }
 0x149   : > { %1552 = vst.msk [vmem:[%s2228_s30 + $0x1d4] sm:$0xf] %vm1434_vm3, %v1423_v51  ;;  %v1073_v54 = vpop.f32.mrf.mxu2  ;;  %v1153_v55 = vpop.f32.mrf.mxu3 }
 0x14a   : > { %1457 = vst.msk [vmem:[%s2228_s30 + $0x58] sm:$0xf] %vm1434_vm3, %v1328_v52  ;;  %v1074_v39 = vadd.f32 %v2554_v56, %v1073_v54  ;;  %v1154_v57 = vadd.f32 %v2554_v56, %v1153_v55  ;;  %v915_v58 = vpop.f32.mrf.mxu0  ;;  %v995_v59 = vpop.f32.mrf.mxu1 }
 0x14b   : > { %1489 = vst.msk [vmem:[%s2228_s30 + $0xd8] sm:$0xf] %vm1434_vm3, %v1360_v53  ;;  %v916_v60 = vadd.f32 %v2554_v56, %v915_v58  ;;  %v996_v61 = vadd.f32 %v2554_v56, %v995_v59 }
 0x14c   : > { %v1264_v62 = vmax.f32 %v1074_v39, 0.0  ;;  %v1296_v63 = vmax.f32 %v1154_v57, 0.0 }
 0x14d   : > { %v1201_v0 = vmax.f32 %v916_v60, 0.0  ;;  %v1233_v1 = vmax.f32 %v996_v61, 0.0 }
 0x14e   : > { %v1392_v2 = vpack.c.bf16 %v1264_v62, %v1264_v62  ;;  %v1424_v3 = vpack.c.bf16 %v1296_v63, %v1296_v63 }
 0x14f   : > { %v1329_v4 = vpack.c.bf16 %v1201_v0, %v1201_v0  ;;  %v1361_v5 = vpack.c.bf16 %v1233_v1, %v1233_v1 }
 0x150   : > { %1521 = vst.msk [vmem:[%s2228_s30 + $0x158] sm:$0xf] %vm1434_vm3, %v1392_v2 }
 0x151   : > { %1553 = vst.msk [vmem:[%s2228_s30 + $0x1d8] sm:$0xf] %vm1434_vm3, %v1424_v3  ;;  %v1075_v6 = vpop.f32.mrf.mxu2  ;;  %v1155_v7 = vpop.f32.mrf.mxu3 }
 0x152   : > { %1458 = vst.msk [vmem:[%s2228_s30 + $0x5c] sm:$0xf] %vm1434_vm3, %v1329_v4  ;;  %v1076_v8 = vadd.f32 %v2554_v56, %v1075_v6  ;;  %v1156_v9 = vadd.f32 %v2554_v56, %v1155_v7  ;;  %v918_v10 = vpop.f32.mrf.mxu0  ;;  %v998_v11 = vpop.f32.mrf.mxu1 }
 0x153   : > { %1490 = vst.msk [vmem:[%s2228_s30 + $0xdc] sm:$0xf] %vm1434_vm3, %v1361_v5  ;;  %v919_v12 = vadd.f32 %v2554_v56, %v918_v10  ;;  %v999_v13 = vadd.f32 %v2554_v56, %v998_v11 }
 0x154   : > { %v1265_v14 = vmax.f32 %v1076_v8, 0.0  ;;  %v1297_v15 = vmax.f32 %v1156_v9, 0.0 }
 0x155   : > { %v1202_v16 = vmax.f32 %v919_v12, 0.0  ;;  %v1234_v17 = vmax.f32 %v999_v13, 0.0 }
 0x156   : > { %v1393_v18 = vpack.c.bf16 %v1265_v14, %v1265_v14  ;;  %v1425_v19 = vpack.c.bf16 %v1297_v15, %v1297_v15 }
 0x157   : > { %v1330_v20 = vpack.c.bf16 %v1202_v16, %v1202_v16  ;;  %v1362_v21 = vpack.c.bf16 %v1234_v17, %v1234_v17 }
 0x158   : > { %1522 = vst.msk [vmem:[%s2228_s30 + $0x15c] sm:$0xf] %vm1434_vm3, %v1393_v18 }
 0x159   : > { %1554 = vst.msk [vmem:[%s2228_s30 + $0x1dc] sm:$0xf] %vm1434_vm3, %v1425_v19  ;;  %v1078_v22 = vpop.f32.mrf.mxu2  ;;  %v1158_v23 = vpop.f32.mrf.mxu3 }
 0x15a   : > { %1459 = vst.msk [vmem:[%s2228_s30 + $0x60] sm:$0xf] %vm1434_vm3, %v1330_v20  ;;  %v1079_v24 = vadd.f32 %v2554_v56, %v1078_v22  ;;  %v1159_v25 = vadd.f32 %v2554_v56, %v1158_v23  ;;  %v920_v26 = vpop.f32.mrf.mxu0  ;;  %v1000_v27 = vpop.f32.mrf.mxu1 }
 0x15b   : > { %1491 = vst.msk [vmem:[%s2228_s30 + $0xe0] sm:$0xf] %vm1434_vm3, %v1362_v21  ;;  %v921_v28 = vadd.f32 %v2554_v56, %v920_v26  ;;  %v1001_v29 = vadd.f32 %v2554_v56, %v1000_v27 }
 0x15c   : > { %v1266_v30 = vmax.f32 %v1079_v24, 0.0  ;;  %v1298_v31 = vmax.f32 %v1159_v25, 0.0 }
 0x15d   : > { %v1203_v32 = vmax.f32 %v921_v28, 0.0  ;;  %v1235_v33 = vmax.f32 %v1001_v29, 0.0 }
 0x15e   : > { %v1394_v34 = vpack.c.bf16 %v1266_v30, %v1266_v30  ;;  %v1426_v35 = vpack.c.bf16 %v1298_v31, %v1298_v31 }
 0x15f   : > { %v1331_v36 = vpack.c.bf16 %v1203_v32, %v1203_v32  ;;  %v1363_v37 = vpack.c.bf16 %v1235_v33, %v1235_v33 }
 0x160   : > { %1523 = vst.msk [vmem:[%s2228_s30 + $0x160] sm:$0xf] %vm1434_vm3, %v1394_v34 }
 0x161   : > { %1555 = vst.msk [vmem:[%s2228_s30 + $0x1e0] sm:$0xf] %vm1434_vm3, %v1426_v35  ;;  %v1080_v38 = vpop.f32.mrf.mxu2  ;;  %v1160_v40 = vpop.f32.mrf.mxu3 }
 0x162   : > { %1460 = vst.msk [vmem:[%s2228_s30 + $0x64] sm:$0xf] %vm1434_vm3, %v1331_v36  ;;  %v1081_v41 = vadd.f32 %v2554_v56, %v1080_v38  ;;  %v1161_v42 = vadd.f32 %v2554_v56, %v1160_v40  ;;  %v923_v43 = vpop.f32.mrf.mxu0  ;;  %v1003_v44 = vpop.f32.mrf.mxu1 }
 0x163   : > { %1492 = vst.msk [vmem:[%s2228_s30 + $0xe4] sm:$0xf] %vm1434_vm3, %v1363_v37  ;;  %v924_v45 = vadd.f32 %v2554_v56, %v923_v43  ;;  %v1004_v46 = vadd.f32 %v2554_v56, %v1003_v44 }
 0x164   : > { %v1267_v47 = vmax.f32 %v1081_v41, 0.0  ;;  %v1299_v48 = vmax.f32 %v1161_v42, 0.0 }
 0x165   : > { %v1204_v49 = vmax.f32 %v924_v45, 0.0  ;;  %v1236_v50 = vmax.f32 %v1004_v46, 0.0 }
 0x166   : > { %v1395_v51 = vpack.c.bf16 %v1267_v47, %v1267_v47  ;;  %v1427_v52 = vpack.c.bf16 %v1299_v48, %v1299_v48 }
 0x167   : > { %v1332_v53 = vpack.c.bf16 %v1204_v49, %v1204_v49  ;;  %v1364_v54 = vpack.c.bf16 %v1236_v50, %v1236_v50 }
 0x168   : > { %1524 = vst.msk [vmem:[%s2228_s30 + $0x164] sm:$0xf] %vm1434_vm3, %v1395_v51 }
 0x169   : > { %1556 = vst.msk [vmem:[%s2228_s30 + $0x1e4] sm:$0xf] %vm1434_vm3, %v1427_v52  ;;  %v1083_v55 = vpop.f32.mrf.mxu2  ;;  %v1163_v39 = vpop.f32.mrf.mxu3 }
 0x16a   : > { %1461 = vst.msk [vmem:[%s2228_s30 + $0x68] sm:$0xf] %vm1434_vm3, %v1332_v53  ;;  %v1084_v57 = vadd.f32 %v2554_v56, %v1083_v55  ;;  %v1164_v58 = vadd.f32 %v2554_v56, %v1163_v39  ;;  %v925_v59 = vpop.f32.mrf.mxu0  ;;  %v1005_v60 = vpop.f32.mrf.mxu1 }
 0x16b   : > { %1493 = vst.msk [vmem:[%s2228_s30 + $0xe8] sm:$0xf] %vm1434_vm3, %v1364_v54  ;;  %v926_v61 = vadd.f32 %v2554_v56, %v925_v59  ;;  %v1006_v62 = vadd.f32 %v2554_v56, %v1005_v60 }
 0x16c   : > { %v1268_v63 = vmax.f32 %v1084_v57, 0.0  ;;  %v1300_v0 = vmax.f32 %v1164_v58, 0.0 }
 0x16d   : > { %v1205_v1 = vmax.f32 %v926_v61, 0.0  ;;  %v1237_v2 = vmax.f32 %v1006_v62, 0.0 }
 0x16e   : > { %v1396_v3 = vpack.c.bf16 %v1268_v63, %v1268_v63  ;;  %v1428_v4 = vpack.c.bf16 %v1300_v0, %v1300_v0 }
 0x16f   : > { %v1333_v5 = vpack.c.bf16 %v1205_v1, %v1205_v1  ;;  %v1365_v6 = vpack.c.bf16 %v1237_v2, %v1237_v2 }
 0x170   : > { %1525 = vst.msk [vmem:[%s2228_s30 + $0x168] sm:$0xf] %vm1434_vm3, %v1396_v3 }
 0x171   : > { %1557 = vst.msk [vmem:[%s2228_s30 + $0x1e8] sm:$0xf] %vm1434_vm3, %v1428_v4  ;;  %v1085_v7 = vpop.f32.mrf.mxu2  ;;  %v1165_v8 = vpop.f32.mrf.mxu3 }
 0x172   : > { %1462 = vst.msk [vmem:[%s2228_s30 + $0x6c] sm:$0xf] %vm1434_vm3, %v1333_v5  ;;  %v1086_v9 = vadd.f32 %v2554_v56, %v1085_v7  ;;  %v1166_v10 = vadd.f32 %v2554_v56, %v1165_v8  ;;  %v928_v11 = vpop.f32.mrf.mxu0  ;;  %v1008_v12 = vpop.f32.mrf.mxu1 }
 0x173   : > { %1494 = vst.msk [vmem:[%s2228_s30 + $0xec] sm:$0xf] %vm1434_vm3, %v1365_v6  ;;  %v929_v13 = vadd.f32 %v2554_v56, %v928_v11  ;;  %v1009_v14 = vadd.f32 %v2554_v56, %v1008_v12 }
 0x174   : > { %v1269_v15 = vmax.f32 %v1086_v9, 0.0  ;;  %v1301_v16 = vmax.f32 %v1166_v10, 0.0 }
 0x175   : > { %v1206_v17 = vmax.f32 %v929_v13, 0.0  ;;  %v1238_v18 = vmax.f32 %v1009_v14, 0.0 }
 0x176   : > { %v1397_v19 = vpack.c.bf16 %v1269_v15, %v1269_v15  ;;  %v1429_v20 = vpack.c.bf16 %v1301_v16, %v1301_v16 }
 0x177   : > { %v1334_v21 = vpack.c.bf16 %v1206_v17, %v1206_v17  ;;  %v1366_v22 = vpack.c.bf16 %v1238_v18, %v1238_v18 }
 0x178   : > { %1526 = vst.msk [vmem:[%s2228_s30 + $0x16c] sm:$0xf] %vm1434_vm3, %v1397_v19 }
 0x179   : > { %1558 = vst.msk [vmem:[%s2228_s30 + $0x1ec] sm:$0xf] %vm1434_vm3, %v1429_v20  ;;  %v1088_v23 = vpop.f32.mrf.mxu2  ;;  %v1168_v24 = vpop.f32.mrf.mxu3 }
 0x17a   : > { %1463 = vst.msk [vmem:[%s2228_s30 + $0x70] sm:$0xf] %vm1434_vm3, %v1334_v21  ;;  %v1089_v25 = vadd.f32 %v2554_v56, %v1088_v23  ;;  %v1169_v26 = vadd.f32 %v2554_v56, %v1168_v24  ;;  %v930_v27 = vpop.f32.mrf.mxu0  ;;  %v1010_v28 = vpop.f32.mrf.mxu1 }
 0x17b   : > { %1495 = vst.msk [vmem:[%s2228_s30 + $0xf0] sm:$0xf] %vm1434_vm3, %v1366_v22  ;;  %v931_v29 = vadd.f32 %v2554_v56, %v930_v27  ;;  %v1011_v30 = vadd.f32 %v2554_v56, %v1010_v28 }
 0x17c   : > { %v1270_v31 = vmax.f32 %v1089_v25, 0.0  ;;  %v1302_v32 = vmax.f32 %v1169_v26, 0.0 }
 0x17d   : > { %v1207_v33 = vmax.f32 %v931_v29, 0.0  ;;  %v1239_v34 = vmax.f32 %v1011_v30, 0.0 }
 0x17e   : > { %v1398_v35 = vpack.c.bf16 %v1270_v31, %v1270_v31  ;;  %v1430_v36 = vpack.c.bf16 %v1302_v32, %v1302_v32 }
 0x17f   : > { %v1335_v37 = vpack.c.bf16 %v1207_v33, %v1207_v33  ;;  %v1367_v38 = vpack.c.bf16 %v1239_v34, %v1239_v34 }
 0x180   : > { %1527 = vst.msk [vmem:[%s2228_s30 + $0x170] sm:$0xf] %vm1434_vm3, %v1398_v35 }
 0x181   : > { %1559 = vst.msk [vmem:[%s2228_s30 + $0x1f0] sm:$0xf] %vm1434_vm3, %v1430_v36  ;;  %v1090_v40 = vpop.f32.mrf.mxu2  ;;  %v1170_v41 = vpop.f32.mrf.mxu3 }
 0x182   : > { %1464 = vst.msk [vmem:[%s2228_s30 + $0x74] sm:$0xf] %vm1434_vm3, %v1335_v37  ;;  %v1091_v42 = vadd.f32 %v2554_v56, %v1090_v40  ;;  %v1171_v43 = vadd.f32 %v2554_v56, %v1170_v41  ;;  %v933_v44 = vpop.f32.mrf.mxu0  ;;  %v1013_v45 = vpop.f32.mrf.mxu1 }
 0x183   : > { %1496 = vst.msk [vmem:[%s2228_s30 + $0xf4] sm:$0xf] %vm1434_vm3, %v1367_v38  ;;  %v934_v46 = vadd.f32 %v2554_v56, %v933_v44  ;;  %v1014_v47 = vadd.f32 %v2554_v56, %v1013_v45 }
 0x184   : > { %v1271_v48 = vmax.f32 %v1091_v42, 0.0  ;;  %v1303_v49 = vmax.f32 %v1171_v43, 0.0 }
 0x185   : > { %v1208_v50 = vmax.f32 %v934_v46, 0.0  ;;  %v1240_v51 = vmax.f32 %v1014_v47, 0.0 }
 0x186   : > { %v1399_v52 = vpack.c.bf16 %v1271_v48, %v1271_v48  ;;  %v1431_v53 = vpack.c.bf16 %v1303_v49, %v1303_v49 }
 0x187   : > { %v1336_v54 = vpack.c.bf16 %v1208_v50, %v1208_v50  ;;  %v1368_v55 = vpack.c.bf16 %v1240_v51, %v1240_v51 }
 0x188   : > { %1528 = vst.msk [vmem:[%s2228_s30 + $0x174] sm:$0xf] %vm1434_vm3, %v1399_v52 }
 0x189   : > { %1560 = vst.msk [vmem:[%s2228_s30 + $0x1f4] sm:$0xf] %vm1434_vm3, %v1431_v53  ;;  %v1093_v39 = vpop.f32.mrf.mxu2  ;;  %v1173_v57 = vpop.f32.mrf.mxu3 }
 0x18a   : > { %1465 = vst.msk [vmem:[%s2228_s30 + $0x78] sm:$0xf] %vm1434_vm3, %v1336_v54  ;;  %v1094_v58 = vadd.f32 %v2554_v56, %v1093_v39  ;;  %v1174_v59 = vadd.f32 %v2554_v56, %v1173_v57  ;;  %v935_v60 = vpop.f32.mrf.mxu0  ;;  %v1015_v61 = vpop.f32.mrf.mxu1 }
 0x18b   : > { %1497 = vst.msk [vmem:[%s2228_s30 + $0xf8] sm:$0xf] %vm1434_vm3, %v1368_v55  ;;  %v936_v62 = vadd.f32 %v2554_v56, %v935_v60  ;;  %v1016_v63 = vadd.f32 %v2554_v56, %v1015_v61 }
 0x18c   : > { %v1272_v0 = vmax.f32 %v1094_v58, 0.0  ;;  %v1304_v1 = vmax.f32 %v1174_v59, 0.0 }
 0x18d   : > { %v1209_v2 = vmax.f32 %v936_v62, 0.0  ;;  %v1241_v3 = vmax.f32 %v1016_v63, 0.0 }
 0x18e   : > { %v1400_v4 = vpack.c.bf16 %v1272_v0, %v1272_v0  ;;  %v1432_v5 = vpack.c.bf16 %v1304_v1, %v1304_v1 }
 0x18f   : > { %v1337_v6 = vpack.c.bf16 %v1209_v2, %v1209_v2  ;;  %v1369_v7 = vpack.c.bf16 %v1241_v3, %v1241_v3 }
 0x190   : > { %1529 = vst.msk [vmem:[%s2228_s30 + $0x178] sm:$0xf] %vm1434_vm3, %v1400_v4 }
 0x191   : > { %1561 = vst.msk [vmem:[%s2228_s30 + $0x1f8] sm:$0xf] %vm1434_vm3, %v1432_v5  ;;  %v1095_v8 = vpop.f32.mrf.mxu2  ;;  %v1175_v9 = vpop.f32.mrf.mxu3 }
 0x192   : > { %1466 = vst.msk [vmem:[%s2228_s30 + $0x7c] sm:$0xf] %vm1434_vm3, %v1337_v6  ;;  %v1096_v10 = vadd.f32 %v2554_v56, %v1095_v8  ;;  %v1176_v11 = vadd.f32 %v2554_v56, %v1175_v9 }
 0x193   : > { %1498 = vst.msk [vmem:[%s2228_s30 + $0xfc] sm:$0xf] %vm1434_vm3, %v1369_v7 }
 0x194   : > { %v1273_v12 = vmax.f32 %v1096_v10, 0.0  ;;  %v1305_v13 = vmax.f32 %v1176_v11, 0.0 }
 0x196   : > { %v1401_v14 = vpack.c.bf16 %v1273_v12, %v1273_v12  ;;  %v1433_v15 = vpack.c.bf16 %v1305_v13, %v1305_v13 }
 0x198   : > { %1530 = vst.msk [vmem:[%s2228_s30 + $0x17c] sm:$0xf] %vm1434_vm3, %v1401_v14 }
 0x199   : > { %1562 = vst.msk [vmem:[%s2228_s30 + $0x1fc] sm:$0xf] %vm1434_vm3, %v1433_v15 }
 0x19a PF: > { %s14_s12 = sadd.s32 1, %s2098_s12  }
 0x19b   : > { %p11_p7 = scmp.ge.s32.totalorder %s14_s12, 4  }
 0x19d   :  { %13 = sbr.rel (!%p11_p7) target bundleno = 1 (0x1), region = 67 }
 0x1a2   :  { %1585 = vsyncpa [#allocation3], 1 }
 0x1a3   :  { %1587 = vsyncpa [#allocation3 + $0x1], 1 }

// kernel: shape_vae_forward.9
= control target key start
LH: loop header
LB: loop body
LE: loop exit
PB: predicated region body
PF: predicated region fallthrough
CT: control target
= control target key end

     0   :  { %s801_s12 = smov 0   ;;  %s977_s0 = inlined_call_operand.vmem [shape: bf16[512,72], index: 0, kind: input, shape index: {}]   ;;  %s978_s1 = inlined_call_operand.vmem [shape: bf16[72,16], index: 1, kind: input, shape index: {}]   ;;  %s979_s2 = inlined_call_operand.vmem [shape: f32[1,16], index: 2, kind: input, shape index: {}]   ;;  %s980_s3 = inlined_call_operand.vmem [shape: bf16[512,16], index: 3, kind: output, shape index: {}]  }
   0x1 LB: > { %s622_s13 = sadd.s32 4294967295, %s779_s12   ;;  %p626_p0 = scmp.ge.s32.totalorder %s779_s12, 1  ;;  %s779_s12 = sphi %s801_s12, %s13_s12  }
   0x2   : > { %p138_p1 = scmp.lt.s32.totalorder %s779_s12, 3 }
   0x4   : > { %p139_p2 = pnand %p626_p0, %p138_p1 }
   0x5   : > { %s627_s16 = sshll.u32 (!%p139_p2), %s622_s13, 5 }
   0x6   : > { %142 = sbr.rel (%p139_p2) target bundleno = 233 (0xe9), region = 32  ;;  %p163_p3 = scmp.lt.s32.totalorder (!%p139_p2), %s627_s16, 63 }
   0xb   : > { %v215_v0 = vld [vmem:[%s978_s1 + $0x20] sm:$0xf]  ;;  %vm376_vm0 = vcmask 1043456   ;;  %v748_v4 = vld [vmem:[%s978_s1 + $0x18] sm:$0xff]  ;;  %v747_v5 = vld [vmem:[%s978_s1 + $0x10] sm:$0xff]  ;;  %s982_s16 = smov (!%p163_p3, %s627_s16), 63 }
   0xc   : > { %v317_v1 = vunpack.c.l.b16 %v215_v0  ;;  %v746_v6 = vld [vmem:[%s978_s1 + $0x8] sm:$0xff]  ;;  %s628_s23 = sshll.u32 %s982_s16, 2  ;;  %v745_v7 = vld [vmem:[%s978_s1] sm:$0xff]  ;;  %vm327_vm1 = vcmask 588800   ;;  %vm533_vm2 = vcmask 125952  }
   0xd   : > { %s832_s28 = scalar_lea.vmem %s977_s0, %s628_s23  ;;  %v869_v24 = vld [vmem:[%s979_s2] ss:$0 sm:$0xff]  ;;  %s878_s6 = scalar_lea.vmem %s980_s3, %s628_s23 }
   0xe   : > { %v322_v2 = vpack.c.b16 %v317_v1, %v317_v1  ;;  %v729_v8 = vld [vmem:[%s832_s28] sm:$0xff]  ;;  %v730_v12 = vld [vmem:[%s832_s28 + $0x8] sm:$0xff]  ;;  %v731_v16 = vld [vmem:[%s832_s28 + $0x10] sm:$0xff] }
   0xf   : > { %v733_v9 = vld [vmem:[%s832_s28 + $0x20] sm:$0xff]  ;;  %v734_v13 = vld [vmem:[%s832_s28 + $0x28] sm:$0xff]  ;;  %v735_v17 = vld [vmem:[%s832_s28 + $0x30] sm:$0xff] }
  0x10   : > { %v378_v3 = vsel %vm376_vm0, %v322_v2, 0  ;;  %v737_v10 = vld [vmem:[%s832_s28 + $0x40] sm:$0xff]  ;;  %v738_v14 = vld [vmem:[%s832_s28 + $0x48] sm:$0xff]  ;;  %v739_v18 = vld [vmem:[%s832_s28 + $0x50] sm:$0xff] }
  0x11   : > { %383 = vmatpush.bf16.msra.mxu0 %v378_v3  ;;  %749 = vmatpush.bf16.msra.mxu1 %v378_v3  ;;  %v741_v11 = vld [vmem:[%s832_s28 + $0x60] sm:$0xff]  ;;  %v742_v15 = vld [vmem:[%s832_s28 + $0x68] sm:$0xff]  ;;  %v743_v19 = vld [vmem:[%s832_s28 + $0x70] sm:$0xff] }
  0x12   : > { %750 = vmatpush.bf16.msra.mxu2 %v378_v3  ;;  %751 = vmatpush.bf16.msra.mxu3 %v378_v3  ;;  %v732_v20 = vld [vmem:[%s832_s28 + $0x18] sm:$0xff] }
  0x13   : > { %v736_v21 = vld [vmem:[%s832_s28 + $0x38] sm:$0xff] }
  0x14   : > { %v740_v22 = vld [vmem:[%s832_s28 + $0x58] sm:$0xff] }
  0x15   : > { %384 = vmatpush.bf16.msra.mxu0 %v748_v4  ;;  %752 = vmatpush.bf16.msra.mxu1 %v748_v4  ;;  %v744_v23 = vld [vmem:[%s832_s28 + $0x78] sm:$0xff] }
  0x16   : > { %753 = vmatpush.bf16.msra.mxu2 %v748_v4  ;;  %754 = vmatpush.bf16.msra.mxu3 %v748_v4 }
  0x19   : > { %385 = vmatpush.bf16.msra.mxu0 %v747_v5  ;;  %755 = vmatpush.bf16.msra.mxu1 %v747_v5 }
  0x1a   : > { %756 = vmatpush.bf16.msra.mxu2 %v747_v5  ;;  %757 = vmatpush.bf16.msra.mxu3 %v747_v5 }
  0x1d   : > { %386 = vmatpush.bf16.msra.mxu0 %v746_v6  ;;  %758 = vmatpush.bf16.msra.mxu1 %v746_v6 }
  0x1e   : > { %759 = vmatpush.bf16.msra.mxu2 %v746_v6  ;;  %760 = vmatpush.bf16.msra.mxu3 %v746_v6 }
  0x21   : > { %387 = vmatpush.bf16.msra.mxu0 %v745_v7  ;;  %761 = vmatpush.bf16.msra.mxu1 %v745_v7 }
  0x22   : > { %762 = vmatpush.bf16.msra.mxu2 %v745_v7  ;;  %763 = vmatpush.bf16.msra.mxu3 %v745_v7 }
  0x24   : > { %711 = vmatmul.msk.bf16.vlgmr.msra.gmra.mxu0 %vm327_vm1, %v729_v8  ;;  %715 = vmatmul.msk.bf16.vlgmr.msra.gmra.mxu1 %vm327_vm1, %v733_v9 }
  0x25   : > { %719 = vmatmul.msk.bf16.vlgmr.msra.gmra.mxu2 %vm327_vm1, %v737_v10  ;;  %723 = vmatmul.msk.bf16.vlgmr.msra.gmra.mxu3 %vm327_vm1, %v741_v11 }
  0x34   : > { %712 = vmatmul.msk.bf16.gmra.mxu0 %vm327_vm1, %v730_v12  ;;  %716 = vmatmul.msk.bf16.gmra.mxu1 %vm327_vm1, %v734_v13 }
  0x35   : > { %720 = vmatmul.msk.bf16.gmra.mxu2 %vm327_vm1, %v738_v14  ;;  %724 = vmatmul.msk.bf16.gmra.mxu3 %vm327_vm1, %v742_v15 }
  0x44   : > { %713 = vmatmul.msk.bf16.gmra.mxu0 %vm327_vm1, %v731_v16  ;;  %717 = vmatmul.msk.bf16.gmra.mxu1 %vm327_vm1, %v735_v17 }
  0x45   : > { %721 = vmatmul.msk.bf16.gmra.mxu2 %vm327_vm1, %v739_v18  ;;  %725 = vmatmul.msk.bf16.gmra.mxu3 %vm327_vm1, %v743_v19 }
  0x54   : > { %714 = vmatmul.msk.bf16.gmra.mxu0 %vm327_vm1, %v732_v20  ;;  %718 = vmatmul.msk.bf16.gmra.mxu1 %vm327_vm1, %v736_v21 }
  0x55   : > { %722 = vmatmul.msk.bf16.gmra.mxu2 %vm327_vm1, %v740_v22  ;;  %726 = vmatmul.msk.bf16.gmra.mxu3 %vm327_vm1, %v744_v23 }
  0xa1   : > { %v389_v25 = vpop.f32.mrf.mxu0  ;;  %v409_v26 = vpop.f32.mrf.mxu1 }
  0xa2   : > { %v390_v27 = vadd.f32 %v869_v24, %v389_v25  ;;  %v410_v28 = vadd.f32 %v869_v24, %v409_v26 }
  0xa4   : > { %v469_v29 = vmax.f32 %v390_v27, 0.0  ;;  %v477_v30 = vmax.f32 %v410_v28, 0.0 }
  0xa6   : > { %v501_v31 = vpack.c.bf16 %v469_v29, %v469_v29  ;;  %v509_v32 = vpack.c.bf16 %v477_v30, %v477_v30 }
  0xa8   : > { %534 = vst.msk [vmem:[%s878_s6] sm:$0xf] %vm533_vm2, %v501_v31  ;;  %v429_v33 = vpop.f32.mrf.mxu2  ;;  %v449_v34 = vpop.f32.mrf.mxu3 }
  0xa9   : > { %542 = vst.msk [vmem:[%s878_s6 + $0x20] sm:$0xf] %vm533_vm2, %v509_v32  ;;  %v430_v35 = vadd.f32 %v869_v24, %v429_v33  ;;  %v450_v36 = vadd.f32 %v869_v24, %v449_v34  ;;  %v391_v37 = vpop.f32.mrf.mxu0  ;;  %v411_v38 = vpop.f32.mrf.mxu1 }
  0xaa   : > { %v392_v39 = vadd.f32 %v869_v24, %v391_v37  ;;  %v412_v40 = vadd.f32 %v869_v24, %v411_v38 }
  0xab   : > { %v485_v41 = vmax.f32 %v430_v35, 0.0  ;;  %v493_v42 = vmax.f32 %v450_v36, 0.0 }
  0xac   : > { %v470_v43 = vmax.f32 %v392_v39, 0.0  ;;  %v478_v44 = vmax.f32 %v412_v40, 0.0 }
  0xad   : > { %v517_v45 = vpack.c.bf16 %v485_v41, %v485_v41  ;;  %v525_v46 = vpack.c.bf16 %v493_v42, %v493_v42 }
  0xae   : > { %v502_v47 = vpack.c.bf16 %v470_v43, %v470_v43  ;;  %v510_v48 = vpack.c.bf16 %v478_v44, %v478_v44 }
  0xaf   : > { %550 = vst.msk [vmem:[%s878_s6 + $0x40] sm:$0xf] %vm533_vm2, %v517_v45 }
  0xb0   : > { %558 = vst.msk [vmem:[%s878_s6 + $0x60] sm:$0xf] %vm533_vm2, %v525_v46  ;;  %v431_v49 = vpop.f32.mrf.mxu2  ;;  %v451_v50 = vpop.f32.mrf.mxu3 }
  0xb1   : > { %535 = vst.msk [vmem:[%s878_s6 + $0x4] sm:$0xf] %vm533_vm2, %v502_v47  ;;  %v432_v51 = vadd.f32 %v869_v24, %v431_v49  ;;  %v452_v52 = vadd.f32 %v869_v24, %v451_v50  ;;  %v394_v53 = vpop.f32.mrf.mxu0  ;;  %v414_v54 = vpop.f32.mrf.mxu1 }
  0xb2   : > { %543 = vst.msk [vmem:[%s878_s6 + $0x24] sm:$0xf] %vm533_vm2, %v510_v48  ;;  %v395_v55 = vadd.f32 %v869_v24, %v394_v53  ;;  %v415_v56 = vadd.f32 %v869_v24, %v414_v54 }
  0xb3   : > { %v486_v57 = vmax.f32 %v432_v51, 0.0  ;;  %v494_v58 = vmax.f32 %v452_v52, 0.0 }
  0xb4   : > { %v471_v59 = vmax.f32 %v395_v55, 0.0  ;;  %v479_v60 = vmax.f32 %v415_v56, 0.0 }
  0xb5   : > { %v518_v61 = vpack.c.bf16 %v486_v57, %v486_v57  ;;  %v526_v62 = vpack.c.bf16 %v494_v58, %v494_v58 }
  0xb6   : > { %v503_v63 = vpack.c.bf16 %v471_v59, %v471_v59  ;;  %v511_v0 = vpack.c.bf16 %v479_v60, %v479_v60 }
  0xb7   : > { %551 = vst.msk [vmem:[%s878_s6 + $0x44] sm:$0xf] %vm533_vm2, %v518_v61 }
  0xb8   : > { %559 = vst.msk [vmem:[%s878_s6 + $0x64] sm:$0xf] %vm533_vm2, %v526_v62  ;;  %v434_v1 = vpop.f32.mrf.mxu2  ;;  %v454_v2 = vpop.f32.mrf.mxu3 }
  0xb9   : > { %536 = vst.msk [vmem:[%s878_s6 + $0x8] sm:$0xf] %vm533_vm2, %v503_v63  ;;  %v435_v3 = vadd.f32 %v869_v24, %v434_v1  ;;  %v455_v4 = vadd.f32 %v869_v24, %v454_v2  ;;  %v396_v5 = vpop.f32.mrf.mxu0  ;;  %v416_v6 = vpop.f32.mrf.mxu1 }
  0xba   : > { %544 = vst.msk [vmem:[%s878_s6 + $0x28] sm:$0xf] %vm533_vm2, %v511_v0  ;;  %v397_v7 = vadd.f32 %v869_v24, %v396_v5  ;;  %v417_v8 = vadd.f32 %v869_v24, %v416_v6 }
  0xbb   : > { %v487_v9 = vmax.f32 %v435_v3, 0.0  ;;  %v495_v10 = vmax.f32 %v455_v4, 0.0 }
  0xbc   : > { %v472_v11 = vmax.f32 %v397_v7, 0.0  ;;  %v480_v12 = vmax.f32 %v417_v8, 0.0 }
  0xbd   : > { %v519_v13 = vpack.c.bf16 %v487_v9, %v487_v9  ;;  %v527_v14 = vpack.c.bf16 %v495_v10, %v495_v10 }
  0xbe   : > { %v504_v15 = vpack.c.bf16 %v472_v11, %v472_v11  ;;  %v512_v16 = vpack.c.bf16 %v480_v12, %v480_v12 }
  0xbf   : > { %552 = vst.msk [vmem:[%s878_s6 + $0x48] sm:$0xf] %vm533_vm2, %v519_v13 }
  0xc0   : > { %560 = vst.msk [vmem:[%s878_s6 + $0x68] sm:$0xf] %vm533_vm2, %v527_v14  ;;  %v436_v17 = vpop.f32.mrf.mxu2  ;;  %v456_v18 = vpop.f32.mrf.mxu3 }
  0xc1   : > { %537 = vst.msk [vmem:[%s878_s6 + $0xc] sm:$0xf] %vm533_vm2, %v504_v15  ;;  %v437_v19 = vadd.f32 %v869_v24, %v436_v17  ;;  %v457_v20 = vadd.f32 %v869_v24, %v456_v18  ;;  %v399_v21 = vpop.f32.mrf.mxu0  ;;  %v419_v22 = vpop.f32.mrf.mxu1 }
  0xc2   : > { %545 = vst.msk [vmem:[%s878_s6 + $0x2c] sm:$0xf] %vm533_vm2, %v512_v16  ;;  %v400_v23 = vadd.f32 %v869_v24, %v399_v21  ;;  %v420_v25 = vadd.f32 %v869_v24, %v419_v22 }
  0xc3   : > { %v488_v26 = vmax.f32 %v437_v19, 0.0  ;;  %v496_v27 = vmax.f32 %v457_v20, 0.0 }
  0xc4   : > { %v473_v28 = vmax.f32 %v400_v23, 0.0  ;;  %v481_v29 = vmax.f32 %v420_v25, 0.0 }
  0xc5   : > { %v520_v30 = vpack.c.bf16 %v488_v26, %v488_v26  ;;  %v528_v31 = vpack.c.bf16 %v496_v27, %v496_v27 }
  0xc6   : > { %v505_v32 = vpack.c.bf16 %v473_v28, %v473_v28  ;;  %v513_v33 = vpack.c.bf16 %v481_v29, %v481_v29 }
  0xc7   : > { %553 = vst.msk [vmem:[%s878_s6 + $0x4c] sm:$0xf] %vm533_vm2, %v520_v30 }
  0xc8   : > { %561 = vst.msk [vmem:[%s878_s6 + $0x6c] sm:$0xf] %vm533_vm2, %v528_v31  ;;  %v439_v34 = vpop.f32.mrf.mxu2  ;;  %v459_v35 = vpop.f32.mrf.mxu3 }
  0xc9   : > { %538 = vst.msk [vmem:[%s878_s6 + $0x10] sm:$0xf] %vm533_vm2, %v505_v32  ;;  %v440_v36 = vadd.f32 %v869_v24, %v439_v34  ;;  %v460_v37 = vadd.f32 %v869_v24, %v459_v35  ;;  %v401_v38 = vpop.f32.mrf.mxu0  ;;  %v421_v39 = vpop.f32.mrf.mxu1 }
  0xca   : > { %546 = vst.msk [vmem:[%s878_s6 + $0x30] sm:$0xf] %vm533_vm2, %v513_v33  ;;  %v402_v40 = vadd.f32 %v869_v24, %v401_v38  ;;  %v422_v41 = vadd.f32 %v869_v24, %v421_v39 }
  0xcb   : > { %v489_v42 = vmax.f32 %v440_v36, 0.0  ;;  %v497_v43 = vmax.f32 %v460_v37, 0.0 }
  0xcc   : > { %v474_v44 = vmax.f32 %v402_v40, 0.0  ;;  %v482_v45 = vmax.f32 %v422_v41, 0.0 }
  0xcd   : > { %v521_v46 = vpack.c.bf16 %v489_v42, %v489_v42  ;;  %v529_v47 = vpack.c.bf16 %v497_v43, %v497_v43 }
  0xce   : > { %v506_v48 = vpack.c.bf16 %v474_v44, %v474_v44  ;;  %v514_v49 = vpack.c.bf16 %v482_v45, %v482_v45 }
  0xcf   : > { %554 = vst.msk [vmem:[%s878_s6 + $0x50] sm:$0xf] %vm533_vm2, %v521_v46 }
  0xd0   : > { %562 = vst.msk [vmem:[%s878_s6 + $0x70] sm:$0xf] %vm533_vm2, %v529_v47  ;;  %v441_v50 = vpop.f32.mrf.mxu2  ;;  %v461_v51 = vpop.f32.mrf.mxu3 }
  0xd1   : > { %539 = vst.msk [vmem:[%s878_s6 + $0x14] sm:$0xf] %vm533_vm2, %v506_v48  ;;  %v442_v52 = vadd.f32 %v869_v24, %v441_v50  ;;  %v462_v53 = vadd.f32 %v869_v24, %v461_v51  ;;  %v404_v54 = vpop.f32.mrf.mxu0  ;;  %v424_v55 = vpop.f32.mrf.mxu1 }
  0xd2   : > { %547 = vst.msk [vmem:[%s878_s6 + $0x34] sm:$0xf] %vm533_vm2, %v514_v49  ;;  %v405_v56 = vadd.f32 %v869_v24, %v404_v54  ;;  %v425_v57 = vadd.f32 %v869_v24, %v424_v55 }
  0xd3   : > { %v490_v58 = vmax.f32 %v442_v52, 0.0  ;;  %v498_v59 = vmax.f32 %v462_v53, 0.0 }
  0xd4   : > { %v475_v60 = vmax.f32 %v405_v56, 0.0  ;;  %v483_v61 = vmax.f32 %v425_v57, 0.0 }
  0xd5   : > { %v522_v62 = vpack.c.bf16 %v490_v58, %v490_v58  ;;  %v530_v63 = vpack.c.bf16 %v498_v59, %v498_v59 }
  0xd6   : > { %v507_v0 = vpack.c.bf16 %v475_v60, %v475_v60  ;;  %v515_v1 = vpack.c.bf16 %v483_v61, %v483_v61 }
  0xd7   : > { %555 = vst.msk [vmem:[%s878_s6 + $0x54] sm:$0xf] %vm533_vm2, %v522_v62 }
  0xd8   : > { %563 = vst.msk [vmem:[%s878_s6 + $0x74] sm:$0xf] %vm533_vm2, %v530_v63  ;;  %v444_v2 = vpop.f32.mrf.mxu2  ;;  %v464_v3 = vpop.f32.mrf.mxu3 }
  0xd9   : > { %540 = vst.msk [vmem:[%s878_s6 + $0x18] sm:$0xf] %vm533_vm2, %v507_v0  ;;  %v445_v4 = vadd.f32 %v869_v24, %v444_v2  ;;  %v465_v5 = vadd.f32 %v869_v24, %v464_v3  ;;  %v406_v6 = vpop.f32.mrf.mxu0  ;;  %v426_v7 = vpop.f32.mrf.mxu1 }
  0xda   : > { %548 = vst.msk [vmem:[%s878_s6 + $0x38] sm:$0xf] %vm533_vm2, %v515_v1  ;;  %v407_v8 = vadd.f32 %v869_v24, %v406_v6  ;;  %v427_v9 = vadd.f32 %v869_v24, %v426_v7 }
  0xdb   : > { %v491_v10 = vmax.f32 %v445_v4, 0.0  ;;  %v499_v11 = vmax.f32 %v465_v5, 0.0 }
  0xdc   : > { %v476_v12 = vmax.f32 %v407_v8, 0.0  ;;  %v484_v13 = vmax.f32 %v427_v9, 0.0 }
  0xdd   : > { %v523_v14 = vpack.c.bf16 %v491_v10, %v491_v10  ;;  %v531_v15 = vpack.c.bf16 %v499_v11, %v499_v11 }
  0xde   : > { %v508_v16 = vpack.c.bf16 %v476_v12, %v476_v12  ;;  %v516_v17 = vpack.c.bf16 %v484_v13, %v484_v13 }
  0xdf   : > { %556 = vst.msk [vmem:[%s878_s6 + $0x58] sm:$0xf] %vm533_vm2, %v523_v14 }
  0xe0   : > { %564 = vst.msk [vmem:[%s878_s6 + $0x78] sm:$0xf] %vm533_vm2, %v531_v15  ;;  %v446_v18 = vpop.f32.mrf.mxu2  ;;  %v466_v19 = vpop.f32.mrf.mxu3 }
  0xe1   : > { %541 = vst.msk [vmem:[%s878_s6 + $0x1c] sm:$0xf] %vm533_vm2, %v508_v16  ;;  %v447_v20 = vadd.f32 %v869_v24, %v446_v18  ;;  %v467_v21 = vadd.f32 %v869_v24, %v466_v19 }
  0xe2   : > { %549 = vst.msk [vmem:[%s878_s6 + $0x3c] sm:$0xf] %vm533_vm2, %v516_v17 }
  0xe3   : > { %v492_v22 = vmax.f32 %v447_v20, 0.0  ;;  %v500_v23 = vmax.f32 %v467_v21, 0.0 }
  0xe5   : > { %v524_v25 = vpack.c.bf16 %v492_v22, %v492_v22  ;;  %v532_v26 = vpack.c.bf16 %v500_v23, %v500_v23 }
  0xe7   : > { %557 = vst.msk [vmem:[%s878_s6 + $0x5c] sm:$0xf] %vm533_vm2, %v524_v25 }
  0xe8   : > { %565 = vst.msk [vmem:[%s878_s6 + $0x7c] sm:$0xf] %vm533_vm2, %v532_v26 }
  0xe9 PF: > { %s13_s12 = sadd.s32 1, %s779_s12  }
  0xea   : > { %p10_p4 = scmp.ge.s32.totalorder %s13_s12, 4  }
  0xec   :  { %12 = sbr.rel (!%p10_p4) target bundleno = 1 (0x1), region = 62 }

// kernel: shape_vae_forward.10
= control target key start
LH: loop header
LB: loop body
LE: loop exit
PB: predicated region body
PF: predicated region fallthrough
CT: control target
= control target key end

     0   :  { %vm179_vm0 = vcmask 130048   ;;  %vm334_vm1 = vcmask 257024   ;;  %s734_s1 = inlined_call_operand.vmem [shape: bf16[144,32], index: 1, kind: input, shape index: {}]   ;;  %s735_s0 = inlined_call_operand.vmem [shape: bf16[128,144], index: 0, kind: input, shape index: {}]   ;;  %s736_s2 = inlined_call_operand.vmem [shape: f32[1,32], index: 2, kind: input, shape index: {}]   ;;  %s737_s3 = inlined_call_operand.vmem [shape: bf16[128,32], index: 3, kind: output, shape index: {}]  }
   0x1   :  { %v486_v0 = vld [vmem:[%s734_s1 + $0x38] sm:$0xff]  ;;  %v487_v1 = vld [vmem:[%s734_s1 + $0x40] sm:$0xff]  ;;  %v359_v3 = vld [vmem:[%s735_s0 + $0x8] sm:$0xf0] }
   0x2   :  { %v463_v2 = vld [vmem:[%s735_s0 + $0x4] sm:$0xf]  ;;  %204 = vmatpush.bf16.msra.mxu0 %v486_v0  ;;  %488 = vmatpush.bf16.msra.mxu2 %v486_v0  ;;  %v485_v5 = vld [vmem:[%s734_s1 + $0x30] sm:$0xff]  ;;  %v484_v6 = vld [vmem:[%s734_s1 + $0x28] sm:$0xff] }
   0x3   :  { %v362_v4 = vor.u32 %v463_v2, %v359_v3  ;;  %260 = vmatpush.bf16.msra.mxu1 %v487_v1  ;;  %496 = vmatpush.bf16.msra.mxu3 %v487_v1  ;;  %v473_v7 = vld [vmem:[%s735_s0 + $0x54] sm:$0xf]  ;;  %v399_v8 = vld [vmem:[%s735_s0 + $0x58] sm:$0xf0]  ;;  %v483_v10 = vld [vmem:[%s734_s1 + $0x20] sm:$0xff] }
   0x4   :  { %v402_v9 = vor.u32 %v473_v7, %v399_v8  ;;  %v482_v11 = vld [vmem:[%s734_s1 + $0x18] sm:$0xff]  ;;  %v465_v12 = vld [vmem:[%s735_s0 + $0x14] sm:$0xf]  ;;  %v480_v16 = vld [vmem:[%s734_s1 + $0x8] sm:$0xff] }
   0x5   :  { %v367_v13 = vld [vmem:[%s735_s0 + $0x18] sm:$0xf0]  ;;  %v481_v15 = vld [vmem:[%s734_s1 + $0x10] sm:$0xff]  ;;  %v475_v17 = vld [vmem:[%s735_s0 + $0x64] sm:$0xf] }
   0x6   :  { %455 = vmatmul.msk.bf16.vlgmr.msra.gmra.mxu1 %vm179_vm0, %v362_v4  ;;  %205 = vmatpush.bf16.msra.mxu0 %v485_v5  ;;  %v370_v14 = vor.u32 %v465_v12, %v367_v13  ;;  %v407_v18 = vld [vmem:[%s735_s0 + $0x68] sm:$0xf0]  ;;  %v479_v20 = vld [vmem:[%s734_s1] sm:$0xff]  ;;  %v464_v22 = vld [vmem:[%s735_s0 + $0x4] sm:$0xf0] }
   0x7   :  { %489 = vmatpush.bf16.msra.mxu2 %v485_v5  ;;  %460 = vmatmul.msk.bf16.vlgmr.msra.gmra.mxu3 %vm179_vm0, %v402_v9  ;;  %v410_v19 = vor.u32 %v475_v17, %v407_v18  ;;  %v357_v21 = vld [vmem:[%s735_s0] sm:$0xf]  ;;  %v472_v24 = vld [vmem:[%s735_s0 + $0x44] sm:$0xf0]  ;;  %v467_v27 = vld [vmem:[%s735_s0 + $0x24] sm:$0xf] }
   0x8   :  { %v389_v23 = vld [vmem:[%s735_s0 + $0x40] sm:$0xf]  ;;  %v358_v25 = vor.u32 %v464_v22, %v357_v21  ;;  %v375_v28 = vld [vmem:[%s735_s0 + $0x28] sm:$0xf0]  ;;  %v477_v30 = vld [vmem:[%s735_s0 + $0x74] sm:$0xf] }
   0x9   :  { %v390_v26 = vor.u32 %v472_v24, %v389_v23  ;;  %v378_v29 = vor.u32 %v467_v27, %v375_v28  ;;  %v415_v31 = vld [vmem:[%s735_s0 + $0x78] sm:$0xf0]  ;;  %v365_v33 = vld [vmem:[%s735_s0 + $0x10] sm:$0xf]  ;;  %v466_v34 = vld [vmem:[%s735_s0 + $0x14] sm:$0xf0] }
   0xa   :  { %206 = vmatpush.bf16.msra.mxu0 %v484_v6  ;;  %v418_v32 = vor.u32 %v477_v30, %v415_v31  ;;  %v397_v35 = vld [vmem:[%s735_s0 + $0x50] sm:$0xf]  ;;  %v474_v36 = vld [vmem:[%s735_s0 + $0x54] sm:$0xf0]  ;;  %v366_v37 = vor.u32 %v466_v34, %v365_v33  ;;  %v469_v39 = vld [vmem:[%s735_s0 + $0x34] sm:$0xf] }
   0xb   :  { %490 = vmatpush.bf16.msra.mxu2 %v484_v6  ;;  %v398_v38 = vor.u32 %v474_v36, %v397_v35  ;;  %v383_v40 = vld [vmem:[%s735_s0 + $0x38] sm:$0xf0]  ;;  %v373_v42 = vld [vmem:[%s735_s0 + $0x20] sm:$0xf]  ;;  %v468_v43 = vld [vmem:[%s735_s0 + $0x24] sm:$0xf0] }
   0xc   :  { %v386_v41 = vor.u32 %v469_v39, %v383_v40  ;;  %v405_v44 = vld [vmem:[%s735_s0 + $0x60] sm:$0xf]  ;;  %v476_v45 = vld [vmem:[%s735_s0 + $0x64] sm:$0xf0]  ;;  %v374_v46 = vor.u32 %v468_v43, %v373_v42  ;;  %v471_v48 = vld [vmem:[%s735_s0 + $0x44] sm:$0xf] }
   0xd   :  { %v406_v47 = vor.u32 %v476_v45, %v405_v44  ;;  %v391_v49 = vld [vmem:[%s735_s0 + $0x48] sm:$0xf0]  ;;  %v381_v51 = vld [vmem:[%s735_s0 + $0x30] sm:$0xf]  ;;  %v470_v52 = vld [vmem:[%s735_s0 + $0x34] sm:$0xf0] }
   0xe   :  { %207 = vmatpush.bf16.msra.mxu0 %v483_v10  ;;  %v394_v50 = vor.u32 %v471_v48, %v391_v49  ;;  %v413_v53 = vld [vmem:[%s735_s0 + $0x70] sm:$0xf]  ;;  %v478_v54 = vld [vmem:[%s735_s0 + $0x74] sm:$0xf0]  ;;  %v382_v55 = vor.u32 %v470_v52, %v381_v51  ;;  %v652_v61 = vld [vmem:[%s736_s2] ss:$0 sm:$0xff] }
   0xf   :  { %491 = vmatpush.bf16.msra.mxu2 %v483_v10  ;;  %v414_v56 = vor.u32 %v478_v54, %v413_v53 }
  0x12   :  { %208 = vmatpush.bf16.msra.mxu0 %v482_v11 }
  0x13   :  { %492 = vmatpush.bf16.msra.mxu2 %v482_v11 }
  0x16   :  { %456 = vmatmul.msk.bf16.gmra.mxu1 %vm179_vm0, %v370_v14  ;;  %209 = vmatpush.bf16.msra.mxu0 %v481_v15 }
  0x17   :  { %493 = vmatpush.bf16.msra.mxu2 %v481_v15  ;;  %461 = vmatmul.msk.bf16.gmra.mxu3 %vm179_vm0, %v410_v19 }
  0x1a   :  { %210 = vmatpush.bf16.msra.mxu0 %v480_v16 }
  0x1b   :  { %494 = vmatpush.bf16.msra.mxu2 %v480_v16 }
  0x1e   :  { %211 = vmatpush.bf16.msra.mxu0 %v479_v20 }
  0x1f   :  { %495 = vmatpush.bf16.msra.mxu2 %v479_v20 }
  0x21   :  { %212 = vmatmul.bf16.vlgmr.msra.gmra.mxu0 %v358_v25 }
  0x22   :  { %232 = vmatmul.bf16.vlgmr.msra.gmra.mxu2 %v390_v26 }
  0x26   :  { %457 = vmatmul.msk.bf16.gmra.mxu1 %vm179_vm0, %v378_v29 }
  0x27   :  { %462 = vmatmul.msk.bf16.gmra.mxu3 %vm179_vm0, %v418_v32 }
  0x31   :  { %217 = vmatmul.bf16.gmra.mxu0 %v366_v37 }
  0x32   :  { %237 = vmatmul.bf16.gmra.mxu2 %v398_v38 }
  0x36   :  { %458 = vmatmul.msk.bf16.gmra.mxu1 %vm179_vm0, %v386_v41 }
  0x41   :  { %222 = vmatmul.bf16.gmra.mxu0 %v374_v46 }
  0x42   :  { %242 = vmatmul.bf16.gmra.mxu2 %v406_v47 }
  0x46   :  { %459 = vmatmul.msk.bf16.gmra.mxu1 %vm179_vm0, %v394_v50 }
  0x51   :  { %227 = vmatmul.bf16.gmra.mxu0 %v382_v55 }
  0x52   :  { %247 = vmatmul.bf16.gmra.mxu2 %v414_v56 }
  0x83   :  { %v262_v57 = vpop.f32.mrf.mxu1 }
  0x8a   :  { %v287_v12 = vpop.f32.mrf.mxu3 }
  0x8b   :  { %v264_v58 = vpop.f32.mrf.mxu1 }
  0x92   :  { %v289_v23 = vpop.f32.mrf.mxu3 }
  0x93   :  { %v267_v59 = vpop.f32.mrf.mxu1 }
  0x9a   :  { %v292_v37 = vpop.f32.mrf.mxu3 }
  0x9b   :  { %v269_v60 = vpop.f32.mrf.mxu1 }
  0x9e   :  { %v213_v62 = vpop.f32.mrf.mxu0 }
  0x9f   :  { %v214_v63 = vadd.f32 %v652_v61, %v213_v62 }
  0xa1   :  { %v263_v0 = vadd.f32 %v262_v57, %v214_v63 }
  0xa2   :  { %v294_v56 = vpop.f32.mrf.mxu3 }
  0xa3   :  { %v302_v1 = vmax.f32 %v263_v0, 0.0  ;;  %v272_v2 = vpop.f32.mrf.mxu1 }
  0xa5   :  { %v318_v3 = vpack.c.bf16 %v302_v1, %v302_v1  ;;  %v233_v4 = vpop.f32.mrf.mxu2 }
  0xa6   :  { %v215_v5 = vpop.f32.mrf.mxu0  ;;  %v234_v38 = vadd.f32 %v652_v61, %v233_v4 }
  0xa7   :  { %335 = vst.msk [vmem:[%s737_s3] sm:$0xf] %vm334_vm1, %v318_v3  ;;  %v216_v6 = vadd.f32 %v652_v61, %v215_v5 }
  0xa9   :  { %v265_v7 = vadd.f32 %v264_v58, %v216_v6 }
  0xab   :  { %v303_v8 = vmax.f32 %v265_v7, 0.0  ;;  %v274_v9 = vpop.f32.mrf.mxu1 }
  0xad   :  { %v319_v10 = vpack.c.bf16 %v303_v8, %v303_v8  ;;  %v235_v11 = vpop.f32.mrf.mxu2 }
  0xae   :  { %v218_v13 = vpop.f32.mrf.mxu0  ;;  %v236_v53 = vadd.f32 %v652_v61, %v235_v11 }
  0xaf   :  { %336 = vst.msk [vmem:[%s737_s3 + $0x4] sm:$0xf] %vm334_vm1, %v319_v10  ;;  %v219_v14 = vadd.f32 %v652_v61, %v218_v13  ;;  %v297_v10 = vpop.f32.mrf.mxu3 }
  0xb1   :  { %v268_v15 = vadd.f32 %v267_v59, %v219_v14 }
  0xb3   :  { %v304_v16 = vmax.f32 %v268_v15, 0.0  ;;  %v277_v17 = vpop.f32.mrf.mxu1 }
  0xb5   :  { %v320_v18 = vpack.c.bf16 %v304_v16, %v304_v16  ;;  %v238_v19 = vpop.f32.mrf.mxu2 }
  0xb6   :  { %v239_v20 = vadd.f32 %v652_v61, %v238_v19  ;;  %v220_v21 = vpop.f32.mrf.mxu0 }
  0xb7   :  { %337 = vst.msk [vmem:[%s737_s3 + $0x8] sm:$0xf] %vm334_vm1, %v320_v18  ;;  %v221_v22 = vadd.f32 %v652_v61, %v220_v21 }
  0xb8   :  { %v288_v24 = vadd.f32 %v287_v12, %v239_v20 }
  0xb9   :  { %v270_v25 = vadd.f32 %v269_v60, %v221_v22 }
  0xba   :  { %v312_v26 = vmax.f32 %v288_v24, 0.0 }
  0xbb   :  { %v305_v27 = vmax.f32 %v270_v25, 0.0  ;;  %v279_v28 = vpop.f32.mrf.mxu1 }
  0xbc   :  { %v328_v29 = vpack.c.bf16 %v312_v26, %v312_v26 }
  0xbd   :  { %v321_v30 = vpack.c.bf16 %v305_v27, %v305_v27  ;;  %v240_v31 = vpop.f32.mrf.mxu2 }
  0xbe   :  { %345 = vst.msk [vmem:[%s737_s3 + $0x28] sm:$0xf] %vm334_vm1, %v328_v29  ;;  %v241_v32 = vadd.f32 %v652_v61, %v240_v31  ;;  %v223_v33 = vpop.f32.mrf.mxu0 }
  0xbf   :  { %338 = vst.msk [vmem:[%s737_s3 + $0xc] sm:$0xf] %vm334_vm1, %v321_v30  ;;  %v224_v34 = vadd.f32 %v652_v61, %v223_v33 }
  0xc0   :  { %v290_v35 = vadd.f32 %v289_v23, %v241_v32  ;;  %v299_v23 = vpop.f32.mrf.mxu3 }
  0xc1   :  { %v273_v36 = vadd.f32 %v272_v2, %v224_v34 }
  0xc2   :  { %v313_v39 = vmax.f32 %v290_v35, 0.0 }
  0xc3   :  { %v306_v40 = vmax.f32 %v273_v36, 0.0  ;;  %v282_v41 = vpop.f32.mrf.mxu1 }
  0xc4   :  { %v329_v42 = vpack.c.bf16 %v313_v39, %v313_v39  ;;  %v283_v43 = vadd.f32 %v282_v41, %v234_v38 }
  0xc5   :  { %v322_v44 = vpack.c.bf16 %v306_v40, %v306_v40  ;;  %v243_v45 = vpop.f32.mrf.mxu2 }
  0xc6   :  { %346 = vst.msk [vmem:[%s737_s3 + $0x2c] sm:$0xf] %vm334_vm1, %v329_v42  ;;  %v310_v46 = vmax.f32 %v283_v43, 0.0  ;;  %v244_v47 = vadd.f32 %v652_v61, %v243_v45  ;;  %v225_v48 = vpop.f32.mrf.mxu0 }
  0xc7   :  { %339 = vst.msk [vmem:[%s737_s3 + $0x10] sm:$0xf] %vm334_vm1, %v322_v44  ;;  %v226_v49 = vadd.f32 %v652_v61, %v225_v48 }
  0xc8   :  { %v326_v50 = vpack.c.bf16 %v310_v46, %v310_v46  ;;  %v293_v51 = vadd.f32 %v292_v37, %v244_v47 }
  0xc9   :  { %v275_v52 = vadd.f32 %v274_v9, %v226_v49 }
  0xca   :  { %343 = vst.msk [vmem:[%s737_s3 + $0x20] sm:$0xf] %vm334_vm1, %v326_v50  ;;  %v314_v54 = vmax.f32 %v293_v51, 0.0 }
  0xcb   :  { %v307_v55 = vmax.f32 %v275_v52, 0.0  ;;  %v284_v57 = vpop.f32.mrf.mxu1 }
  0xcc   :  { %v330_v58 = vpack.c.bf16 %v314_v54, %v314_v54  ;;  %v285_v59 = vadd.f32 %v284_v57, %v236_v53 }
  0xcd   :  { %v323_v60 = vpack.c.bf16 %v307_v55, %v307_v55  ;;  %v245_v62 = vpop.f32.mrf.mxu2 }
  0xce   :  { %347 = vst.msk [vmem:[%s737_s3 + $0x30] sm:$0xf] %vm334_vm1, %v330_v58  ;;  %v311_v63 = vmax.f32 %v285_v59, 0.0  ;;  %v246_v0 = vadd.f32 %v652_v61, %v245_v62  ;;  %v228_v1 = vpop.f32.mrf.mxu0 }
  0xcf   :  { %340 = vst.msk [vmem:[%s737_s3 + $0x14] sm:$0xf] %vm334_vm1, %v323_v60  ;;  %v229_v2 = vadd.f32 %v652_v61, %v228_v1 }
  0xd0   :  { %v327_v3 = vpack.c.bf16 %v311_v63, %v311_v63  ;;  %v295_v4 = vadd.f32 %v294_v56, %v246_v0 }
  0xd1   :  { %v278_v5 = vadd.f32 %v277_v17, %v229_v2 }
  0xd2   :  { %344 = vst.msk [vmem:[%s737_s3 + $0x24] sm:$0xf] %vm334_vm1, %v327_v3  ;;  %v315_v6 = vmax.f32 %v295_v4, 0.0 }
  0xd3   :  { %v308_v7 = vmax.f32 %v278_v5, 0.0 }
  0xd4   :  { %v331_v8 = vpack.c.bf16 %v315_v6, %v315_v6 }
  0xd5   :  { %v324_v9 = vpack.c.bf16 %v308_v7, %v308_v7  ;;  %v248_v11 = vpop.f32.mrf.mxu2 }
  0xd6   :  { %348 = vst.msk [vmem:[%s737_s3 + $0x34] sm:$0xf] %vm334_vm1, %v331_v8  ;;  %v249_v12 = vadd.f32 %v652_v61, %v248_v11  ;;  %v230_v13 = vpop.f32.mrf.mxu0 }
  0xd7   :  { %341 = vst.msk [vmem:[%s737_s3 + $0x18] sm:$0xf] %vm334_vm1, %v324_v9  ;;  %v231_v14 = vadd.f32 %v652_v61, %v230_v13 }
  0xd8   :  { %v298_v15 = vadd.f32 %v297_v10, %v249_v12 }
  0xd9   :  { %v280_v16 = vadd.f32 %v279_v28, %v231_v14 }
  0xda   :  { %v316_v17 = vmax.f32 %v298_v15, 0.0 }
  0xdb   :  { %v309_v18 = vmax.f32 %v280_v16, 0.0 }
  0xdc   :  { %v332_v19 = vpack.c.bf16 %v316_v17, %v316_v17 }
  0xdd   :  { %v325_v20 = vpack.c.bf16 %v309_v18, %v309_v18  ;;  %v250_v21 = vpop.f32.mrf.mxu2 }
  0xde   :  { %349 = vst.msk [vmem:[%s737_s3 + $0x38] sm:$0xf] %vm334_vm1, %v332_v19  ;;  %v251_v22 = vadd.f32 %v652_v61, %v250_v21 }
  0xdf   :  { %342 = vst.msk [vmem:[%s737_s3 + $0x1c] sm:$0xf] %vm334_vm1, %v325_v20 }
  0xe0   :  { %v300_v24 = vadd.f32 %v299_v23, %v251_v22 }
  0xe2   :  { %v317_v25 = vmax.f32 %v300_v24, 0.0 }
  0xe4   :  { %v333_v26 = vpack.c.bf16 %v317_v25, %v317_v25 }
  0xe6   :  { %350 = vst.msk [vmem:[%s737_s3 + $0x3c] sm:$0xf] %vm334_vm1, %v333_v26 }

// kernel: shape_vae_forward.11
= control target key start
LH: loop header
LB: loop body
LE: loop exit
PB: predicated region body
PF: predicated region fallthrough
CT: control target
= control target key end

     0   :  { %vm201_vm0 = vcmask 261120   ;;  %vm273_vm1 = vcmask 519168   ;;  %s544_s1 = inlined_call_operand.vmem [shape: bf16[288,64], index: 1, kind: input, shape index: {}]   ;;  %s545_s0 = inlined_call_operand.vmem [shape: bf16[32,288], index: 0, kind: input, shape index: {}]   ;;  %s546_s2 = inlined_call_operand.vmem [shape: f32[1,64], index: 2, kind: input, shape index: {}]   ;;  %s547_s3 = inlined_call_operand.vmem [shape: bf16[32,64], index: 3, kind: output, shape index: {}]  }
   0x1   :  { %v393_v0 = vld [vmem:[%s544_s1 + $0x38] sm:$0xff]  ;;  %v392_v2 = vld [vmem:[%s544_s1 + $0x30] sm:$0xff]  ;;  %v403_v3 = vld [vmem:[%s544_s1 + $0x88] sm:$0xff] }
   0x2   :  { %v401_v1 = vld [vmem:[%s544_s1 + $0x78] sm:$0xff]  ;;  %208 = vmatpush.bf16.msra.mxu0 %v393_v0  ;;  %404 = vmatpush.bf16.msra.mxu3 %v393_v0  ;;  %v400_v4 = vld [vmem:[%s544_s1 + $0x70] sm:$0xff]  ;;  %v402_v5 = vld [vmem:[%s544_s1 + $0x80] sm:$0xff] }
   0x3   :  { %227 = vmatpush.bf16.msra.mxu1 %v401_v1  ;;  %252 = vmatpush.bf16.msra.mxu2 %v403_v3  ;;  %v292_v6 = vld [vmem:[%s545_s0 + $0x8] sm:$0xf]  ;;  %v382_v7 = vld [vmem:[%s545_s0 + $0x10] sm:$0xf0]  ;;  %v390_v11 = vld [vmem:[%s544_s1 + $0x20] sm:$0xff] }
   0x4   :  { %v391_v8 = vld [vmem:[%s544_s1 + $0x28] sm:$0xff]  ;;  %v293_v10 = vor.u32 %v382_v7, %v292_v6  ;;  %v398_v12 = vld [vmem:[%s544_s1 + $0x60] sm:$0xff]  ;;  %v389_v13 = vld [vmem:[%s544_s1 + $0x18] sm:$0xff] }
   0x5   :  { %v399_v9 = vld [vmem:[%s544_s1 + $0x68] sm:$0xff]  ;;  %v397_v14 = vld [vmem:[%s544_s1 + $0x58] sm:$0xff]  ;;  %v388_v15 = vld [vmem:[%s544_s1 + $0x10] sm:$0xff] }
   0x6   :  { %209 = vmatpush.bf16.msra.mxu0 %v392_v2  ;;  %405 = vmatpush.bf16.msra.mxu3 %v392_v2  ;;  %v396_v16 = vld [vmem:[%s544_s1 + $0x50] sm:$0xff]  ;;  %v304_v17 = vld [vmem:[%s545_s0 + $0x20] sm:$0xf]  ;;  %v385_v18 = vld [vmem:[%s545_s0 + $0x28] sm:$0xf0] }
   0x7   :  { %228 = vmatpush.bf16.msra.mxu1 %v400_v4  ;;  %253 = vmatpush.bf16.msra.mxu2 %v402_v5  ;;  %v387_v19 = vld [vmem:[%s544_s1 + $0x8] sm:$0xff]  ;;  %v305_v21 = vor.u32 %v385_v18, %v304_v17  ;;  %v386_v22 = vld [vmem:[%s544_s1] sm:$0xff]  ;;  %v296_v25 = vld [vmem:[%s545_s0 + $0x18] sm:$0xf] }
   0x8   :  { %v395_v20 = vld [vmem:[%s544_s1 + $0x48] sm:$0xff]  ;;  %v284_v23 = vld [vmem:[%s545_s0] sm:$0xf]  ;;  %v384_v26 = vld [vmem:[%s545_s0 + $0x20] sm:$0xf0] }
   0x9   :  { %v381_v24 = vld [vmem:[%s545_s0 + $0x8] sm:$0xf0]  ;;  %v394_v27 = vld [vmem:[%s544_s1 + $0x40] sm:$0xff]  ;;  %v286_v29 = vld [vmem:[%s545_s0 + $0xc] sm:$0xf0]  ;;  %v297_v31 = vor.u32 %v384_v26, %v296_v25 }
   0xa   :  { %210 = vmatpush.bf16.msra.mxu0 %v391_v8  ;;  %406 = vmatpush.bf16.msra.mxu3 %v391_v8  ;;  %v380_v28 = vld [vmem:[%s545_s0 + $0x4] sm:$0xf]  ;;  %v285_v30 = vor.u32 %v381_v24, %v284_v23  ;;  %v383_v33 = vld [vmem:[%s545_s0 + $0x1c] sm:$0xf]  ;;  %v298_v34 = vld [vmem:[%s545_s0 + $0x24] sm:$0xf0] }
   0xb   :  { %229 = vmatpush.bf16.msra.mxu1 %v399_v9  ;;  %378 = vmatmul.msk.bf16.vlgmr.msra.gmra.mxu2 %vm201_vm0, %v293_v10  ;;  %v289_v32 = vor.u32 %v380_v28, %v286_v29  ;;  %v301_v35 = vor.u32 %v383_v33, %v298_v34  ;;  %v412_v37 = vld [vmem:[%s546_s2] ss:$0 sm:$0xff] }
   0xe   :  { %211 = vmatpush.bf16.msra.mxu0 %v390_v11  ;;  %407 = vmatpush.bf16.msra.mxu3 %v390_v11 }
   0xf   :  { %230 = vmatpush.bf16.msra.mxu1 %v398_v12 }
  0x12   :  { %212 = vmatpush.bf16.msra.mxu0 %v389_v13  ;;  %408 = vmatpush.bf16.msra.mxu3 %v389_v13 }
  0x13   :  { %231 = vmatpush.bf16.msra.mxu1 %v397_v14 }
  0x16   :  { %213 = vmatpush.bf16.msra.mxu0 %v388_v15  ;;  %409 = vmatpush.bf16.msra.mxu3 %v388_v15 }
  0x17   :  { %232 = vmatpush.bf16.msra.mxu1 %v396_v16 }
  0x1a   :  { %214 = vmatpush.bf16.msra.mxu0 %v387_v19  ;;  %410 = vmatpush.bf16.msra.mxu3 %v387_v19 }
  0x1b   :  { %233 = vmatpush.bf16.msra.mxu1 %v395_v20  ;;  %379 = vmatmul.msk.bf16.gmra.mxu2 %vm201_vm0, %v305_v21 }
  0x1e   :  { %215 = vmatpush.bf16.msra.mxu0 %v386_v22  ;;  %411 = vmatpush.bf16.msra.mxu3 %v386_v22 }
  0x1f   :  { %234 = vmatpush.bf16.msra.mxu1 %v394_v27 }
  0x21   :  { %216 = vmatmul.bf16.vlgmr.msra.gmra.mxu0 %v285_v30  ;;  %221 = vmatmul.bf16.vlgmr.msra.gmra.mxu3 %v297_v31 }
  0x22   :  { %235 = vmatmul.bf16.vlgmr.msra.gmra.mxu1 %v289_v32 }
  0x32   :  { %240 = vmatmul.bf16.gmra.mxu1 %v301_v35 }
  0x8e   :  { %v255_v36 = vpop.f32.mrf.mxu2 }
  0x96   :  { %v257_v44 = vpop.f32.mrf.mxu2 }
  0x9e   :  { %v217_v38 = vpop.f32.mrf.mxu0  ;;  %v260_v55 = vpop.f32.mrf.mxu2 }
  0x9f   :  { %v218_v39 = vadd.f32 %v412_v37, %v217_v38  ;;  %v236_v40 = vpop.f32.mrf.mxu1 }
  0xa1   :  { %v237_v41 = vadd.f32 %v236_v40, %v218_v39 }
  0xa3   :  { %v256_v42 = vadd.f32 %v255_v36, %v237_v41 }
  0xa4   :  { %v222_v49 = vpop.f32.mrf.mxu3 }
  0xa5   :  { %v265_v43 = vmax.f32 %v256_v42, 0.0  ;;  %v223_v52 = vadd.f32 %v412_v37, %v222_v49 }
  0xa6   :  { %v219_v45 = vpop.f32.mrf.mxu0  ;;  %v262_v1 = vpop.f32.mrf.mxu2 }
  0xa7   :  { %v269_v46 = vpack.c.bf16 %v265_v43, %v265_v43  ;;  %v220_v47 = vadd.f32 %v412_v37, %v219_v45  ;;  %v238_v48 = vpop.f32.mrf.mxu1 }
  0xa9   :  { %274 = vst.msk [vmem:[%s547_s3] sm:$0xf] %vm273_vm1, %v269_v46  ;;  %v239_v50 = vadd.f32 %v238_v48, %v220_v47 }
  0xab   :  { %v258_v51 = vadd.f32 %v257_v44, %v239_v50 }
  0xac   :  { %v224_v59 = vpop.f32.mrf.mxu3 }
  0xad   :  { %v266_v53 = vmax.f32 %v258_v51, 0.0  ;;  %v225_v61 = vadd.f32 %v412_v37, %v224_v59 }
  0xaf   :  { %v270_v54 = vpack.c.bf16 %v266_v53, %v266_v53  ;;  %v241_v56 = vpop.f32.mrf.mxu1 }
  0xb0   :  { %v242_v57 = vadd.f32 %v241_v56, %v223_v52 }
  0xb1   :  { %275 = vst.msk [vmem:[%s547_s3 + $0x4] sm:$0xf] %vm273_vm1, %v270_v54 }
  0xb2   :  { %v261_v58 = vadd.f32 %v260_v55, %v242_v57 }
  0xb4   :  { %v267_v60 = vmax.f32 %v261_v58, 0.0 }
  0xb6   :  { %v271_v62 = vpack.c.bf16 %v267_v60, %v267_v60 }
  0xb7   :  { %v243_v63 = vpop.f32.mrf.mxu1 }
  0xb8   :  { %276 = vst.msk [vmem:[%s547_s3 + $0x8] sm:$0xf] %vm273_vm1, %v271_v62  ;;  %v244_v0 = vadd.f32 %v243_v63, %v225_v61 }
  0xba   :  { %v263_v2 = vadd.f32 %v262_v1, %v244_v0 }
  0xbc   :  { %v268_v3 = vmax.f32 %v263_v2, 0.0 }
  0xbe   :  { %v272_v4 = vpack.c.bf16 %v268_v3, %v268_v3 }
  0xc0   :  { %277 = vst.msk [vmem:[%s547_s3 + $0xc] sm:$0xf] %vm273_vm1, %v272_v4 }

// kernel: shape_vae_forward.12
= control target key start
LH: loop header
LB: loop body
LE: loop exit
PB: predicated region body
PF: predicated region fallthrough
CT: control target
= control target key end

     0   :  { %17 = vsyncpa [#allocation3], 0  ;;  %s1778_s0 = inlined_call_operand.vmem [shape: bf16[2,1024], index: 0, kind: input, shape index: {}]   ;;  %s1779_s1 = inlined_call_operand.vmem [shape: f32[2,8], index: 1, kind: input, shape index: {}]   ;;  %s1780_s2 = inlined_call_operand.vmem [shape: bf16[1024,17], index: 2, kind: input, shape index: {}]   ;;  %s1781_s3 = inlined_call_operand.vmem [shape: f32[1,17], index: 3, kind: input, shape index: {}]   ;;  %s1782_s4 = inlined_call_operand.vmem [shape: bf16[8,1024], index: 4, kind: input, shape index: {}]   ;;  %s1783_s5 = inlined_call_operand.vmem [shape: f32[1,1024], index: 5, kind: input, shape index: {}]   ;;  %s1784_s6 = inlined_call_operand.vmem [shape: f32[1,1024], index: 6, kind: input, shape index: {}]   ;;  %s1785_s7 = inlined_call_operand.hbm [shape: f32[2,8], index: 7, kind: output, shape index: {0}]   ;;  %s1786_s8 = inlined_call_operand.hbm [shape: f32[2,8], index: 8, kind: output, shape index: {1}]   ;;  %s1787_s9 = inlined_call_operand.hbm [shape: f32[2,8], index: 9, kind: output, shape index: {2}]   ;;  %s1788_s10 = inlined_call_operand.hbm [shape: f32[2,9], index: 10, kind: output, shape index: {3}]   ;;  %s1789_s11 = inlined_call_operand.vmem [shape: bf16[2,1024], index: 11, kind: output, shape index: {4}]  }
   0x1   :  { %18 = vsyncpa [#allocation5], 0  ;;  %v1293_v0 = vld [vmem:[%s1780_s2 + $0x38] sm:$0xff]  ;;  %v1292_v4 = vld [vmem:[%s1780_s2 + $0x30] sm:$0xff] }
   0x2   :  { %v1301_v1 = vld [vmem:[%s1780_s2 + $0x78] sm:$0xff]  ;;  %570 = vmatpush.bf16.msra.mxu0 %v1293_v0  ;;  %v1300_v5 = vld [vmem:[%s1780_s2 + $0x70] sm:$0xff]  ;;  %v1291_v8 = vld [vmem:[%s1780_s2 + $0x28] sm:$0xff] }
   0x3   :  { %v1309_v2 = vld [vmem:[%s1780_s2 + $0xb8] sm:$0xff]  ;;  %583 = vmatpush.bf16.msra.mxu1 %v1301_v1  ;;  %v1308_v6 = vld [vmem:[%s1780_s2 + $0xb0] sm:$0xff]  ;;  %v1299_v9 = vld [vmem:[%s1780_s2 + $0x68] sm:$0xff] }
   0x4   :  { %v1317_v3 = vld [vmem:[%s1780_s2 + $0xf8] sm:$0xff]  ;;  %596 = vmatpush.bf16.msra.mxu2 %v1309_v2  ;;  %v1316_v7 = vld [vmem:[%s1780_s2 + $0xf0] sm:$0xff]  ;;  %v1307_v10 = vld [vmem:[%s1780_s2 + $0xa8] sm:$0xff] }
   0x5   :  { %609 = vmatpush.bf16.msra.mxu3 %v1317_v3  ;;  %v1315_v11 = vld [vmem:[%s1780_s2 + $0xe8] sm:$0xff]  ;;  %v1290_v12 = vld [vmem:[%s1780_s2 + $0x20] sm:$0xff]  ;;  %v1289_v17 = vld [vmem:[%s1780_s2 + $0x18] sm:$0xff] }
   0x6   :  { %571 = vmatpush.bf16.msra.mxu0 %v1292_v4  ;;  %v1298_v13 = vld [vmem:[%s1780_s2 + $0x60] sm:$0xff]  ;;  %v1297_v18 = vld [vmem:[%s1780_s2 + $0x58] sm:$0xff]  ;;  %v1288_v21 = vld [vmem:[%s1780_s2 + $0x10] sm:$0xff] }
   0x7   :  { %584 = vmatpush.bf16.msra.mxu1 %v1300_v5  ;;  %v1306_v14 = vld [vmem:[%s1780_s2 + $0xa0] sm:$0xff]  ;;  %v1305_v19 = vld [vmem:[%s1780_s2 + $0x98] sm:$0xff]  ;;  %v1296_v22 = vld [vmem:[%s1780_s2 + $0x50] sm:$0xff] }
   0x8   :  { %597 = vmatpush.bf16.msra.mxu2 %v1308_v6  ;;  %v1314_v15 = vld [vmem:[%s1780_s2 + $0xe0] sm:$0xff]  ;;  %v1313_v20 = vld [vmem:[%s1780_s2 + $0xd8] sm:$0xff] }
   0x9   :  { %610 = vmatpush.bf16.msra.mxu3 %v1316_v7  ;;  %v35_v16 = vld [vmem:[%s1778_s0] sm:$0xff] }
   0xa   :  { %572 = vmatpush.bf16.msra.mxu0 %v1291_v8  ;;  %169 = vst [vmem:[#allocation1] ss:$9 sm:$0xff] %v35_v16 }
   0xb   :  { %585 = vmatpush.bf16.msra.mxu1 %v1299_v9 }
   0xc   :  { %598 = vmatpush.bf16.msra.mxu2 %v1307_v10 }
   0xd   :  { %611 = vmatpush.bf16.msra.mxu3 %v1315_v11 }
   0xe   :  { %573 = vmatpush.bf16.msra.mxu0 %v1290_v12 }
   0xf   :  { %586 = vmatpush.bf16.msra.mxu1 %v1298_v13 }
  0x10   :  { %599 = vmatpush.bf16.msra.mxu2 %v1306_v14 }
  0x11   :  { %612 = vmatpush.bf16.msra.mxu3 %v1314_v15 }
  0x12   :  { %574 = vmatpush.bf16.msra.mxu0 %v1289_v17 }
  0x13   :  { %587 = vmatpush.bf16.msra.mxu1 %v1297_v18 }
  0x14   :  { %19 = vsyncpa [#allocation8], 0  ;;  %600 = vmatpush.bf16.msra.mxu2 %v1305_v19  ;;  %v1304_v23 = vld [vmem:[%s1780_s2 + $0x90] sm:$0xff]  ;;  %v1287_v25 = vld [vmem:[%s1780_s2 + $0x8] sm:$0xff]  ;;  %vm684_vm0 = vcmask 58368   ;;  %s1466_s29 = smov 112  }
  0x15   :  { %613 = vmatpush.bf16.msra.mxu3 %v1313_v20  ;;  %v1312_v24 = vld [vmem:[%s1780_s2 + $0xd0] sm:$0xff]  ;;  %v1295_v26 = vld [vmem:[%s1780_s2 + $0x48] sm:$0xff]  ;;  %v1286_v29 = vld [vmem:[%s1780_s2] sm:$0xff]  ;;  %v1464_v20 = vmov 16   ;;  %vm762_vm1 = vcmask 1043456   ;;  %vm695_vm2 = vcmask 1024  }
  0x16   :  { %575 = vmatpush.bf16.msra.mxu0 %v1288_v21  ;;  %v1303_v27 = vld [vmem:[%s1780_s2 + $0x88] sm:$0xff]  ;;  %v1294_v30 = vld [vmem:[%s1780_s2 + $0x40] sm:$0xff]  ;;  %v1325_v33 = vld [vmem:[%s1780_s2 + $0x138] sm:$0xff]  ;;  %1358 = vset.pattern.permute.xlu0 %v1464_v20  ;;  %vm758_vm3 = vcmask 64512   ;;  %s1467_s20 = smov 1   ;;  %s1468_s0 = smov [#allocation4]  }
  0x17   :  { %588 = vmatpush.bf16.msra.mxu1 %v1296_v22  ;;  %v1311_v28 = vld [vmem:[%s1780_s2 + $0xc8] sm:$0xff]  ;;  %v1302_v31 = vld [vmem:[%s1780_s2 + $0x80] sm:$0xff]  ;;  %v1333_v34 = vld [vmem:[%s1780_s2 + $0x178] sm:$0xff]  ;;  %s971_s21 = sshll.u32 %s1468_s0, 4  ;;  %s973_s23 = sshll.u32 %s1786_s8, 4  ;;  %vm701_vm4 = vcmask 66568   ;;  %s972_s21 = int_to_ptr.vmem [resolvable:$true] %s971_s21  ;;  %s974_s23 = int_to_ptr.hbm [resolvable:$true] %s973_s23 }
  0x18   :  { %601 = vmatpush.bf16.msra.mxu2 %v1304_v23  ;;  %v1310_v32 = vld [vmem:[%s1780_s2 + $0xc0] sm:$0xff]  ;;  %v1341_v35 = vld [vmem:[%s1780_s2 + $0x1b8] sm:$0xff]  ;;  %v1324_v37 = vld [vmem:[%s1780_s2 + $0x130] sm:$0xff]  ;;  %s962_s26 = sshll.u32 %s1785_s7, 4  ;;  %s1469_s27 = smov [#allocation2]   ;;  %vm936_vm5 = vcmask 1042434   ;;  %s963_s26 = int_to_ptr.hbm [resolvable:$true] %s962_s26 }
  0x19   :  { %614 = vmatpush.bf16.msra.mxu3 %v1312_v24  ;;  %v1349_v36 = vld [vmem:[%s1780_s2 + $0x1f8] sm:$0xff]  ;;  %v170_v39 = vld [vmem:[#allocation1] sm:$0xff]  ;;  %v1332_v40 = vld [vmem:[%s1780_s2 + $0x170] sm:$0xff]  ;;  %s960_s28 = sshll.u32 %s1469_s27, 4  ;;  %s984_s12 = sshll.u32 %s1787_s9, 4  ;;  %vm932_vm6 = vcmask 1040384   ;;  %s961_s28 = int_to_ptr.vmem [resolvable:$true] %s960_s28  ;;  %s985_s12 = int_to_ptr.hbm [resolvable:$true] %s984_s12 }
  0x1a   :  { %576 = vmatpush.bf16.msra.mxu0 %v1287_v25  ;;  %v172_v38 = vld [vmem:[#allocation1 + $0x12] sm:$0xff]  ;;  %v173_v41 = vld [vmem:[#allocation1 + $0x1b] sm:$0xff]  ;;  %v171_v42 = vld [vmem:[#allocation1 + $0x9] sm:$0xff]  ;;  %s1471_s8 = smov [#allocation7]   ;;  %s995_s7 = sshll.u32 %s1788_s10, 4  ;;  %vm940_vm7 = vcmask 1041408   ;;  %s996_s7 = int_to_ptr.hbm [resolvable:$true] %s995_s7 }
  0x1b   :  { %589 = vmatpush.bf16.msra.mxu1 %v1295_v26  ;;  %v1340_v43 = vld [vmem:[%s1780_s2 + $0x1b0] sm:$0xff]  ;;  %v1323_v45 = vld [vmem:[%s1780_s2 + $0x128] sm:$0xff]  ;;  %v1322_v49 = vld [vmem:[%s1780_s2 + $0x120] sm:$0xff]  ;;  %s993_s13 = sshll.u32 %s1471_s8, 4  ;;  %vm942_vm8 = vcmask 1044484   ;;  %vm946_vm9 = vcmask 1046534   ;;  %s994_s13 = int_to_ptr.vmem [resolvable:$true] %s993_s13 }
  0x1c   :  { %602 = vmatpush.bf16.msra.mxu2 %v1303_v27  ;;  %v1348_v44 = vld [vmem:[%s1780_s2 + $0x1f0] sm:$0xff]  ;;  %v1331_v46 = vld [vmem:[%s1780_s2 + $0x168] sm:$0xff]  ;;  %v1330_v50 = vld [vmem:[%s1780_s2 + $0x160] sm:$0xff]  ;;  %vm950_vm10 = vcmask 1045508  }
  0x1d   :  { %615 = vmatpush.bf16.msra.mxu3 %v1311_v28  ;;  %v1339_v47 = vld [vmem:[%s1780_s2 + $0x1a8] sm:$0xff]  ;;  %v1338_v51 = vld [vmem:[%s1780_s2 + $0x1a0] sm:$0xff]  ;;  %v1321_v53 = vld [vmem:[%s1780_s2 + $0x118] sm:$0xff] }
  0x1e   :  { %577 = vmatpush.bf16.msra.mxu0 %v1286_v29  ;;  %v1347_v48 = vld [vmem:[%s1780_s2 + $0x1e8] sm:$0xff]  ;;  %v1346_v52 = vld [vmem:[%s1780_s2 + $0x1e0] sm:$0xff]  ;;  %v1329_v54 = vld [vmem:[%s1780_s2 + $0x158] sm:$0xff] }
  0x1f   :  { %590 = vmatpush.bf16.msra.mxu1 %v1294_v30  ;;  %v1337_v55 = vld [vmem:[%s1780_s2 + $0x198] sm:$0xff]  ;;  %v1320_v57 = vld [vmem:[%s1780_s2 + $0x110] sm:$0xff]  ;;  %v1319_v61 = vld [vmem:[%s1780_s2 + $0x108] sm:$0xff] }
  0x20   :  { %603 = vmatpush.bf16.msra.mxu2 %v1302_v31  ;;  %v1345_v56 = vld [vmem:[%s1780_s2 + $0x1d8] sm:$0xff]  ;;  %v1328_v58 = vld [vmem:[%s1780_s2 + $0x150] sm:$0xff]  ;;  %v1327_v62 = vld [vmem:[%s1780_s2 + $0x148] sm:$0xff] }
  0x21   :  { %616 = vmatpush.bf16.msra.mxu3 %v1310_v32  ;;  %578 = vmatmul.bf16.vlgmr.msra.gmra.mxu0 %v170_v39  ;;  %v1336_v59 = vld [vmem:[%s1780_s2 + $0x190] sm:$0xff]  ;;  %v1335_v63 = vld [vmem:[%s1780_s2 + $0x188] sm:$0xff]  ;;  %v1318_v1 = vld [vmem:[%s1780_s2 + $0x100] sm:$0xff] }
  0x22   :  { %622 = vmatpush.bf16.msrb.mxu0 %v1325_v33  ;;  %591 = vmatmul.bf16.vlgmr.msra.gmra.mxu1 %v171_v42  ;;  %v1344_v60 = vld [vmem:[%s1780_s2 + $0x1d0] sm:$0xff]  ;;  %v1343_v0 = vld [vmem:[%s1780_s2 + $0x1c8] sm:$0xff]  ;;  %v1326_v2 = vld [vmem:[%s1780_s2 + $0x140] sm:$0xff] }
  0x23   :  { %635 = vmatpush.bf16.msrb.mxu1 %v1333_v34  ;;  %604 = vmatmul.bf16.vlgmr.msra.gmra.mxu2 %v172_v38  ;;  %v1334_v3 = vld [vmem:[%s1780_s2 + $0x180] sm:$0xff]  ;;  %v175_v6 = vld [vmem:[#allocation1 + $0x2d] sm:$0xff]  ;;  %v176_v7 = vld [vmem:[#allocation1 + $0x36] sm:$0xff] }
  0x24   :  { %648 = vmatpush.bf16.msrb.mxu2 %v1341_v35  ;;  %617 = vmatmul.bf16.vlgmr.msra.gmra.mxu3 %v173_v41  ;;  %v1342_v4 = vld [vmem:[%s1780_s2 + $0x1c0] sm:$0xff]  ;;  %v705_v38 = vld [vmem:[%s1782_s4 + $0x8] sm:$0xff]  ;;  %s1470_s2 = smov [#allocation6]  }
  0x25   :  { %661 = vmatpush.bf16.msrb.mxu3 %v1349_v36  ;;  %v174_v5 = vld [vmem:[#allocation1 + $0x24] sm:$0xff]  ;;  %v1359_v15 = vld [vmem:[%s1781_s3] ss:$0 sm:$0xff]  ;;  %s1465_s3 = smov 120   ;;  %v745_v41 = vunpack.c.h.b16 %v705_v38 }
  0x26   :  { %623 = vmatpush.bf16.msrb.mxu0 %v1324_v37  ;;  %v177_v8 = vld [vmem:[#allocation1 + $0x3f] sm:$0xff] }
  0x27   :  { %636 = vmatpush.bf16.msrb.mxu1 %v1332_v40  ;;  %v704_v39 = vld [vmem:[%s1782_s4] sm:$0xff]  ;;  %v744_v40 = vunpack.c.l.b16 %v705_v38 }
  0x28   :  { %649 = vmatpush.bf16.msrb.mxu2 %v1340_v43  ;;  %v742_v42 = vunpack.c.l.b16 %v704_v39  ;;  %v743_v43 = vunpack.c.h.b16 %v704_v39 }
  0x29   :  { %662 = vmatpush.bf16.msrb.mxu3 %v1348_v44  ;;  %v752_v44 = vpack.c.b16 %v744_v40, %v744_v40 }
  0x2a   :  { %624 = vmatpush.bf16.msrb.mxu0 %v1323_v45  ;;  %v753_v45 = vpack.c.b16 %v745_v41, %v745_v41 }
  0x2b   :  { %637 = vmatpush.bf16.msrb.mxu1 %v1331_v46  ;;  %v750_v46 = vpack.c.b16 %v742_v42, %v742_v42 }
  0x2c   :  { %650 = vmatpush.bf16.msrb.mxu2 %v1339_v47  ;;  %v751_v47 = vpack.c.b16 %v743_v43, %v743_v43 }
  0x2d   :  { %663 = vmatpush.bf16.msrb.mxu3 %v1347_v48  ;;  %v770_v48 = vsel %vm762_vm1, %v752_v44, 0 }
  0x2e   :  { %625 = vmatpush.bf16.msrb.mxu0 %v1322_v49  ;;  %v773_v49 = vsel %vm762_vm1, %v753_v45, 0 }
  0x2f   :  { %638 = vmatpush.bf16.msrb.mxu1 %v1330_v50  ;;  %v764_v50 = vsel %vm762_vm1, %v750_v46, 0 }
  0x30   :  { %651 = vmatpush.bf16.msrb.mxu2 %v1338_v51  ;;  %v767_v51 = vsel %vm762_vm1, %v751_v47, 0 }
  0x31   :  { %664 = vmatpush.bf16.msrb.mxu3 %v1346_v52  ;;  %v707_v52 = vld [vmem:[%s1782_s4 + $0x18] sm:$0xff] }
  0x32   :  { %626 = vmatpush.bf16.msrb.mxu0 %v1321_v53  ;;  %v706_v53 = vld [vmem:[%s1782_s4 + $0x10] sm:$0xff] }
  0x33   :  { %639 = vmatpush.bf16.msrb.mxu1 %v1329_v54  ;;  %v748_v54 = vunpack.c.l.b16 %v707_v52 }
  0x34   :  { %652 = vmatpush.bf16.msrb.mxu2 %v1337_v55  ;;  %v749_v55 = vunpack.c.h.b16 %v707_v52 }
  0x35   :  { %665 = vmatpush.bf16.msrb.mxu3 %v1345_v56  ;;  %v746_v56 = vunpack.c.l.b16 %v706_v53 }
  0x36   :  { %627 = vmatpush.bf16.msrb.mxu0 %v1320_v57  ;;  %v747_v57 = vunpack.c.h.b16 %v706_v53 }
  0x37   :  { %640 = vmatpush.bf16.msrb.mxu1 %v1328_v58  ;;  %v756_v58 = vpack.c.b16 %v748_v54, %v748_v54 }
  0x38   :  { %653 = vmatpush.bf16.msrb.mxu2 %v1336_v59  ;;  %v757_v59 = vpack.c.b16 %v749_v55, %v749_v55 }
  0x39   :  { %666 = vmatpush.bf16.msrb.mxu3 %v1344_v60  ;;  %v754_v60 = vpack.c.b16 %v746_v56, %v746_v56 }
  0x3a   :  { %628 = vmatpush.bf16.msrb.mxu0 %v1319_v61  ;;  %v755_v61 = vpack.c.b16 %v747_v57, %v747_v57 }
  0x3b   :  { %641 = vmatpush.bf16.msrb.mxu1 %v1327_v62  ;;  %v782_v62 = vsel %vm762_vm1, %v756_v58, 0 }
  0x3c   :  { %654 = vmatpush.bf16.msrb.mxu2 %v1335_v63  ;;  %v785_v63 = vsel %vm762_vm1, %v757_v59, 0 }
  0x3d   :  { %667 = vmatpush.bf16.msrb.mxu3 %v1343_v0  ;;  %v776_v0 = vsel %vm762_vm1, %v754_v60, 0 }
  0x3e   :  { %629 = vmatpush.bf16.msrb.mxu0 %v1318_v1  ;;  %v779_v1 = vsel %vm762_vm1, %v755_v61, 0 }
  0x3f   :  { %642 = vmatpush.bf16.msrb.mxu1 %v1326_v2 }
  0x40   :  { %655 = vmatpush.bf16.msrb.mxu2 %v1334_v3 }
  0x41   :  { %668 = vmatpush.bf16.msrb.mxu3 %v1342_v4  ;;  %630 = vmatmul.bf16.vlgmr.msrb.gmra.mxu0 %v174_v5  ;;  %v674_v4 = vld [vmem:[%s1779_s1] sm:$0x3] }
  0x42   :  { %643 = vmatmul.bf16.vlgmr.msrb.gmra.mxu1 %v175_v6  ;;  %794 = vmatpush.bf16.msra.mxu0 %v764_v50 }
  0x43   :  { %656 = vmatmul.bf16.vlgmr.msrb.gmra.mxu2 %v176_v7  ;;  %807 = vmatpush.bf16.msra.mxu1 %v767_v51 }
  0x44   :  { %669 = vmatmul.bf16.vlgmr.msrb.gmra.mxu3 %v177_v8  ;;  %820 = vmatpush.bf16.msra.mxu2 %v770_v48 }
  0x45   :  { %833 = vmatpush.bf16.msra.mxu3 %v773_v49 }
  0x46   :  { %846 = vmatpush.bf16.msrb.mxu0 %v776_v0 }
  0x47   :  { %859 = vmatpush.bf16.msrb.mxu1 %v779_v1 }
  0x48   :  { %872 = vmatpush.bf16.msrb.mxu2 %v782_v62 }
  0x49   :  { %885 = vmatpush.bf16.msrb.mxu3 %v785_v63 }
  0x9e   :  { %v579_v9 = vpop.f32.mrf.mxu0 }
  0x9f   :  { %v592_v10 = vpop.f32.mrf.mxu1  ;;  %v580_v18 = vadd.f32 %v1359_v15, %v579_v9 }
  0xa1   :  { %v593_v19 = vadd.f32 %v592_v10, %v580_v18 }
  0xa6   :  { %v605_v11 = vpop.f32.mrf.mxu2  ;;  %v581_v13 = vpop.f32.mrf.mxu0 }
  0xa7   :  { %v618_v12 = vpop.f32.mrf.mxu3  ;;  %v594_v14 = vpop.f32.mrf.mxu1  ;;  %v606_v21 = vadd.f32 %v605_v11, %v593_v19 }
  0xa9   :  { %v619_v22 = vadd.f32 %v618_v12, %v606_v21  ;;  %v708_v12 = vld [vmem:[%s1783_s5] sm:$0xff] }
  0xaa   :  { %v716_v15 = vperm.slane %v708_v12, 2  ;;  %v714_v20 = vperm.slane %v708_v12, 0  ;;  %v715_v21 = vperm.slane %v708_v12, 1  ;;  %v720_v47 = vperm.slane %v708_v12, 6 }
  0xab   :  { %v721_v50 = vperm.slane %v708_v12, 7 }
  0xae   :  { %v607_v16 = vpop.f32.mrf.mxu2 }
  0xaf   :  { %v620_v17 = vpop.f32.mrf.mxu3  ;;  %v717_v16 = vperm.slane %v708_v12, 3 }
  0xbe   :  { %v631_v23 = vpop.f32.mrf.mxu0 }
  0xbf   :  { %v644_v24 = vpop.f32.mrf.mxu1  ;;  %v632_v25 = vadd.f32 %v631_v23, %v619_v22  ;;  %v718_v22 = vperm.slane %v708_v12, 4  ;;  %v719_v23 = vperm.slane %v708_v12, 5 }
  0xc1   :  { %v645_v26 = vadd.f32 %v644_v24, %v632_v25  ;;  %v891_v24 = vld [vmem:[%s1784_s6] sm:$0xff] }
  0xc2   :  { %v897_v42 = vperm.slane %v891_v24, 4  ;;  %v898_v44 = vperm.slane %v891_v24, 5  ;;  %v899_v57 = vperm.slane %v891_v24, 6  ;;  %v900_v59 = vperm.slane %v891_v24, 7 }
  0xc6   :  { %v657_v27 = vpop.f32.mrf.mxu2  ;;  %v633_v30 = vpop.f32.mrf.mxu0 }
  0xc7   :  { %v670_v28 = vpop.f32.mrf.mxu3  ;;  %v658_v29 = vadd.f32 %v657_v27, %v645_v26  ;;  %v646_v31 = vpop.f32.mrf.mxu1  ;;  %v895_v30 = vperm.slane %v891_v24, 2 }
  0xc9   :  { %v671_v32 = vadd.f32 %v670_v28, %v658_v29 }
  0xcb   :  { %687 = vrot.lane.b32.xlu1 %v671_v32, %s1465_s3  ;;  %v675_v33 = vmul.f32 0.5, %v671_v32  ;;  %685 = vst.msk [vmem:[#allocation2] sm:$0x3] %vm684_vm0, %v671_v32 }
  0xcc   :  { %965 = dma.vmem_to_hbm [thread:$0]  %s961_s28, 32, %s963_s26, [#allocation3]  }
  0xcd   :  { %v676_v34 = vmul.f32 1.442695, %v675_v33  ;;  %v893_v33 = vperm.slane %v891_v24, 0 }
  0xce   :  { %v659_v35 = vpop.f32.mrf.mxu2 }
  0xcf   :  { %v672_v36 = vpop.f32.mrf.mxu3  ;;  %1360 = vpow2.f32 %v676_v34  ;;  %v894_v34 = vperm.slane %v891_v24, 1 }
  0xd3   :  { %692 = vrot.lane.b32.xlu1 %v671_v32, %s1466_s29 }
  0xd5   :  { %v1361_v37 = vpop.eup %1360 }
  0xd6   :  { %679 = vrot.lane.b32.xlu0 %v1361_v37, %s1465_s3  ;;  %s982_s3 = sshll.u32 %s1470_s2, 4  ;;  %s983_s3 = int_to_ptr.vmem [resolvable:$true] %s982_s3 }
  0xde   :  { %710 = vperm.xlu0 %1358, %v671_v32  }
 0x13d   :  { %v688_v2 = vpop.permute.xlu1 %687 }
 0x13e   :  { %690 = vst.msk [vmem:[#allocation4] sm:$0x3] %vm684_vm0, %v688_v2 }
 0x13f   :  { %976 = dma.vmem_to_hbm [thread:$0]  %s972_s21, 32, %s974_s23, [#allocation5]  }
 0x145   :  { %v693_v3 = vpop.permute.xlu1 %692 }
 0x146   :  { %696 = vst.msk [vmem:[#allocation7] sm:$0x3] %vm695_vm2, %v693_v3 }
 0x148   :  { %v680_v5 = vpop.permute.xlu0 %679 }
 0x149   :  { %v682_v6 = vmul.f32 %v680_v5, %v674_v4 }
 0x14b   :  { %v683_v7 = vadd.f32 %v682_v6, %v671_v32  ;;  %v896_v32 = vperm.slane %v891_v24, 3 }
 0x14d   :  { %v703_v8 = vpack.c.bf16 %v683_v7, %v683_v7  ;;  %691 = vst.msk [vmem:[#allocation6] sm:$0x3] %vm684_vm0, %v683_v7  ;;  %698 = vrot.lane.b32.xlu2 %v683_v7, %s1467_s20 }
 0x14e   :  { %987 = dma.vmem_to_hbm [thread:$0]  %s983_s3, 32, %s985_s12, [#allocation5]  }
 0x14f   :  { %1278 = vmatmul.msk.bf16.vlgmr.msra.gmra.mxu0 %vm758_vm3, %v703_v8  ;;  %1279 = vmatmul.msk.bf16.vlgmr.msra.gmra.mxu1 %vm758_vm3, %v703_v8 }
 0x150   :  { %1280 = vmatmul.msk.bf16.vlgmr.msra.gmra.mxu2 %vm758_vm3, %v703_v8  ;;  %1281 = vmatmul.msk.bf16.vlgmr.msra.gmra.mxu3 %vm758_vm3, %v703_v8  ;;  %v711_v19 = vpop.permute.xlu0 %710 }
 0x151   :  { %v732_v25 = vmul.f32 %v716_v15, %v711_v19  ;;  %v733_v26 = vmul.f32 %v717_v16, %v711_v19  ;;  %v730_v27 = vmul.f32 %v714_v20, %v711_v19  ;;  %v731_v28 = vmul.f32 %v715_v21, %v711_v19 }
 0x152   :  { %v734_v37 = vmul.f32 %v718_v22, %v711_v19  ;;  %v735_v38 = vmul.f32 %v719_v23, %v711_v19  ;;  %v736_v55 = vmul.f32 %v720_v47, %v711_v19  ;;  %v737_v58 = vmul.f32 %v721_v50, %v711_v19 }
 0x15f   :  { %1282 = vmatmul.msk.bf16.vlgmr.msrb.gmra.mxu0 %vm758_vm3, %v703_v8  ;;  %1283 = vmatmul.msk.bf16.vlgmr.msrb.gmra.mxu1 %vm758_vm3, %v703_v8 }
 0x160   :  { %1284 = vmatmul.msk.bf16.vlgmr.msrb.gmra.mxu2 %vm758_vm3, %v703_v8  ;;  %1285 = vmatmul.msk.bf16.vlgmr.msrb.gmra.mxu3 %vm758_vm3, %v703_v8 }
 0x1a7   :  { %v699_v9 = vpop.permute.xlu2 %698 }
 0x1a8   :  { %702 = vst.msk [vmem:[#allocation7] sm:$0x3] %vm701_vm4, %v699_v9 }
 0x1a9   :  { %998 = dma.vmem_to_hbm [thread:$0]  %s994_s13, 32, %s996_s7, [#allocation8]  }
 0x1cc   :  { %v796_v10 = vpop.f32.mrf.mxu0  ;;  %v809_v11 = vpop.f32.mrf.mxu1 }
 0x1cd   :  { %v797_v39 = vadd.f32 %v796_v10, %v730_v27  ;;  %v810_v40 = vadd.f32 %v809_v11, %v731_v28 }
 0x1cf   :  { %v909_v51 = vadd.f32 %v893_v33, %v797_v39  ;;  %v910_v52 = vadd.f32 %v894_v34, %v810_v40 }
 0x1d1   :  { %v917_v62 = vpack.c.bf16 %v910_v52, %v909_v51 }
 0x1d3   :  { %v822_v13 = vpop.f32.mrf.mxu2  ;;  %v835_v14 = vpop.f32.mrf.mxu3  ;;  %v925_v8 = vrot.slane %v917_v62, 3 }
 0x1d4   :  { %v798_v17 = vpop.f32.mrf.mxu0  ;;  %v811_v18 = vpop.f32.mrf.mxu1  ;;  %v823_v29 = vadd.f32 %v822_v13, %v732_v25  ;;  %v836_v31 = vadd.f32 %v835_v14, %v733_v26 }
 0x1d5   :  { %v935_v17 = vsel %vm932_vm6, %v917_v62, %v925_v8 }
 0x1d6   :  { %v911_v48 = vadd.f32 %v895_v30, %v823_v29  ;;  %v912_v49 = vadd.f32 %v896_v32, %v836_v31 }
 0x1d8   :  { %v918_v56 = vpack.c.bf16 %v912_v49, %v911_v48 }
 0x1da   :  { %v926_v4 = vrot.slane %v918_v56, 6  ;;  %v927_v5 = vrot.slane %v918_v56, 1 }
 0x1db   :  { %v824_v35 = vpop.f32.mrf.mxu2  ;;  %v837_v36 = vpop.f32.mrf.mxu3 }
 0x1dc   :  { %v848_v41 = vpop.f32.mrf.mxu0  ;;  %v861_v43 = vpop.f32.mrf.mxu1  ;;  %v939_v12 = vsel %vm936_vm5, %v926_v4, %v927_v5 }
 0x1dd   :  { %v849_v45 = vadd.f32 %v848_v41, %v734_v37  ;;  %v862_v46 = vadd.f32 %v861_v43, %v735_v38  ;;  %v941_v20 = vsel %vm940_vm7, %v935_v17, %v939_v12 }
 0x1df   :  { %v913_v53 = vadd.f32 %v897_v42, %v849_v45  ;;  %v914_v54 = vadd.f32 %v898_v44, %v862_v46 }
 0x1e1   :  { %v919_v63 = vpack.c.bf16 %v914_v54, %v913_v53 }
 0x1e3   :  { %v874_v60 = vpop.f32.mrf.mxu2  ;;  %v887_v61 = vpop.f32.mrf.mxu3  ;;  %v928_v9 = vrot.slane %v919_v63, 4  ;;  %v929_v10 = vrot.slane %v919_v63, 7 }
 0x1e4   :  { %v875_v0 = vadd.f32 %v874_v60, %v736_v55  ;;  %v888_v1 = vadd.f32 %v887_v61, %v737_v58  ;;  %v850_v2 = vpop.f32.mrf.mxu0  ;;  %v863_v3 = vpop.f32.mrf.mxu1 }
 0x1e5   :  { %v945_v18 = vsel %vm942_vm8, %v928_v9, %v929_v10 }
 0x1e6   :  { %v915_v6 = vadd.f32 %v899_v57, %v875_v0  ;;  %v916_v7 = vadd.f32 %v900_v59, %v888_v1 }
 0x1e8   :  { %v920_v11 = vpack.c.bf16 %v916_v7, %v915_v6 }
 0x1ea   :  { %v930_v13 = vrot.slane %v920_v11, 2  ;;  %v931_v14 = vrot.slane %v920_v11, 5 }
 0x1eb   :  { %v876_v15 = vpop.f32.mrf.mxu2  ;;  %v889_v16 = vpop.f32.mrf.mxu3 }
 0x1ec   :  { %v949_v19 = vsel %vm946_vm9, %v930_v13, %v931_v14 }
 0x1ed   :  { %v951_v21 = vsel %vm950_vm10, %v945_v18, %v949_v19 }
 0x1ee   :  { %v952_v22 = vsel %vm762_vm1, %v941_v20, %v951_v21 }
 0x1ef   :  { %954 = vst [vmem:[%s1789_s11] sm:$0xff] %v952_v22 }
 0x1f0   :  { %1458 = dma.done.wait [#allocation3], 32  }
 0x1f1   :  { %1459 = vsyncadd [#allocation3], 4294967264 }
 0x1f2   :  { %1460 = dma.done.wait [#allocation5], 64  }
 0x1f3   :  { %1461 = vsyncadd [#allocation5], 4294967232 }
 0x1f4   :  { %1462 = dma.done.wait [#allocation8], 32  }
 0x1f5   :  { %1463 = vsyncadd [#allocation8], 4294967264 }
 0x1f6   :  { %1019 = vsyncpa [#allocation3], 1 }
 0x1f7   :  { %1020 = vsyncpa [#allocation5], 1 }
 0x1f8   :  { %1021 = vsyncpa [#allocation8], 1 }

// kernel: shape_vae_forward.13
= control target key start
LH: loop header
LB: loop body
LE: loop exit
PB: predicated region body
PF: predicated region fallthrough
CT: control target
= control target key end

     0   :  { %s537_s1 = inlined_call_operand.vmem [shape: bf16[256,128], index: 1, kind: input, shape index: {}]   ;;  %s538_s2 = inlined_call_operand.vmem [shape: f32[1,128], index: 2, kind: input, shape index: {}]   ;;  %s539_s0 = inlined_call_operand.vmem [shape: bf16[50,256], index: 0, kind: input, shape index: {}]   ;;  %s540_s3 = inlined_call_operand.vmem [shape: bf16[50,128], index: 3, kind: output, shape index: {}]  }
   0x1   :  { %v372_v0 = vld [vmem:[%s537_s1 + $0x38] sm:$0xff]  ;;  %v371_v2 = vld [vmem:[%s537_s1 + $0x30] sm:$0xff]  ;;  %v370_v4 = vld [vmem:[%s537_s1 + $0x28] sm:$0xff] }
   0x2   :  { %v380_v1 = vld [vmem:[%s537_s1 + $0x78] sm:$0xff]  ;;  %190 = vmatpush.bf16.msra.mxu0 %v372_v0  ;;  %398 = vmatpush.bf16.msra.mxu2 %v372_v0  ;;  %v379_v3 = vld [vmem:[%s537_s1 + $0x70] sm:$0xff]  ;;  %v378_v5 = vld [vmem:[%s537_s1 + $0x68] sm:$0xff] }
   0x3   :  { %218 = vmatpush.bf16.msra.mxu1 %v380_v1  ;;  %406 = vmatpush.bf16.msra.mxu3 %v380_v1  ;;  %v369_v6 = vld [vmem:[%s537_s1 + $0x20] sm:$0xff]  ;;  %v368_v8 = vld [vmem:[%s537_s1 + $0x18] sm:$0xff]  ;;  %v367_v10 = vld [vmem:[%s537_s1 + $0x10] sm:$0xff] }
   0x4   :  { %v377_v7 = vld [vmem:[%s537_s1 + $0x60] sm:$0xff]  ;;  %v376_v9 = vld [vmem:[%s537_s1 + $0x58] sm:$0xff]  ;;  %v375_v11 = vld [vmem:[%s537_s1 + $0x50] sm:$0xff] }
   0x5   :  { %v366_v12 = vld [vmem:[%s537_s1 + $0x8] sm:$0xff]  ;;  %v365_v14 = vld [vmem:[%s537_s1] sm:$0xff]  ;;  %v20_v28 = vld [vmem:[%s539_s0 + $0x30] sm:$0x11] }
   0x6   :  { %191 = vmatpush.bf16.msra.mxu0 %v371_v2  ;;  %399 = vmatpush.bf16.msra.mxu2 %v371_v2  ;;  %v374_v13 = vld [vmem:[%s537_s1 + $0x48] sm:$0xff]  ;;  %v373_v15 = vld [vmem:[%s537_s1 + $0x40] sm:$0xff]  ;;  %v76_v29 = vunpack.c.l.b16 %v20_v28  ;;  %v281_v30 = vld [vmem:[%s539_s0 + $0x10] sm:$0xf]  ;;  %v77_v32 = vunpack.c.h.b16 %v20_v28 }
   0x7   :  { %219 = vmatpush.bf16.msra.mxu1 %v379_v3  ;;  %407 = vmatpush.bf16.msra.mxu3 %v379_v3  ;;  %v273_v16 = vld [vmem:[%s539_s0] sm:$0xf]  ;;  %v360_v17 = vld [vmem:[%s539_s0 + $0x4] sm:$0xf0]  ;;  %v359_v20 = vld [vmem:[%s539_s0 + $0x4] sm:$0xf] }
   0x8   :  { %v289_v18 = vld [vmem:[%s539_s0 + $0x20] sm:$0xf]  ;;  %v364_v19 = vld [vmem:[%s539_s0 + $0x24] sm:$0xf0]  ;;  %v275_v21 = vld [vmem:[%s539_s0 + $0x8] sm:$0xf0]  ;;  %v274_v24 = vor.u32 %v360_v17, %v273_v16  ;;  %v84_v36 = vpack.c.b16 %v76_v29, %v76_v29  ;;  %v85_v38 = vpack.c.b16 %v77_v32, %v77_v32 }
   0x9   :  { %v363_v22 = vld [vmem:[%s539_s0 + $0x24] sm:$0xf]  ;;  %v291_v23 = vld [vmem:[%s539_s0 + $0x28] sm:$0xf0]  ;;  %v290_v25 = vor.u32 %v364_v19, %v289_v18  ;;  %v278_v26 = vor.u32 %v359_v20, %v275_v21  ;;  %v362_v31 = vld [vmem:[%s539_s0 + $0x14] sm:$0xf0] }
   0xa   :  { %192 = vmatpush.bf16.msra.mxu0 %v370_v4  ;;  %400 = vmatpush.bf16.msra.mxu2 %v370_v4  ;;  %v294_v27 = vor.u32 %v363_v22, %v291_v23  ;;  %v361_v33 = vld [vmem:[%s539_s0 + $0x14] sm:$0xf]  ;;  %v283_v34 = vld [vmem:[%s539_s0 + $0x18] sm:$0xf0]  ;;  %v282_v35 = vor.u32 %v362_v31, %v281_v30  ;;  %v414_v40 = vld [vmem:[%s538_s2] ss:$0 sm:$0xff] }
   0xb   :  { %220 = vmatpush.bf16.msra.mxu1 %v378_v5  ;;  %408 = vmatpush.bf16.msra.mxu3 %v378_v5  ;;  %v286_v37 = vor.u32 %v361_v33, %v283_v34 }
   0xe   :  { %193 = vmatpush.bf16.msra.mxu0 %v369_v6  ;;  %401 = vmatpush.bf16.msra.mxu2 %v369_v6 }
   0xf   :  { %221 = vmatpush.bf16.msra.mxu1 %v377_v7  ;;  %409 = vmatpush.bf16.msra.mxu3 %v377_v7 }
  0x12   :  { %194 = vmatpush.bf16.msra.mxu0 %v368_v8  ;;  %402 = vmatpush.bf16.msra.mxu2 %v368_v8 }
  0x13   :  { %222 = vmatpush.bf16.msra.mxu1 %v376_v9  ;;  %410 = vmatpush.bf16.msra.mxu3 %v376_v9 }
  0x16   :  { %195 = vmatpush.bf16.msra.mxu0 %v367_v10  ;;  %403 = vmatpush.bf16.msra.mxu2 %v367_v10 }
  0x17   :  { %223 = vmatpush.bf16.msra.mxu1 %v375_v11  ;;  %411 = vmatpush.bf16.msra.mxu3 %v375_v11 }
  0x1a   :  { %196 = vmatpush.bf16.msra.mxu0 %v366_v12  ;;  %404 = vmatpush.bf16.msra.mxu2 %v366_v12 }
  0x1b   :  { %224 = vmatpush.bf16.msra.mxu1 %v374_v13  ;;  %412 = vmatpush.bf16.msra.mxu3 %v374_v13 }
  0x1e   :  { %197 = vmatpush.bf16.msra.mxu0 %v365_v14  ;;  %405 = vmatpush.bf16.msra.mxu2 %v365_v14 }
  0x1f   :  { %225 = vmatpush.bf16.msra.mxu1 %v373_v15  ;;  %413 = vmatpush.bf16.msra.mxu3 %v373_v15 }
  0x21   :  { %198 = vmatmul.bf16.vlgmr.msra.gmra.mxu0 %v274_v24  ;;  %208 = vmatmul.bf16.vlgmr.msra.gmra.mxu2 %v290_v25 }
  0x22   :  { %226 = vmatmul.bf16.vlgmr.msra.gmra.mxu1 %v278_v26  ;;  %236 = vmatmul.bf16.vlgmr.msra.gmra.mxu3 %v294_v27 }
  0x31   :  { %203 = vmatmul.bf16.gmra.mxu0 %v282_v35  ;;  %213 = vmatmul.bf16.gmra.mxu2 %v84_v36 }
  0x32   :  { %231 = vmatmul.bf16.gmra.mxu1 %v286_v37  ;;  %241 = vmatmul.bf16.gmra.mxu3 %v85_v38 }
  0x9e   :  { %v199_v39 = vpop.f32.mrf.mxu0 }
  0x9f   :  { %v227_v41 = vpop.f32.mrf.mxu1  ;;  %v200_v42 = vadd.f32 %v414_v40, %v199_v39 }
  0xa1   :  { %v228_v46 = vadd.f32 %v227_v41, %v200_v42 }
  0xa3   :  { %v246_v51 = vmax.f32 %v228_v46, 0.0 }
  0xa4   :  { %v209_v43 = vpop.f32.mrf.mxu2 }
  0xa5   :  { %v237_v44 = vpop.f32.mrf.mxu3  ;;  %v210_v49 = vadd.f32 %v414_v40, %v209_v43 }
  0xa6   :  { %v201_v45 = vpop.f32.mrf.mxu0 }
  0xa7   :  { %v202_v47 = vadd.f32 %v414_v40, %v201_v45  ;;  %v229_v48 = vpop.f32.mrf.mxu1  ;;  %v238_v54 = vadd.f32 %v237_v44, %v210_v49 }
  0xa9   :  { %v230_v50 = vadd.f32 %v229_v48, %v202_v47  ;;  %v250_v61 = vmax.f32 %v238_v54, 0.0 }
  0xab   :  { %v247_v52 = vmax.f32 %v230_v50, 0.0 }
  0xac   :  { %v211_v53 = vpop.f32.mrf.mxu2 }
  0xad   :  { %v384_v55 = vpack.c.bf16 %v247_v52, %v246_v51  ;;  %v212_v56 = vadd.f32 %v414_v40, %v211_v53  ;;  %v239_v57 = vpop.f32.mrf.mxu3 }
  0xae   :  { %v204_v58 = vpop.f32.mrf.mxu0 }
  0xaf   :  { %385 = vst [vmem:[%s540_s3] sm:$0xff] %v384_v55   ;;  %v240_v59 = vadd.f32 %v239_v57, %v212_v56  ;;  %v232_v60 = vpop.f32.mrf.mxu1  ;;  %v205_v0 = vadd.f32 %v414_v40, %v204_v58 }
  0xb1   :  { %v251_v62 = vmax.f32 %v240_v59, 0.0  ;;  %v233_v5 = vadd.f32 %v232_v60, %v205_v0 }
  0xb3   :  { %v394_v63 = vpack.c.bf16 %v251_v62, %v250_v61  ;;  %v248_v11 = vmax.f32 %v233_v5, 0.0 }
  0xb4   :  { %v214_v1 = vpop.f32.mrf.mxu2 }
  0xb5   :  { %397 = vst [vmem:[%s540_s3 + $0x10] sm:$0xff] %v394_v63   ;;  %v215_v2 = vadd.f32 %v414_v40, %v214_v1  ;;  %v242_v3 = vpop.f32.mrf.mxu3 }
  0xb6   :  { %v206_v4 = vpop.f32.mrf.mxu0 }
  0xb7   :  { %v243_v6 = vadd.f32 %v242_v3, %v215_v2  ;;  %v207_v7 = vadd.f32 %v414_v40, %v206_v4  ;;  %v234_v8 = vpop.f32.mrf.mxu1 }
  0xb9   :  { %v252_v9 = vmax.f32 %v243_v6, 0.0  ;;  %v235_v10 = vadd.f32 %v234_v8, %v207_v7 }
  0xbb   :  { %v259_v12 = vpack.c.bf16 %v252_v9, %v252_v9  ;;  %v249_v13 = vmax.f32 %v235_v10, 0.0 }
  0xbc   :  { %v216_v14 = vpop.f32.mrf.mxu2 }
  0xbd   :  { %266 = vst [vmem:[%s540_s3 + $0x18] sm:$0x1] %v259_v12  ;;  %v389_v15 = vpack.c.bf16 %v249_v13, %v248_v11  ;;  %v244_v16 = vpop.f32.mrf.mxu3 }
  0xbf   :  { %396 = vst [vmem:[%s540_s3 + $0x8] sm:$0xff] %v389_v15  }

// kernel: shape_vae_forward.14
= control target key start
LH: loop header
LB: loop body
LE: loop exit
PB: predicated region body
PF: predicated region fallthrough
CT: control target
= control target key end

     0   :  { %vm272_vm0 = vcmask 519168   ;;  %vm293_vm1 = vcmask 516096   ;;  %s600_s1 = inlined_call_operand.vmem [shape: bf16[128,64], index: 1, kind: input, shape index: {}]   ;;  %s601_s2 = inlined_call_operand.vmem [shape: f32[1,64], index: 2, kind: input, shape index: {}]   ;;  %s602_s0 = inlined_call_operand.vmem [shape: bf16[162,128], index: 0, kind: input, shape index: {}]   ;;  %s603_s3 = inlined_call_operand.vmem [shape: bf16[162,64], index: 3, kind: output, shape index: {}]  }
   0x1   :  { %v388_v0 = vld [vmem:[%s600_s1 + $0x38] sm:$0xff]  ;;  %v387_v1 = vld [vmem:[%s600_s1 + $0x30] sm:$0xff]  ;;  %v386_v2 = vld [vmem:[%s600_s1 + $0x28] sm:$0xff] }
   0x2   :  { %389 = vmatpush.bf16.msra.mxu1 %v388_v0  ;;  %390 = vmatpush.bf16.msra.mxu2 %v388_v0  ;;  %v385_v3 = vld [vmem:[%s600_s1 + $0x20] sm:$0xff]  ;;  %v384_v4 = vld [vmem:[%s600_s1 + $0x18] sm:$0xff]  ;;  %v383_v5 = vld [vmem:[%s600_s1 + $0x10] sm:$0xff] }
   0x3   :  { %391 = vmatpush.bf16.msra.mxu3 %v388_v0  ;;  %167 = vmatpush.bf16.msra.mxu0 %v388_v0  ;;  %v382_v6 = vld [vmem:[%s600_s1 + $0x8] sm:$0xff]  ;;  %v381_v7 = vld [vmem:[%s600_s1] sm:$0xff]  ;;  %v373_v8 = vld [vmem:[%s602_s0 + $0x10] sm:$0xff] }
   0x4   :  { %v376_v9 = vld [vmem:[%s602_s0 + $0x28] sm:$0xff]  ;;  %v379_v10 = vld [vmem:[%s602_s0 + $0x40] sm:$0xff]  ;;  %v374_v12 = vld [vmem:[%s602_s0 + $0x18] sm:$0xff] }
   0x5   :  { %v371_v11 = vld [vmem:[%s602_s0] sm:$0xff]  ;;  %v377_v13 = vld [vmem:[%s602_s0 + $0x30] sm:$0xff]  ;;  %v380_v14 = vld [vmem:[%s602_s0 + $0x48] sm:$0xff] }
   0x6   :  { %392 = vmatpush.bf16.msra.mxu1 %v387_v1  ;;  %393 = vmatpush.bf16.msra.mxu2 %v387_v1  ;;  %v372_v15 = vld [vmem:[%s602_s0 + $0x8] sm:$0xff]  ;;  %v34_v16 = vld [vmem:[%s602_s0 + $0x50] sm:$0x1]  ;;  %v375_v18 = vld [vmem:[%s602_s0 + $0x20] sm:$0xff] }
   0x7   :  { %394 = vmatpush.bf16.msra.mxu3 %v387_v1  ;;  %168 = vmatpush.bf16.msra.mxu0 %v387_v1  ;;  %v96_v17 = vunpack.c.l.b16 %v34_v16  ;;  %v378_v19 = vld [vmem:[%s602_s0 + $0x38] sm:$0xff]  ;;  %v494_v21 = vld [vmem:[%s601_s2] ss:$0 sm:$0xff] }
   0x9   :  { %v107_v20 = vpack.c.b16 %v96_v17, %v96_v17 }
   0xa   :  { %395 = vmatpush.bf16.msra.mxu1 %v386_v2  ;;  %396 = vmatpush.bf16.msra.mxu2 %v386_v2 }
   0xb   :  { %397 = vmatpush.bf16.msra.mxu3 %v386_v2  ;;  %169 = vmatpush.bf16.msra.mxu0 %v386_v2 }
   0xe   :  { %398 = vmatpush.bf16.msra.mxu1 %v385_v3  ;;  %399 = vmatpush.bf16.msra.mxu2 %v385_v3 }
   0xf   :  { %400 = vmatpush.bf16.msra.mxu3 %v385_v3  ;;  %170 = vmatpush.bf16.msra.mxu0 %v385_v3 }
  0x12   :  { %401 = vmatpush.bf16.msra.mxu1 %v384_v4  ;;  %402 = vmatpush.bf16.msra.mxu2 %v384_v4 }
  0x13   :  { %403 = vmatpush.bf16.msra.mxu3 %v384_v4  ;;  %171 = vmatpush.bf16.msra.mxu0 %v384_v4 }
  0x16   :  { %404 = vmatpush.bf16.msra.mxu1 %v383_v5  ;;  %405 = vmatpush.bf16.msra.mxu2 %v383_v5 }
  0x17   :  { %406 = vmatpush.bf16.msra.mxu3 %v383_v5  ;;  %172 = vmatpush.bf16.msra.mxu0 %v383_v5 }
  0x1a   :  { %407 = vmatpush.bf16.msra.mxu1 %v382_v6  ;;  %408 = vmatpush.bf16.msra.mxu2 %v382_v6 }
  0x1b   :  { %409 = vmatpush.bf16.msra.mxu3 %v382_v6  ;;  %173 = vmatpush.bf16.msra.mxu0 %v382_v6 }
  0x1e   :  { %410 = vmatpush.bf16.msra.mxu1 %v381_v7  ;;  %411 = vmatpush.bf16.msra.mxu2 %v381_v7 }
  0x1f   :  { %412 = vmatpush.bf16.msra.mxu3 %v381_v7  ;;  %174 = vmatpush.bf16.msra.mxu0 %v381_v7 }
  0x21   :  { %185 = vmatmul.bf16.vlgmr.msra.gmra.mxu1 %v373_v8  ;;  %200 = vmatmul.bf16.vlgmr.msra.gmra.mxu2 %v376_v9 }
  0x22   :  { %215 = vmatmul.bf16.vlgmr.msra.gmra.mxu3 %v379_v10  ;;  %175 = vmatmul.bf16.vlgmr.msra.gmra.mxu0 %v371_v11 }
  0x31   :  { %190 = vmatmul.bf16.gmra.mxu1 %v374_v12  ;;  %205 = vmatmul.bf16.gmra.mxu2 %v377_v13 }
  0x32   :  { %220 = vmatmul.bf16.gmra.mxu3 %v380_v14  ;;  %180 = vmatmul.bf16.gmra.mxu0 %v372_v15 }
  0x41   :  { %195 = vmatmul.bf16.gmra.mxu1 %v375_v18  ;;  %210 = vmatmul.bf16.gmra.mxu2 %v378_v19 }
  0x42   :  { %225 = vmatmul.bf16.gmra.mxu3 %v107_v20 }
  0x9e   :  { %v186_v22 = vpop.f32.mrf.mxu1 }
  0x9f   :  { %v187_v23 = vadd.f32 %v494_v21, %v186_v22  ;;  %v176_v24 = vpop.f32.mrf.mxu0 }
  0xa0   :  { %v177_v25 = vadd.f32 %v494_v21, %v176_v24 }
  0xa1   :  { %v234_v26 = vmax.f32 %v187_v23, 0.0 }
  0xa2   :  { %v230_v27 = vmax.f32 %v177_v25, 0.0 }
  0xa3   :  { %v255_v28 = vpack.c.bf16 %v234_v26, %v234_v26 }
  0xa4   :  { %v201_v29 = vpop.f32.mrf.mxu2  ;;  %v251_v30 = vpack.c.bf16 %v230_v27, %v230_v27 }
  0xa5   :  { %277 = vst.msk [vmem:[%s603_s3 + $0x10] sm:$0xf] %vm272_vm0, %v255_v28  ;;  %v202_v31 = vadd.f32 %v494_v21, %v201_v29  ;;  %v216_v32 = vpop.f32.mrf.mxu3 }
  0xa6   :  { %v217_v33 = vadd.f32 %v494_v21, %v216_v32  ;;  %v188_v34 = vpop.f32.mrf.mxu1  ;;  %273 = vst.msk [vmem:[%s603_s3] sm:$0xf] %vm272_vm0, %v251_v30 }
  0xa7   :  { %v240_v35 = vmax.f32 %v202_v31, 0.0  ;;  %v189_v36 = vadd.f32 %v494_v21, %v188_v34  ;;  %v178_v37 = vpop.f32.mrf.mxu0 }
  0xa8   :  { %v246_v38 = vmax.f32 %v217_v33, 0.0  ;;  %v179_v39 = vadd.f32 %v494_v21, %v178_v37 }
  0xa9   :  { %v261_v40 = vpack.c.bf16 %v240_v35, %v240_v35  ;;  %v235_v41 = vmax.f32 %v189_v36, 0.0 }
  0xaa   :  { %v267_v42 = vpack.c.bf16 %v246_v38, %v246_v38  ;;  %v231_v43 = vmax.f32 %v179_v39, 0.0 }
  0xab   :  { %283 = vst.msk [vmem:[%s603_s3 + $0x28] sm:$0xf] %vm272_vm0, %v261_v40  ;;  %v256_v44 = vpack.c.bf16 %v235_v41, %v235_v41 }
  0xac   :  { %289 = vst.msk [vmem:[%s603_s3 + $0x40] sm:$0xf] %vm272_vm0, %v267_v42  ;;  %v203_v45 = vpop.f32.mrf.mxu2  ;;  %v252_v46 = vpack.c.bf16 %v231_v43, %v231_v43 }
  0xad   :  { %278 = vst.msk [vmem:[%s603_s3 + $0x14] sm:$0xf] %vm272_vm0, %v256_v44  ;;  %v204_v47 = vadd.f32 %v494_v21, %v203_v45  ;;  %v218_v48 = vpop.f32.mrf.mxu3 }
  0xae   :  { %v219_v49 = vadd.f32 %v494_v21, %v218_v48  ;;  %v191_v50 = vpop.f32.mrf.mxu1  ;;  %274 = vst.msk [vmem:[%s603_s3 + $0x4] sm:$0xf] %vm272_vm0, %v252_v46 }
  0xaf   :  { %v241_v51 = vmax.f32 %v204_v47, 0.0  ;;  %v192_v52 = vadd.f32 %v494_v21, %v191_v50  ;;  %v181_v53 = vpop.f32.mrf.mxu0 }
  0xb0   :  { %v247_v54 = vmax.f32 %v219_v49, 0.0  ;;  %v182_v55 = vadd.f32 %v494_v21, %v181_v53 }
  0xb1   :  { %v262_v56 = vpack.c.bf16 %v241_v51, %v241_v51  ;;  %v236_v57 = vmax.f32 %v192_v52, 0.0 }
  0xb2   :  { %v268_v58 = vpack.c.bf16 %v247_v54, %v247_v54  ;;  %v232_v59 = vmax.f32 %v182_v55, 0.0 }
  0xb3   :  { %284 = vst.msk [vmem:[%s603_s3 + $0x2c] sm:$0xf] %vm272_vm0, %v262_v56  ;;  %v257_v60 = vpack.c.bf16 %v236_v57, %v236_v57 }
  0xb4   :  { %290 = vst.msk [vmem:[%s603_s3 + $0x44] sm:$0xf] %vm272_vm0, %v268_v58  ;;  %v206_v61 = vpop.f32.mrf.mxu2  ;;  %v253_v62 = vpack.c.bf16 %v232_v59, %v232_v59 }
  0xb5   :  { %279 = vst.msk [vmem:[%s603_s3 + $0x18] sm:$0xf] %vm272_vm0, %v257_v60  ;;  %v207_v63 = vadd.f32 %v494_v21, %v206_v61  ;;  %v221_v0 = vpop.f32.mrf.mxu3 }
  0xb6   :  { %v222_v1 = vadd.f32 %v494_v21, %v221_v0  ;;  %v193_v2 = vpop.f32.mrf.mxu1  ;;  %275 = vst.msk [vmem:[%s603_s3 + $0x8] sm:$0xf] %vm272_vm0, %v253_v62 }
  0xb7   :  { %v242_v3 = vmax.f32 %v207_v63, 0.0  ;;  %v194_v4 = vadd.f32 %v494_v21, %v193_v2  ;;  %v183_v5 = vpop.f32.mrf.mxu0 }
  0xb8   :  { %v248_v6 = vmax.f32 %v222_v1, 0.0  ;;  %v184_v7 = vadd.f32 %v494_v21, %v183_v5 }
  0xb9   :  { %v263_v8 = vpack.c.bf16 %v242_v3, %v242_v3  ;;  %v237_v9 = vmax.f32 %v194_v4, 0.0 }
  0xba   :  { %v269_v10 = vpack.c.bf16 %v248_v6, %v248_v6  ;;  %v233_v11 = vmax.f32 %v184_v7, 0.0 }
  0xbb   :  { %285 = vst.msk [vmem:[%s603_s3 + $0x30] sm:$0xf] %vm272_vm0, %v263_v8  ;;  %v258_v12 = vpack.c.bf16 %v237_v9, %v237_v9 }
  0xbc   :  { %291 = vst.msk [vmem:[%s603_s3 + $0x48] sm:$0xf] %vm272_vm0, %v269_v10  ;;  %v208_v13 = vpop.f32.mrf.mxu2  ;;  %v254_v14 = vpack.c.bf16 %v233_v11, %v233_v11 }
  0xbd   :  { %280 = vst.msk [vmem:[%s603_s3 + $0x1c] sm:$0xf] %vm272_vm0, %v258_v12  ;;  %v209_v15 = vadd.f32 %v494_v21, %v208_v13  ;;  %v223_v16 = vpop.f32.mrf.mxu3 }
  0xbe   :  { %v224_v17 = vadd.f32 %v494_v21, %v223_v16  ;;  %v196_v18 = vpop.f32.mrf.mxu1  ;;  %276 = vst.msk [vmem:[%s603_s3 + $0xc] sm:$0xf] %vm272_vm0, %v254_v14 }
  0xbf   :  { %v243_v19 = vmax.f32 %v209_v15, 0.0  ;;  %v197_v20 = vadd.f32 %v494_v21, %v196_v18 }
  0xc0   :  { %v249_v22 = vmax.f32 %v224_v17, 0.0 }
  0xc1   :  { %v264_v23 = vpack.c.bf16 %v243_v19, %v243_v19  ;;  %v238_v24 = vmax.f32 %v197_v20, 0.0 }
  0xc2   :  { %v270_v25 = vpack.c.bf16 %v249_v22, %v249_v22 }
  0xc3   :  { %286 = vst.msk [vmem:[%s603_s3 + $0x34] sm:$0xf] %vm272_vm0, %v264_v23  ;;  %v259_v26 = vpack.c.bf16 %v238_v24, %v238_v24 }
  0xc4   :  { %292 = vst.msk [vmem:[%s603_s3 + $0x4c] sm:$0xf] %vm272_vm0, %v270_v25  ;;  %v211_v27 = vpop.f32.mrf.mxu2 }
  0xc5   :  { %281 = vst.msk [vmem:[%s603_s3 + $0x20] sm:$0xf] %vm272_vm0, %v259_v26  ;;  %v212_v28 = vadd.f32 %v494_v21, %v211_v27  ;;  %v226_v29 = vpop.f32.mrf.mxu3 }
  0xc6   :  { %v227_v30 = vadd.f32 %v494_v21, %v226_v29  ;;  %v198_v31 = vpop.f32.mrf.mxu1 }
  0xc7   :  { %v244_v32 = vmax.f32 %v212_v28, 0.0  ;;  %v199_v33 = vadd.f32 %v494_v21, %v198_v31 }
  0xc8   :  { %v250_v34 = vmax.f32 %v227_v30, 0.0 }
  0xc9   :  { %v265_v35 = vpack.c.bf16 %v244_v32, %v244_v32  ;;  %v239_v36 = vmax.f32 %v199_v33, 0.0 }
  0xca   :  { %v271_v37 = vpack.c.bf16 %v250_v34, %v250_v34 }
  0xcb   :  { %287 = vst.msk [vmem:[%s603_s3 + $0x38] sm:$0xf] %vm272_vm0, %v265_v35  ;;  %v260_v38 = vpack.c.bf16 %v239_v36, %v239_v36 }
  0xcc   :  { %294 = vst.msk [vmem:[%s603_s3 + $0x50] sm:$0x1] %vm293_vm1, %v271_v37  ;;  %v213_v39 = vpop.f32.mrf.mxu2 }
  0xcd   :  { %282 = vst.msk [vmem:[%s603_s3 + $0x24] sm:$0xf] %vm272_vm0, %v260_v38  ;;  %v214_v40 = vadd.f32 %v494_v21, %v213_v39  ;;  %v228_v41 = vpop.f32.mrf.mxu3 }
  0xcf   :  { %v245_v42 = vmax.f32 %v214_v40, 0.0 }
  0xd1   :  { %v266_v43 = vpack.c.bf16 %v245_v42, %v245_v42 }
  0xd3   :  { %288 = vst.msk [vmem:[%s603_s3 + $0x3c] sm:$0xf] %vm272_vm0, %v266_v43 }

// kernel: shape_vae_forward.15
= control target key start
LH: loop header
LB: loop body
LE: loop exit
PB: predicated region body
PF: predicated region fallthrough
CT: control target
= control target key end

     0   :  { %s1585_s18 = smov 0   ;;  %s1587_s19 = smov 0   ;;  %s2002_s0 = inlined_call_operand.vmem [shape: bf16[578,64], index: 0, kind: input, shape index: {}]   ;;  %s2003_s1 = inlined_call_operand.vmem [shape: bf16[64,32], index: 1, kind: input, shape index: {}]   ;;  %s2004_s2 = inlined_call_operand.vmem [shape: f32[1,32], index: 2, kind: input, shape index: {}]   ;;  %s2005_s3 = inlined_call_operand.vmem [shape: bf16[32,16], index: 3, kind: input, shape index: {}]   ;;  %s2006_s4 = inlined_call_operand.vmem [shape: f32[1,16], index: 4, kind: input, shape index: {}]   ;;  %s2007_s5 = inlined_call_operand.vmem [shape: f32[578,16], index: 5, kind: output, shape index: {}]  }
   0x1   :  { %s1589_s20 = smov 0  }
   0x2 LB: > { %s1598_s21 = sadd.s32 4294967295, %s1521_s20   ;;  %s1600_s22 = sadd.s32 1, %s1521_s20   ;;  %s1521_s20 = sphi %s1589_s20, %s2016_s20   ;;  %s1517_s19 = sphi %s1587_s19, %s2015_s19   ;;  %s1513_s18 = sphi %s1585_s18, %s2014_s18  }
   0x3   : > { %s129_s23 = ssub.s32 %s1521_s20, %s1600_s22  ;;  %s132_s24 = sadd.s32 1, %s1517_s19 }
   0x4   : > { %p130_p0 = scmp.eq.s32.totalorder %s129_s23, 0  ;;  %p142_p1 = scmp.ne.s32.totalorder %s1517_s19, %s1513_s18 }
   0x5   : > { %p143_p2 = scmp.eq.s32.totalorder %s1598_s21, 1  ;;  %p1192_p3 = scmp.ge.s32.totalorder %s1521_s20, 1 }
   0x6   : > { %s1608_s25 = scalar_select %p130_p0, %s1517_s19, %s132_s24  }
   0x7   : > { %p1610_p4 = por %p143_p2, %p142_p1  ;;  %p196_p5 = scmp.lt.s32.totalorder %s1521_s20, 3 }
   0x9   : > { %p197_p6 = pnand %p1192_p3, %p196_p5 }
   0xa   : > { %s1618_s29 = smul.u32 (!%p197_p6), 37, %s1598_s21  ;;  %s224_s28 = sand.u32 (!%p197_p6), 1, %s1513_s18  }
   0xb   : > { %200 = sbr.rel (%p197_p6) target bundleno = 517 (0x205), region = 40 }
   0xc   : > { %p232_p7 = scmp.lt.s32.totalorder (!%p197_p6), %s1618_s29, 72  ;;  %s1376_s30 = smul.u32 (!%p197_p6), 296, %s224_s28 }
   0xe   : > { %s1743_s18 = scalar_lea.vmem (!%p197_p6), [#allocation2], %s1376_s30  }
  0x10   : > { %v1364_v0 = vld [vmem:[%s2003_s1 + $0x18] sm:$0xff]  ;;  %v1363_v1 = vld [vmem:[%s2003_s1 + $0x10] sm:$0xff]  ;;  %s233_s7 = scalar_select %p232_p7, %s1618_s29, 72  ;;  %v1362_v2 = vld [vmem:[%s2003_s1 + $0x8] sm:$0xff]  ;;  %vm413_vm0 = vcmask 523264   ;;  %vm650_vm1 = vcmask 261120  }
  0x11   : > { %475 = vmatpush.bf16.msra.mxu0 %v1364_v0  ;;  %1370 = vmatpush.bf16.msra.mxu2 %v1364_v0  ;;  %v1361_v3 = vld [vmem:[%s2003_s1] sm:$0xff]  ;;  %v1366_v18 = vld [vmem:[%s2005_s3 + $0x8] sm:$0xff]  ;;  %vm811_vm2 = vcmask 130048   ;;  %s857_s8 = ssub.s32 (%p1610_p4), 73, %s1618_s29  ;;  %s1367_s9 = smul.u32 (%p1610_p4), 296, %s1598_s21 }
  0x12   : > { %s1193_s10 = sshll.u32 %s233_s7, 2  ;;  %714 = vmatpush.bf16.msra.mxu1 %v1366_v18  ;;  %1374 = vmatpush.bf16.msra.mxu3 %v1366_v18  ;;  %v1365_v19 = vld [vmem:[%s2005_s3] sm:$0xff]  ;;  %p858_p8 = scmp.lt.s32.totalorder (%p1610_p4), %s857_s8, 37 }
  0x13   : > { %s1634_s15 = scalar_lea.vmem %s2002_s0, %s1193_s10  ;;  %v1679_v27 = vld [vmem:[%s2004_s2] ss:$0 sm:$0xff]  ;;  %s1867_s12 = scalar_lea.vmem (%p1610_p4), %s2007_s5, %s1367_s9  }
  0x14   : > { %v1343_v4 = vld [vmem:[%s1634_s15] sm:$0xff]  ;;  %v1353_v5 = vld [vmem:[%s1634_s15 + $0x50] sm:$0xff]  ;;  %v1344_v6 = vld [vmem:[%s1634_s15 + $0x8] sm:$0xff] }
  0x15   : > { %476 = vmatpush.bf16.msra.mxu0 %v1363_v1  ;;  %1371 = vmatpush.bf16.msra.mxu2 %v1363_v1  ;;  %v1354_v7 = vld [vmem:[%s1634_s15 + $0x58] sm:$0xff]  ;;  %v1345_v8 = vld [vmem:[%s1634_s15 + $0x10] sm:$0xff]  ;;  %v1355_v9 = vld [vmem:[%s1634_s15 + $0x60] sm:$0xff] }
  0x16   : > { %v1346_v10 = vld [vmem:[%s1634_s15 + $0x18] sm:$0xff]  ;;  %v1356_v11 = vld [vmem:[%s1634_s15 + $0x68] sm:$0xff]  ;;  %v1347_v12 = vld [vmem:[%s1634_s15 + $0x20] sm:$0xff]  ;;  %715 = vmatpush.bf16.msra.mxu1 %v1365_v19  ;;  %1375 = vmatpush.bf16.msra.mxu3 %v1365_v19 }
  0x17   : > { %v1357_v13 = vld [vmem:[%s1634_s15 + $0x70] sm:$0xff]  ;;  %v1348_v14 = vld [vmem:[%s1634_s15 + $0x28] sm:$0xff]  ;;  %v1358_v15 = vld [vmem:[%s1634_s15 + $0x78] sm:$0xff] }
  0x18   : > { %v1349_v16 = vld [vmem:[%s1634_s15 + $0x30] sm:$0xff]  ;;  %v1359_v17 = vld [vmem:[%s1634_s15 + $0x80] sm:$0xff]  ;;  %v1350_v20 = vld [vmem:[%s1634_s15 + $0x38] sm:$0xff] }
  0x19   : > { %477 = vmatpush.bf16.msra.mxu0 %v1362_v2  ;;  %1372 = vmatpush.bf16.msra.mxu2 %v1362_v2  ;;  %v1360_v21 = vld [vmem:[%s1634_s15 + $0x88] sm:$0xff]  ;;  %v283_v22 = vld [vmem:[%s1634_s15 + $0x90] sm:$0xf]  ;;  %v1351_v24 = vld [vmem:[%s1634_s15 + $0x40] sm:$0xff] }
  0x1a   : > { %v369_v23 = vunpack.c.l.b16 %v283_v22  ;;  %v1352_v39 = vld [vmem:[%s1634_s15 + $0x48] sm:$0xff] }
  0x1c   : > { %v388_v25 = vpack.c.b16 %v369_v23, %v369_v23 }
  0x1d   : > { %478 = vmatpush.bf16.msra.mxu0 %v1361_v3  ;;  %1373 = vmatpush.bf16.msra.mxu2 %v1361_v3 }
  0x20   : > { %1282 = vmatmul.msk.bf16.vlgmr.msra.gmra.mxu0 %vm413_vm0, %v1343_v4  ;;  %1292 = vmatmul.msk.bf16.vlgmr.msra.gmra.mxu2 %vm413_vm0, %v1353_v5 }
  0x30   : > { %1283 = vmatmul.msk.bf16.gmra.mxu0 %vm413_vm0, %v1344_v6  ;;  %1293 = vmatmul.msk.bf16.gmra.mxu2 %vm413_vm0, %v1354_v7 }
  0x40   : > { %1284 = vmatmul.msk.bf16.gmra.mxu0 %vm413_vm0, %v1345_v8  ;;  %1294 = vmatmul.msk.bf16.gmra.mxu2 %vm413_vm0, %v1355_v9 }
  0x50   : > { %1285 = vmatmul.msk.bf16.gmra.mxu0 %vm413_vm0, %v1346_v10  ;;  %1295 = vmatmul.msk.bf16.gmra.mxu2 %vm413_vm0, %v1356_v11 }
  0x60   : > { %1286 = vmatmul.msk.bf16.gmra.mxu0 %vm413_vm0, %v1347_v12  ;;  %1296 = vmatmul.msk.bf16.gmra.mxu2 %vm413_vm0, %v1357_v13 }
  0x70   : > { %1287 = vmatmul.msk.bf16.gmra.mxu0 %vm413_vm0, %v1348_v14  ;;  %1297 = vmatmul.msk.bf16.gmra.mxu2 %vm413_vm0, %v1358_v15 }
  0x80   : > { %1288 = vmatmul.msk.bf16.gmra.mxu0 %vm413_vm0, %v1349_v16  ;;  %1298 = vmatmul.msk.bf16.gmra.mxu2 %vm413_vm0, %v1359_v17 }
  0x90   : > { %1289 = vmatmul.msk.bf16.gmra.mxu0 %vm413_vm0, %v1350_v20  ;;  %1299 = vmatmul.msk.bf16.gmra.mxu2 %vm413_vm0, %v1360_v21 }
  0x9d   : > { %v480_v26 = vpop.f32.mrf.mxu0 }
  0x9e   : > { %v481_v29 = vadd.f32 %v1679_v27, %v480_v26 }
  0xa0   : > { %1290 = vmatmul.msk.bf16.gmra.mxu0 %vm413_vm0, %v1351_v24  ;;  %1300 = vmatmul.msk.bf16.gmra.mxu2 %vm413_vm0, %v388_v25  ;;  %v574_v32 = vmax.f32 %v481_v29, 0.0 }
  0xa3   : > { %v530_v28 = vpop.f32.mrf.mxu2 }
  0xa4   : > { %v531_v33 = vadd.f32 %v1679_v27, %v530_v28 }
  0xa5   : > { %v482_v30 = vpop.f32.mrf.mxu0 }
  0xa6   : > { %v483_v31 = vadd.f32 %v1679_v27, %v482_v30  ;;  %v594_v37 = vmax.f32 %v531_v33, 0.0 }
  0xa8   : > { %v575_v34 = vmax.f32 %v483_v31, 0.0 }
  0xaa   : > { %v611_v35 = vpack.c.bf16 %v575_v34, %v574_v32 }
  0xab   : > { %v532_v36 = vpop.f32.mrf.mxu2 }
  0xac   : > { %v533_v38 = vadd.f32 %v1679_v27, %v532_v36  ;;  %1309 = vmatmul.msk.bf16.vlgmr.msra.gmra.mxu1 %vm650_vm1, %v611_v35 }
  0xad   : > { %v485_v40 = vpop.f32.mrf.mxu0 }
  0xae   : > { %v595_v41 = vmax.f32 %v533_v38, 0.0  ;;  %v486_v44 = vadd.f32 %v1679_v27, %v485_v40 }
  0xb0   : > { %v621_v42 = vpack.c.bf16 %v595_v41, %v594_v37  ;;  %1291 = vmatmul.msk.bf16.gmra.mxu0 %vm413_vm0, %v1352_v39  ;;  %v576_v47 = vmax.f32 %v486_v44, 0.0 }
  0xb2   : > { %1319 = vmatmul.msk.bf16.vlgmr.msra.gmra.mxu3 %vm650_vm1, %v621_v42 }
  0xb3   : > { %v535_v43 = vpop.f32.mrf.mxu2 }
  0xb4   : > { %v536_v48 = vadd.f32 %v1679_v27, %v535_v43 }
  0xb5   : > { %v487_v45 = vpop.f32.mrf.mxu0 }
  0xb6   : > { %v488_v46 = vadd.f32 %v1679_v27, %v487_v45  ;;  %v596_v52 = vmax.f32 %v536_v48, 0.0 }
  0xb8   : > { %v577_v49 = vmax.f32 %v488_v46, 0.0 }
  0xba   : > { %v612_v50 = vpack.c.bf16 %v577_v49, %v576_v47 }
  0xbb   : > { %v537_v51 = vpop.f32.mrf.mxu2 }
  0xbc   : > { %v538_v53 = vadd.f32 %v1679_v27, %v537_v51  ;;  %1310 = vmatmul.msk.bf16.gmra.mxu1 %vm650_vm1, %v612_v50 }
  0xbd   : > { %v490_v54 = vpop.f32.mrf.mxu0 }
  0xbe   : > { %v597_v55 = vmax.f32 %v538_v53, 0.0  ;;  %v491_v58 = vadd.f32 %v1679_v27, %v490_v54 }
  0xc0   : > { %v622_v56 = vpack.c.bf16 %v597_v55, %v596_v52  ;;  %v578_v61 = vmax.f32 %v491_v58, 0.0 }
  0xc2   : > { %1320 = vmatmul.msk.bf16.gmra.mxu3 %vm650_vm1, %v622_v56 }
  0xc3   : > { %v540_v57 = vpop.f32.mrf.mxu2 }
  0xc4   : > { %v541_v62 = vadd.f32 %v1679_v27, %v540_v57 }
  0xc5   : > { %v492_v59 = vpop.f32.mrf.mxu0 }
  0xc6   : > { %v493_v60 = vadd.f32 %v1679_v27, %v492_v59  ;;  %v598_v2 = vmax.f32 %v541_v62, 0.0 }
  0xc8   : > { %v579_v63 = vmax.f32 %v493_v60, 0.0 }
  0xca   : > { %v613_v0 = vpack.c.bf16 %v579_v63, %v578_v61 }
  0xcb   : > { %v542_v1 = vpop.f32.mrf.mxu2 }
  0xcc   : > { %v543_v3 = vadd.f32 %v1679_v27, %v542_v1  ;;  %1311 = vmatmul.msk.bf16.gmra.mxu1 %vm650_vm1, %v613_v0 }
  0xcd   : > { %v495_v4 = vpop.f32.mrf.mxu0 }
  0xce   : > { %v599_v5 = vmax.f32 %v543_v3, 0.0  ;;  %v496_v8 = vadd.f32 %v1679_v27, %v495_v4 }
  0xd0   : > { %v623_v6 = vpack.c.bf16 %v599_v5, %v598_v2  ;;  %v580_v11 = vmax.f32 %v496_v8, 0.0 }
  0xd2   : > { %1321 = vmatmul.msk.bf16.gmra.mxu3 %vm650_vm1, %v623_v6 }
  0xd3   : > { %v545_v7 = vpop.f32.mrf.mxu2 }
  0xd4   : > { %v546_v12 = vadd.f32 %v1679_v27, %v545_v7 }
  0xd5   : > { %v497_v9 = vpop.f32.mrf.mxu0 }
  0xd6   : > { %v498_v10 = vadd.f32 %v1679_v27, %v497_v9  ;;  %v600_v16 = vmax.f32 %v546_v12, 0.0 }
  0xd8   : > { %v581_v13 = vmax.f32 %v498_v10, 0.0 }
  0xda   : > { %v614_v14 = vpack.c.bf16 %v581_v13, %v580_v11 }
  0xdb   : > { %v547_v15 = vpop.f32.mrf.mxu2 }
  0xdc   : > { %v548_v17 = vadd.f32 %v1679_v27, %v547_v15  ;;  %1312 = vmatmul.msk.bf16.gmra.mxu1 %vm650_vm1, %v614_v14 }
  0xdd   : > { %v500_v18 = vpop.f32.mrf.mxu0 }
  0xde   : > { %v601_v19 = vmax.f32 %v548_v17, 0.0  ;;  %v501_v22 = vadd.f32 %v1679_v27, %v500_v18  ;;  %v1739_v18 = vld [vmem:[%s2006_s4] ss:$0 sm:$0xff] }
  0xe0   : > { %v624_v20 = vpack.c.bf16 %v601_v19, %v600_v16  ;;  %v582_v25 = vmax.f32 %v501_v22, 0.0 }
  0xe2   : > { %1322 = vmatmul.msk.bf16.gmra.mxu3 %vm650_vm1, %v624_v20 }
  0xe3   : > { %v550_v21 = vpop.f32.mrf.mxu2 }
  0xe4   : > { %v551_v26 = vadd.f32 %v1679_v27, %v550_v21 }
  0xe5   : > { %v502_v23 = vpop.f32.mrf.mxu0 }
  0xe6   : > { %v503_v24 = vadd.f32 %v1679_v27, %v502_v23  ;;  %v602_v31 = vmax.f32 %v551_v26, 0.0 }
  0xe8   : > { %v583_v28 = vmax.f32 %v503_v24, 0.0 }
  0xea   : > { %v615_v29 = vpack.c.bf16 %v583_v28, %v582_v25 }
  0xeb   : > { %v552_v30 = vpop.f32.mrf.mxu2 }
  0xec   : > { %v553_v32 = vadd.f32 %v1679_v27, %v552_v30  ;;  %1313 = vmatmul.msk.bf16.gmra.mxu1 %vm650_vm1, %v615_v29 }
  0xed   : > { %v505_v33 = vpop.f32.mrf.mxu0 }
  0xee   : > { %v603_v34 = vmax.f32 %v553_v32, 0.0  ;;  %v506_v37 = vadd.f32 %v1679_v27, %v505_v33 }
  0xf0   : > { %v625_v35 = vpack.c.bf16 %v603_v34, %v602_v31  ;;  %v584_v40 = vmax.f32 %v506_v37, 0.0 }
  0xf2   : > { %1323 = vmatmul.msk.bf16.gmra.mxu3 %vm650_vm1, %v625_v35 }
  0xf3   : > { %v555_v36 = vpop.f32.mrf.mxu2 }
  0xf4   : > { %v556_v41 = vadd.f32 %v1679_v27, %v555_v36 }
  0xf5   : > { %v507_v38 = vpop.f32.mrf.mxu0 }
  0xf6   : > { %v508_v39 = vadd.f32 %v1679_v27, %v507_v38  ;;  %v604_v45 = vmax.f32 %v556_v41, 0.0 }
  0xf8   : > { %v585_v42 = vmax.f32 %v508_v39, 0.0 }
  0xfa   : > { %v616_v43 = vpack.c.bf16 %v585_v42, %v584_v40 }
  0xfb   : > { %v557_v44 = vpop.f32.mrf.mxu2 }
  0xfc   : > { %v558_v46 = vadd.f32 %v1679_v27, %v557_v44  ;;  %1314 = vmatmul.msk.bf16.gmra.mxu1 %vm650_vm1, %v616_v43 }
  0xfd   : > { %v510_v47 = vpop.f32.mrf.mxu0 }
  0xfe   : > { %v605_v48 = vmax.f32 %v558_v46, 0.0  ;;  %v511_v51 = vadd.f32 %v1679_v27, %v510_v47 }
 0x100   : > { %v626_v49 = vpack.c.bf16 %v605_v48, %v604_v45  ;;  %v586_v54 = vmax.f32 %v511_v51, 0.0 }
 0x102   : > { %1324 = vmatmul.msk.bf16.gmra.mxu3 %vm650_vm1, %v626_v49 }
 0x103   : > { %v560_v50 = vpop.f32.mrf.mxu2 }
 0x104   : > { %v561_v55 = vadd.f32 %v1679_v27, %v560_v50 }
 0x105   : > { %v512_v52 = vpop.f32.mrf.mxu0 }
 0x106   : > { %v513_v53 = vadd.f32 %v1679_v27, %v512_v52  ;;  %v606_v59 = vmax.f32 %v561_v55, 0.0 }
 0x108   : > { %v587_v56 = vmax.f32 %v513_v53, 0.0 }
 0x10a   : > { %v617_v57 = vpack.c.bf16 %v587_v56, %v586_v54 }
 0x10b   : > { %v562_v58 = vpop.f32.mrf.mxu2 }
 0x10c   : > { %v563_v60 = vadd.f32 %v1679_v27, %v562_v58  ;;  %1315 = vmatmul.msk.bf16.gmra.mxu1 %vm650_vm1, %v617_v57 }
 0x10d   : > { %v515_v61 = vpop.f32.mrf.mxu0 }
 0x10e   : > { %v607_v62 = vmax.f32 %v563_v60, 0.0  ;;  %v516_v1 = vadd.f32 %v1679_v27, %v515_v61 }
 0x110   : > { %v627_v63 = vpack.c.bf16 %v607_v62, %v606_v59  ;;  %v588_v4 = vmax.f32 %v516_v1, 0.0 }
 0x112   : > { %1325 = vmatmul.msk.bf16.gmra.mxu3 %vm650_vm1, %v627_v63 }
 0x113   : > { %v565_v0 = vpop.f32.mrf.mxu2 }
 0x114   : > { %v566_v5 = vadd.f32 %v1679_v27, %v565_v0 }
 0x115   : > { %v517_v2 = vpop.f32.mrf.mxu0 }
 0x116   : > { %v518_v3 = vadd.f32 %v1679_v27, %v517_v2  ;;  %v608_v9 = vmax.f32 %v566_v5, 0.0 }
 0x118   : > { %v589_v6 = vmax.f32 %v518_v3, 0.0 }
 0x11a   : > { %v618_v7 = vpack.c.bf16 %v589_v6, %v588_v4 }
 0x11b   : > { %v567_v8 = vpop.f32.mrf.mxu2 }
 0x11c   : > { %v568_v10 = vadd.f32 %v1679_v27, %v567_v8  ;;  %1316 = vmatmul.msk.bf16.gmra.mxu1 %vm650_vm1, %v618_v7 }
 0x11d   : > { %v520_v11 = vpop.f32.mrf.mxu0 }
 0x11e   : > { %v609_v12 = vmax.f32 %v568_v10, 0.0  ;;  %v521_v15 = vadd.f32 %v1679_v27, %v520_v11 }
 0x120   : > { %v628_v13 = vpack.c.bf16 %v609_v12, %v608_v9  ;;  %v590_v20 = vmax.f32 %v521_v15, 0.0 }
 0x122   : > { %1326 = vmatmul.msk.bf16.gmra.mxu3 %vm650_vm1, %v628_v13 }
 0x123   : > { %v570_v14 = vpop.f32.mrf.mxu2 }
 0x124   : > { %v571_v19 = vadd.f32 %v1679_v27, %v570_v14 }
 0x125   : > { %v522_v16 = vpop.f32.mrf.mxu0 }
 0x126   : > { %v523_v17 = vadd.f32 %v1679_v27, %v522_v16  ;;  %v610_v25 = vmax.f32 %v571_v19, 0.0 }
 0x128   : > { %v591_v21 = vmax.f32 %v523_v17, 0.0  ;;  %v629_v29 = vpack.c.bf16 %v610_v25, %v610_v25 }
 0x129   : > { %v717_v22 = vpop.f32.mrf.mxu1 }
 0x12a   : > { %v619_v23 = vpack.c.bf16 %v591_v21, %v590_v20  ;;  %v718_v24 = vadd.f32 %v1739_v18, %v717_v22 }
 0x12b   : > { %v572_v26 = vpop.f32.mrf.mxu2 }
 0x12c   : > { %812 = vst.msk [vmem:[%s1743_s18] sm:$0xff] %vm811_vm2, %v718_v24  ;;  %1317 = vmatmul.msk.bf16.gmra.mxu1 %vm650_vm1, %v619_v23 }
 0x12d   : > { %v525_v28 = vpop.f32.mrf.mxu0 }
 0x12e   : > { %v526_v32 = vadd.f32 %v1679_v27, %v525_v28 }
 0x130   : > { %v592_v37 = vmax.f32 %v526_v32, 0.0 }
 0x131   : > { %v719_v30 = vpop.f32.mrf.mxu1 }
 0x132   : > { %v720_v31 = vadd.f32 %v1739_v18, %v719_v30  ;;  %1327 = vmatmul.msk.bf16.gmra.mxu3 %vm650_vm1, %v629_v29 }
 0x134   : > { %813 = vst.msk [vmem:[%s1743_s18 + $0x8] sm:$0xff] %vm811_vm2, %v720_v31 }
 0x135   : > { %v527_v33 = vpop.f32.mrf.mxu0  ;;  %v767_v34 = vpop.f32.mrf.mxu3 }
 0x136   : > { %v528_v35 = vadd.f32 %v1679_v27, %v527_v33  ;;  %v768_v36 = vadd.f32 %v1739_v18, %v767_v34 }
 0x138   : > { %v593_v38 = vmax.f32 %v528_v35, 0.0  ;;  %832 = vst.msk [vmem:[%s1743_s18 + $0xa0] sm:$0xff] %vm811_vm2, %v768_v36 }
 0x139   : > { %v722_v39 = vpop.f32.mrf.mxu1 }
 0x13a   : > { %v620_v40 = vpack.c.bf16 %v593_v38, %v592_v37  ;;  %v723_v41 = vadd.f32 %v1739_v18, %v722_v39 }
 0x13c   : > { %814 = vst.msk [vmem:[%s1743_s18 + $0x10] sm:$0xff] %vm811_vm2, %v723_v41  ;;  %1318 = vmatmul.msk.bf16.gmra.mxu1 %vm650_vm1, %v620_v40 }
 0x13d   : > { %v769_v42 = vpop.f32.mrf.mxu3 }
 0x13e   : > { %v770_v27 = vadd.f32 %v1739_v18, %v769_v42 }
 0x140   : > { %833 = vst.msk [vmem:[%s1743_s18 + $0xa8] sm:$0xff] %vm811_vm2, %v770_v27 }
 0x141   : > { %v724_v43 = vpop.f32.mrf.mxu1 }
 0x142   : > { %v725_v44 = vadd.f32 %v1739_v18, %v724_v43 }
 0x144   : > { %815 = vst.msk [vmem:[%s1743_s18 + $0x18] sm:$0xff] %vm811_vm2, %v725_v44 }
 0x145   : > { %v772_v45 = vpop.f32.mrf.mxu3 }
 0x146   : > { %v773_v46 = vadd.f32 %v1739_v18, %v772_v45 }
 0x148   : > { %834 = vst.msk [vmem:[%s1743_s18 + $0xb0] sm:$0xff] %vm811_vm2, %v773_v46 }
 0x149   : > { %v727_v47 = vpop.f32.mrf.mxu1 }
 0x14a   : > { %v728_v48 = vadd.f32 %v1739_v18, %v727_v47 }
 0x14c   : > { %816 = vst.msk [vmem:[%s1743_s18 + $0x20] sm:$0xff] %vm811_vm2, %v728_v48 }
 0x14d   : > { %v774_v49 = vpop.f32.mrf.mxu3 }
 0x14e   : > { %v775_v50 = vadd.f32 %v1739_v18, %v774_v49 }
 0x150   : > { %835 = vst.msk [vmem:[%s1743_s18 + $0xb8] sm:$0xff] %vm811_vm2, %v775_v50 }
 0x151   : > { %v729_v51 = vpop.f32.mrf.mxu1 }
 0x152   : > { %v730_v52 = vadd.f32 %v1739_v18, %v729_v51 }
 0x154   : > { %817 = vst.msk [vmem:[%s1743_s18 + $0x28] sm:$0xff] %vm811_vm2, %v730_v52 }
 0x155   : > { %v777_v53 = vpop.f32.mrf.mxu3 }
 0x156   : > { %v778_v54 = vadd.f32 %v1739_v18, %v777_v53 }
 0x158   : > { %836 = vst.msk [vmem:[%s1743_s18 + $0xc0] sm:$0xff] %vm811_vm2, %v778_v54 }
 0x159   : > { %v732_v55 = vpop.f32.mrf.mxu1 }
 0x15a   : > { %v733_v56 = vadd.f32 %v1739_v18, %v732_v55 }
 0x15c   : > { %818 = vst.msk [vmem:[%s1743_s18 + $0x30] sm:$0xff] %vm811_vm2, %v733_v56 }
 0x15d   : > { %v779_v57 = vpop.f32.mrf.mxu3 }
 0x15e   : > { %v780_v58 = vadd.f32 %v1739_v18, %v779_v57 }
 0x160   : > { %837 = vst.msk [vmem:[%s1743_s18 + $0xc8] sm:$0xff] %vm811_vm2, %v780_v58 }
 0x161   : > { %v734_v59 = vpop.f32.mrf.mxu1 }
 0x162   : > { %v735_v60 = vadd.f32 %v1739_v18, %v734_v59 }
 0x164   : > { %819 = vst.msk [vmem:[%s1743_s18 + $0x38] sm:$0xff] %vm811_vm2, %v735_v60 }
 0x165   : > { %v782_v61 = vpop.f32.mrf.mxu3 }
 0x166   : > { %v783_v62 = vadd.f32 %v1739_v18, %v782_v61 }
 0x168   : > { %838 = vst.msk [vmem:[%s1743_s18 + $0xd0] sm:$0xff] %vm811_vm2, %v783_v62 }
 0x169   : > { %v737_v63 = vpop.f32.mrf.mxu1 }
 0x16a   : > { %v738_v0 = vadd.f32 %v1739_v18, %v737_v63 }
 0x16c   : > { %820 = vst.msk [vmem:[%s1743_s18 + $0x40] sm:$0xff] %vm811_vm2, %v738_v0 }
 0x16d   : > { %v784_v1 = vpop.f32.mrf.mxu3 }
 0x16e   : > { %v785_v2 = vadd.f32 %v1739_v18, %v784_v1 }
 0x170   : > { %839 = vst.msk [vmem:[%s1743_s18 + $0xd8] sm:$0xff] %vm811_vm2, %v785_v2 }
 0x171   : > { %v739_v3 = vpop.f32.mrf.mxu1 }
 0x172   : > { %v740_v4 = vadd.f32 %v1739_v18, %v739_v3 }
 0x174   : > { %821 = vst.msk [vmem:[%s1743_s18 + $0x48] sm:$0xff] %vm811_vm2, %v740_v4 }
 0x175   : > { %v787_v5 = vpop.f32.mrf.mxu3 }
 0x176   : > { %v788_v6 = vadd.f32 %v1739_v18, %v787_v5 }
 0x178   : > { %840 = vst.msk [vmem:[%s1743_s18 + $0xe0] sm:$0xff] %vm811_vm2, %v788_v6 }
 0x179   : > { %v742_v7 = vpop.f32.mrf.mxu1 }
 0x17a   : > { %v743_v8 = vadd.f32 %v1739_v18, %v742_v7 }
 0x17c   : > { %822 = vst.msk [vmem:[%s1743_s18 + $0x50] sm:$0xff] %vm811_vm2, %v743_v8 }
 0x17d   : > { %v789_v9 = vpop.f32.mrf.mxu3 }
 0x17e   : > { %v790_v10 = vadd.f32 %v1739_v18, %v789_v9 }
 0x180   : > { %841 = vst.msk [vmem:[%s1743_s18 + $0xe8] sm:$0xff] %vm811_vm2, %v790_v10 }
 0x181   : > { %v744_v11 = vpop.f32.mrf.mxu1 }
 0x182   : > { %v745_v12 = vadd.f32 %v1739_v18, %v744_v11 }
 0x184   : > { %823 = vst.msk [vmem:[%s1743_s18 + $0x58] sm:$0xff] %vm811_vm2, %v745_v12 }
 0x185   : > { %v792_v13 = vpop.f32.mrf.mxu3 }
 0x186   : > { %v793_v14 = vadd.f32 %v1739_v18, %v792_v13 }
 0x188   : > { %842 = vst.msk [vmem:[%s1743_s18 + $0xf0] sm:$0xff] %vm811_vm2, %v793_v14 }
 0x189   : > { %v747_v15 = vpop.f32.mrf.mxu1 }
 0x18a   : > { %v748_v16 = vadd.f32 %v1739_v18, %v747_v15 }
 0x18c   : > { %824 = vst.msk [vmem:[%s1743_s18 + $0x60] sm:$0xff] %vm811_vm2, %v748_v16 }
 0x18d   : > { %v794_v17 = vpop.f32.mrf.mxu3 }
 0x18e   : > { %v795_v19 = vadd.f32 %v1739_v18, %v794_v17 }
 0x190   : > { %843 = vst.msk [vmem:[%s1743_s18 + $0xf8] sm:$0xff] %vm811_vm2, %v795_v19 }
 0x191   : > { %v749_v20 = vpop.f32.mrf.mxu1 }
 0x192   : > { %v750_v21 = vadd.f32 %v1739_v18, %v749_v20 }
 0x194   : > { %825 = vst.msk [vmem:[%s1743_s18 + $0x68] sm:$0xff] %vm811_vm2, %v750_v21 }
 0x195   : > { %v797_v22 = vpop.f32.mrf.mxu3 }
 0x196   : > { %v798_v23 = vadd.f32 %v1739_v18, %v797_v22 }
 0x198   : > { %844 = vst.msk [vmem:[%s1743_s18 + $0x100] sm:$0xff] %vm811_vm2, %v798_v23 }
 0x199   : > { %v752_v24 = vpop.f32.mrf.mxu1 }
 0x19a   : > { %v753_v25 = vadd.f32 %v1739_v18, %v752_v24 }
 0x19c   : > { %826 = vst.msk [vmem:[%s1743_s18 + $0x70] sm:$0xff] %vm811_vm2, %v753_v25 }
 0x19d   : > { %v799_v26 = vpop.f32.mrf.mxu3 }
 0x19e   : > { %v800_v28 = vadd.f32 %v1739_v18, %v799_v26 }
 0x1a0   : > { %845 = vst.msk [vmem:[%s1743_s18 + $0x108] sm:$0xff] %vm811_vm2, %v800_v28 }
 0x1a1   : > { %v754_v29 = vpop.f32.mrf.mxu1 }
 0x1a2   : > { %v755_v30 = vadd.f32 %v1739_v18, %v754_v29 }
 0x1a4   : > { %827 = vst.msk [vmem:[%s1743_s18 + $0x78] sm:$0xff] %vm811_vm2, %v755_v30 }
 0x1a5   : > { %v802_v31 = vpop.f32.mrf.mxu3 }
 0x1a6   : > { %v803_v32 = vadd.f32 %v1739_v18, %v802_v31 }
 0x1a8   : > { %846 = vst.msk [vmem:[%s1743_s18 + $0x110] sm:$0xff] %vm811_vm2, %v803_v32 }
 0x1a9   : > { %v757_v33 = vpop.f32.mrf.mxu1 }
 0x1aa   : > { %v758_v34 = vadd.f32 %v1739_v18, %v757_v33 }
 0x1ac   : > { %828 = vst.msk [vmem:[%s1743_s18 + $0x80] sm:$0xff] %vm811_vm2, %v758_v34 }
 0x1ad   : > { %v804_v35 = vpop.f32.mrf.mxu3 }
 0x1ae   : > { %v805_v36 = vadd.f32 %v1739_v18, %v804_v35 }
 0x1b0   : > { %847 = vst.msk [vmem:[%s1743_s18 + $0x118] sm:$0xff] %vm811_vm2, %v805_v36 }
 0x1b1   : > { %v759_v37 = vpop.f32.mrf.mxu1 }
 0x1b2   : > { %v760_v38 = vadd.f32 %v1739_v18, %v759_v37 }
 0x1b4   : > { %829 = vst.msk [vmem:[%s1743_s18 + $0x88] sm:$0xff] %vm811_vm2, %v760_v38 }
 0x1b5   : > { %v807_v39 = vpop.f32.mrf.mxu3 }
 0x1b6   : > { %v808_v40 = vadd.f32 %v1739_v18, %v807_v39 }
 0x1b8   : > { %848 = vst.msk [vmem:[%s1743_s18 + $0x120] sm:$0xff] %vm811_vm2, %v808_v40 }
 0x1b9   : > { %v762_v41 = vpop.f32.mrf.mxu1 }
 0x1ba   : > { %v763_v42 = vadd.f32 %v1739_v18, %v762_v41 }
 0x1bc   : > { %830 = vst.msk [vmem:[%s1743_s18 + $0x90] sm:$0xff] %vm811_vm2, %v763_v42 }
 0x1bd   : > { %v809_v27 = vpop.f32.mrf.mxu3 }
 0x1c0   : > { %855 = sbr.rel (!%p1610_p4) target bundleno = 517 (0x205), region = 44 }
 0x1c1   : > { %v764_v43 = vpop.f32.mrf.mxu1 }
 0x1c2   : > { %v765_v44 = vadd.f32 %v1739_v18, %v764_v43 }
 0x1c4   : > { %831 = vst.msk [vmem:[%s1743_s18 + $0x98] sm:$0xff] %vm811_vm2, %v765_v44 }
 0x1c5   : > { %s2018_s8 = smov (!%p858_p8, %s857_s8), 37 }
 0x1c6   : > { %s1328_s13 = sshll.u32 %s2018_s8, 3 }
 0x1c7   : > { %p1331_p9 = scmp.eq.s32.totalorder %s1328_s13, 0 }
 0x1c8   : > { %s1873_s14 = sshrl.u32 (!%p1331_p9), %s2018_s8, 5 }
 0x1c9   : > { %866 = sbr.rel (%p1331_p9) target bundleno = 517 (0x205), region = 48  ;;  %p1332_p10 = scmp.le.s32.totalorder (!%p1331_p9), %s1873_s14, 0 }
 0x1ce   : > { %1145 = sbr.rel (%p1332_p10) target bundleno = 500 (0x1f4), region = 124  ;;  %s2009_s21 = smov (!%p1332_p10), %s1867_s12 }
 0x1cf   : > { %s2010_s26 = smov (!%p1332_p10), %s1743_s18  ;;  %s1882_s29 = smov (!%p1332_p10), 0  }
 0x1d0   : > { %s1884_s15 = smov (!%p1332_p10), 0  }
 0x1d3 LB: >> { %v991_v18 = vld [vmem:[%s1529_s26] sm:$0xff]  ;;  %v993_v45 = vld [vmem:[%s1529_s26 + $0x8] sm:$0xff]  ;;  %v995_v46 = vld [vmem:[%s1529_s26 + $0x10] sm:$0xff]  ;;  %s1055_s16 = sadd.s32 1, %s1533_s29  ;;  %s985_s15 = sadd.s32 1, %s1537_s15   ;;  %s1537_s15 = sphi %s1884_s15, %s985_s15   ;;  %s1533_s29 = sphi %s1882_s29, %s2013_s29   ;;  %s1529_s26 = sphi %s2010_s26, %s2012_s26   ;;  %s1525_s21 = sphi %s2009_s21, %s2011_s21  }
 0x1d4   : >> { %992 = vst [vmem:[%s1525_s21] sm:$0xff] %v991_v18  ;;  %v997_v47 = vld [vmem:[%s1529_s26 + $0x18] sm:$0xff]  ;;  %p1056_p11 = scmp.ge.s32.totalorder %s1055_s16, %s1873_s14  ;;  %v999_v48 = vld [vmem:[%s1529_s26 + $0x20] sm:$0xff]  ;;  %v1001_v49 = vld [vmem:[%s1529_s26 + $0x28] sm:$0xff]  ;;  %p984_p12 = scmp.ge.s32.totalorder %s985_s15, %s1873_s14 }
 0x1d5   : >> { %994 = vst [vmem:[%s1525_s21 + $0x8] sm:$0xff] %v993_v45  ;;  %v1003_v50 = vld [vmem:[%s1529_s26 + $0x30] sm:$0xff]  ;;  %v1005_v51 = vld [vmem:[%s1529_s26 + $0x38] sm:$0xff]  ;;  %v1007_v52 = vld [vmem:[%s1529_s26 + $0x40] sm:$0xff] }
 0x1d6   : >> { %996 = vst [vmem:[%s1525_s21 + $0x10] sm:$0xff] %v995_v46  ;;  %s2020_s16 = smov (%p1056_p11, %s1055_s16), 0  ;;  %v1009_v53 = vld [vmem:[%s1529_s26 + $0x48] sm:$0xff]  ;;  %v1011_v54 = vld [vmem:[%s1529_s26 + $0x50] sm:$0xff]  ;;  %v1013_v55 = vld [vmem:[%s1529_s26 + $0x58] sm:$0xff] }
 0x1d7   : >> { %998 = vst [vmem:[%s1525_s21 + $0x18] sm:$0xff] %v997_v47  ;;  %s1333_s17 = sshll.u32 %s2020_s16, 8  ;;  %v1015_v56 = vld [vmem:[%s1529_s26 + $0x60] sm:$0xff]  ;;  %v1017_v57 = vld [vmem:[%s1529_s26 + $0x68] sm:$0xff]  ;;  %v1019_v58 = vld [vmem:[%s1529_s26 + $0x70] sm:$0xff]  ;;  %s2013_s29 = smov %s2020_s16 }
 0x1d8   : >> { %1000 = vst [vmem:[%s1525_s21 + $0x20] sm:$0xff] %v999_v48  ;;  %s1916_s20 = scalar_lea.vmem %s1743_s18, %s1333_s17 [#allocation2]   ;;  %s1919_s23 = scalar_lea.vmem %s1867_s12, %s1333_s17   ;;  %v1021_v59 = vld [vmem:[%s1529_s26 + $0x78] sm:$0xff]  ;;  %v1023_v60 = vld [vmem:[%s1529_s26 + $0x80] sm:$0xff]  ;;  %v1025_v61 = vld [vmem:[%s1529_s26 + $0x88] sm:$0xff] }
 0x1d9   : >> { %1002 = vst [vmem:[%s1525_s21 + $0x28] sm:$0xff] %v1001_v49  ;;  %v1027_v62 = vld [vmem:[%s1529_s26 + $0x90] sm:$0xff]  ;;  %v1029_v63 = vld [vmem:[%s1529_s26 + $0x98] sm:$0xff]  ;;  %v1031_v0 = vld [vmem:[%s1529_s26 + $0xa0] sm:$0xff] }
 0x1da   : >> { %1004 = vst [vmem:[%s1525_s21 + $0x30] sm:$0xff] %v1003_v50  ;;  %v1033_v1 = vld [vmem:[%s1529_s26 + $0xa8] sm:$0xff]  ;;  %v1035_v2 = vld [vmem:[%s1529_s26 + $0xb0] sm:$0xff]  ;;  %v1037_v3 = vld [vmem:[%s1529_s26 + $0xb8] sm:$0xff] }
 0x1db   : >> { %1006 = vst [vmem:[%s1525_s21 + $0x38] sm:$0xff] %v1005_v51  ;;  %v1039_v4 = vld [vmem:[%s1529_s26 + $0xc0] sm:$0xff]  ;;  %v1041_v5 = vld [vmem:[%s1529_s26 + $0xc8] sm:$0xff]  ;;  %v1043_v6 = vld [vmem:[%s1529_s26 + $0xd0] sm:$0xff] }
 0x1dc   : >> { %1008 = vst [vmem:[%s1525_s21 + $0x40] sm:$0xff] %v1007_v52  ;;  %v1045_v7 = vld [vmem:[%s1529_s26 + $0xd8] sm:$0xff]  ;;  %v1047_v8 = vld [vmem:[%s1529_s26 + $0xe0] sm:$0xff]  ;;  %v1049_v9 = vld [vmem:[%s1529_s26 + $0xe8] sm:$0xff] }
 0x1dd   : >> { %1010 = vst [vmem:[%s1525_s21 + $0x48] sm:$0xff] %v1009_v53  ;;  %v1051_v10 = vld [vmem:[%s1529_s26 + $0xf0] sm:$0xff]  ;;  %v1053_v11 = vld [vmem:[%s1529_s26 + $0xf8] sm:$0xff]  ;;  %s2012_s26 = smov %s1916_s20 }
 0x1de   : >> { %1012 = vst [vmem:[%s1525_s21 + $0x50] sm:$0xff] %v1011_v54 }
 0x1df   : >> { %1014 = vst [vmem:[%s1525_s21 + $0x58] sm:$0xff] %v1013_v55 }
 0x1e0   : >> { %1016 = vst [vmem:[%s1525_s21 + $0x60] sm:$0xff] %v1015_v56 }
 0x1e1   : >> { %1018 = vst [vmem:[%s1525_s21 + $0x68] sm:$0xff] %v1017_v57 }
 0x1e2   : >> { %1020 = vst [vmem:[%s1525_s21 + $0x70] sm:$0xff] %v1019_v58 }
 0x1e3   : >> { %1022 = vst [vmem:[%s1525_s21 + $0x78] sm:$0xff] %v1021_v59 }
 0x1e4   : >> { %1024 = vst [vmem:[%s1525_s21 + $0x80] sm:$0xff] %v1023_v60 }
 0x1e5   : >> { %1026 = vst [vmem:[%s1525_s21 + $0x88] sm:$0xff] %v1025_v61 }
 0x1e6   : >> { %1028 = vst [vmem:[%s1525_s21 + $0x90] sm:$0xff] %v1027_v62 }
 0x1e7   : >> { %1030 = vst [vmem:[%s1525_s21 + $0x98] sm:$0xff] %v1029_v63 }
 0x1e8   : >> { %1032 = vst [vmem:[%s1525_s21 + $0xa0] sm:$0xff] %v1031_v0 }
 0x1e9   : >> { %1034 = vst [vmem:[%s1525_s21 + $0xa8] sm:$0xff] %v1033_v1 }
 0x1ea   : >> { %1036 = vst [vmem:[%s1525_s21 + $0xb0] sm:$0xff] %v1035_v2 }
 0x1eb   : >> { %1038 = vst [vmem:[%s1525_s21 + $0xb8] sm:$0xff] %v1037_v3 }
 0x1ec   : >> { %1040 = vst [vmem:[%s1525_s21 + $0xc0] sm:$0xff] %v1039_v4 }
 0x1ed   : >> { %1042 = vst [vmem:[%s1525_s21 + $0xc8] sm:$0xff] %v1041_v5 }
 0x1ee   : >> { %1044 = vst [vmem:[%s1525_s21 + $0xd0] sm:$0xff] %v1043_v6 }
 0x1ef   : >> { %1046 = vst [vmem:[%s1525_s21 + $0xd8] sm:$0xff] %v1045_v7  ;;  %987 = sbr.rel (!%p984_p12) target bundleno = 467 (0x1d3), region = 130 }
 0x1f0   : >> { %1048 = vst [vmem:[%s1525_s21 + $0xe0] sm:$0xff] %v1047_v8 }
 0x1f1   : >> { %1050 = vst [vmem:[%s1525_s21 + $0xe8] sm:$0xff] %v1049_v9 }
 0x1f2   : >> { %1052 = vst [vmem:[%s1525_s21 + $0xf0] sm:$0xff] %v1051_v10 }
 0x1f3   : >> { %1054 = vst [vmem:[%s1525_s21 + $0xf8] sm:$0xff] %v1053_v11  ;;  %s2011_s21 = smov %s1919_s23 }
 0x1f4 PF: > { %s1984_s24 = sand.u32 31, %s2018_s8   ;;  %s1368_s27 = sshll.u32 %s1873_s14, 8 }
 0x1f5   : > { %s1066_s28 = scalar_lea.vmem %s1743_s18, %s1368_s27 [#allocation2]   ;;  %s1068_s30 = scalar_lea.vmem %s1867_s12, %s1368_s27  }
 0x1f6   : > { %p1338_p13 = scmp.le.s32.totalorder %s1984_s24, 0 }
 0x1f7   : > { %s1539_s6 = smov (!%p1338_p13), %s1068_s30   ;;  %s1543_s7 = smov (!%p1338_p13), %s1066_s28  }
 0x1f8   : > { %1159 = sbr.rel (%p1338_p13) target bundleno = 517 (0x205), region = 135  ;;  %s1547_s9 = smov (!%p1338_p13), 0  }
 0x1f9   : > { %s1551_s10 = smov (!%p1338_p13), 0  }
 0x1fd LB: >> { %v1078_v12 = vld [vmem:[%s1545_s7] sm:$0xff]  ;;  %s1080_s8 = sadd.s32 1, %s1549_s9  ;;  %s1072_s10 = sadd.s32 1, %s1553_s10   ;;  %s1553_s10 = sphi %s1551_s10, %s1072_s10   ;;  %s1549_s9 = sphi %s1547_s9, %s1548_s9   ;;  %s1545_s7 = sphi %s1543_s7, %s1085_s7   ;;  %s1541_s6 = sphi %s1539_s6, %s1086_s6  }
 0x1fe   : >> { %1079 = vst [vmem:[%s1541_s6] sm:$0xff] %v1078_v12  ;;  %p1081_p0 = scmp.ge.s32.totalorder %s1080_s8, %s1984_s24  ;;  %p1071_p1 = scmp.ge.s32.totalorder %s1072_s10, %s1984_s24 }
 0x200   : >> { %s2022_s8 = smov (%p1081_p0, %s1080_s8), 0  ;;  %1074 = sbr.rel (!%p1071_p1) target bundleno = 509 (0x1fd), region = 141 }
 0x201   : >> { %s1339_s18 = sshll.u32 %s2022_s8, 3  ;;  %s1548_s9 = smov %s2022_s8  }
 0x202   : >> { %s1085_s7 = scalar_lea.vmem %s1066_s28, %s1339_s18 [#allocation2]   ;;  %s1086_s6 = scalar_lea.vmem %s1068_s30, %s1339_s18  }
 0x205 PF: > { %p12_p2 = scmp.ge.s32.totalorder %s1600_s22, 4   ;;  %s2014_s18 = smov %s1517_s19 }
 0x206   : > { %s2015_s19 = smov %s1608_s25  ;;  %s2016_s20 = smov %s1600_s22 }
 0x207   :  { %14 = sbr.rel (!%p12_p2) target bundleno = 2 (0x2), region = 152 }

</bundles_post_ra>
